<compile_context>
chip_gen: v7x
topology: tpu7x:2x2x1
jax: 0.10.0
libtpu: 0.0.40
codegen_flags: <defaults>
</compile_context>

<pallas_src>
import functools
import math

import jax
import jax.numpy as jnp
from jax import lax
from jax.experimental import pallas as pl
from jax.experimental.pallas import tpu as pltpu

_INV_SQRT2 = 1.0 / math.sqrt(2.0)


def _ln_linear_gelu_kernel(x_ref, g_ref, b_ref, w_ref, bias_ref, o_ref):
    # x_ref:    (R, C)  f32 row block, resident across all grid steps
    # g_ref:    (1, C)  f32 LayerNorm gamma, resident
    # b_ref:    (1, C)  f32 LayerNorm beta, resident
    # w_ref:    (C, tn) W^T tile (bf16 by default)
    # bias_ref: (1, tn) Linear bias tile (f32)
    # o_ref:    (R, tn) output tile
    x = x_ref[...]

    # LayerNorm: biased variance, eps=1e-6, affine in f32 (matches torch.nn.LayerNorm).
    mean = jnp.mean(x, axis=-1, keepdims=True)
    centered = x - mean
    var = jnp.mean(centered * centered, axis=-1, keepdims=True)
    xn = centered * lax.rsqrt(var + 1e-6)
    xa = xn * g_ref[...] + b_ref[...]

    # MXU matmul: operands in weight dtype (bf16 default), f32 accumulation.
    y = jnp.dot(xa.astype(w_ref.dtype), w_ref[...],
                preferred_element_type=jnp.float32) + bias_ref[...]

    # Exact GELU (approximate='none'): 0.5 * y * (1 + erf(y / sqrt(2))), f32.
    gelu = 0.5 * y * (1.0 + lax.erf(y * _INV_SQRT2))
    o_ref[...] = gelu.astype(o_ref.dtype)


def prepare_weight(weight, *, matmul_dtype=jnp.bfloat16):
    """One-time parameter setup (call OUTSIDE the per-step hot path).

    weight: (N, C) torch Linear layout  ->  returns (C, N) in matmul_dtype.
    """
    return jnp.asarray(weight).T.astype(matmul_dtype)


@functools.partial(jax.jit, static_argnames=("tn", "out_dtype"))
def layernorm_linear_gelu(x, gamma, beta, w_t, bias, *, tn=512,
                          out_dtype=jnp.float32):
    """Fused LayerNorm(C) -> Linear(C->N, bias) -> exact GELU.

    x: (B, H, W, C) float32 (channels-last, as in the torch module)
    gamma, beta: (C,)    w_t: (C, N) pre-prepared (see prepare_weight)    bias: (N,)
    Returns (B, H, W, N) in out_dtype.
    """
    B, H, W, C = x.shape
    Cw, N = w_t.shape
    assert Cw == C, (Cw, C)
    R = B * H * W
    assert N % tn == 0 and tn % 128 == 0, (N, tn)

    x2d = x.reshape(R, C)
    g2d = gamma.astype(jnp.float32).reshape(1, C)
    b2d = beta.astype(jnp.float32).reshape(1, C)
    bias2d = bias.astype(jnp.float32).reshape(1, N)

    w_bytes = C * N * jnp.dtype(w_t.dtype).itemsize
    out_bytes = R * N * jnp.dtype(out_dtype).itemsize
    cost = pl.CostEstimate(
        flops=2 * R * C * N + 10 * R * C + 4 * R * N,
        bytes_accessed=R * C * 4 + w_bytes + (N + 2 * C) * 4 + out_bytes,
        transcendentals=R * N,
    )

    grid = (N // tn,)

    out2d = pl.pallas_call(
        _ln_linear_gelu_kernel,
        out_shape=jax.ShapeDtypeStruct((R, N), out_dtype),
        grid_spec=pltpu.PrefetchScalarGridSpec(
            num_scalar_prefetch=0,
            grid=grid,
            in_specs=[
                pl.BlockSpec((R, C), lambda j: (0, 0)),    # x rows (resident)
                pl.BlockSpec((1, C), lambda j: (0, 0)),    # gamma (resident)
                pl.BlockSpec((1, C), lambda j: (0, 0)),    # beta (resident)
                pl.BlockSpec((C, tn), lambda j: (0, j)),   # W^T tile
                pl.BlockSpec((1, tn), lambda j: (0, j)),   # bias tile
            ],
            out_specs=pl.BlockSpec((R, tn), lambda j: (0, j)),
        ),
        compiler_params=pltpu.CompilerParams(
            dimension_semantics=("parallel",),
        ),
        cost_estimate=cost,
    )(x2d, g2d, b2d, w_t, bias2d)

    return out2d.reshape(B, H, W, N)


def _reference_f32(x, gamma, beta, weight, bias):
    """Exact f32 reference of the torch module."""
    mean = jnp.mean(x, axis=-1, keepdims=True)
    var = jnp.mean((x - mean) ** 2, axis=-1, keepdims=True)
    xn = (x - mean) * lax.rsqrt(var + 1e-6) * gamma + beta
    y = jnp.einsum("bhwc,nc->bhwn", xn, weight) + bias
    return 0.5 * y * (1.0 + lax.erf(y * _INV_SQRT2))


def _reference_matched(x, gamma, beta, weight, bias, matmul_dtype):
    """Reference using the same f32 affine + bf16 matmul operands as the kernel."""
    B, H, W, C = x.shape
    N = weight.shape[0]
    x2d = x.reshape(-1, C)
    mean = jnp.mean(x2d, axis=-1, keepdims=True)
    var = jnp.mean((x2d - mean) ** 2, axis=-1, keepdims=True)
    xa = (x2d - mean) * lax.rsqrt(var + 1e-6) * gamma + beta
    w_t = weight.T.astype(matmul_dtype)
    y = jnp.dot(xa.astype(matmul_dtype), w_t,
                preferred_element_type=jnp.float32) + bias
    y = 0.5 * y * (1.0 + lax.erf(y * _INV_SQRT2))
    return y.reshape(B, H, W, N)


if __name__ == "__main__":
    key = jax.random.PRNGKey(0)
    kx, kg, kb, kw, kbias = jax.random.split(key, 5)

    B, H, W, C, N = 1, 14, 14, 512, 2048

    x = jax.random.normal(kx, (B, H, W, C), dtype=jnp.float32)

    # Deterministic synthetic parameters (shapes match the torch module's __init__).
    gamma = 1.0 + 0.02 * jax.random.normal(kg, (C,), dtype=jnp.float32)
    beta = 0.02 * jax.random.normal(kb, (C,), dtype=jnp.float32)
    weight = jax.random.normal(kw, (N, C), dtype=jnp.float32) / math.sqrt(C)
    bias = 0.02 * jax.random.normal(kbias, (N,), dtype=jnp.float32)

    # One-time parameter prep (outside the hot path), then the fused call.
    w_t = jax.block_until_ready(prepare_weight(weight))

    out = layernorm_linear_gelu(x, gamma, beta, w_t, bias)
    out = jax.block_until_ready(out)
    assert out.shape == (B, H, W, N), out.shape

    # Tight check against a reference with the same bf16 matmul operands
    # (validates the kernel independently of bf16 quantization error).
    ref_matched = _reference_matched(x, gamma, beta, weight, bias, jnp.bfloat16)
    err_matched = float(jnp.max(jnp.abs(out - ref_matched)))
    assert err_matched < 2e-3, err_matched

    # Loose check against the exact f32 torch-equivalent reference (bf16 matmul
    # operands introduce ~1e-2-level absolute error on O(1) outputs).
    ref_f32 = _reference_f32(x, gamma, beta, weight, bias)
    err_f32 = float(jnp.max(jnp.abs(out - ref_f32)))
    assert err_f32 < 6e-2, err_f32

    print("KERNEL_OK")
</pallas_src>

<mosaic_0001>
module attributes {stable_mosaic.version = 11 : i64} {
  func.func @_ln_linear_gelu_kernel(%arg0: i32, %arg1: memref<196x512xf32, #tpu.memory_space<vmem>>, %arg2: memref<1x512xf32, #tpu.memory_space<vmem>>, %arg3: memref<1x512xf32, #tpu.memory_space<vmem>>, %arg4: memref<512x512xbf16, #tpu.memory_space<vmem>>, %arg5: memref<1x512xf32, #tpu.memory_space<vmem>>, %arg6: memref<196x512xf32, #tpu.memory_space<vmem>>) attributes {dimension_semantics = [#tpu.dimension_semantics<parallel>], iteration_bounds = array<i64: 4>, scalar_prefetch = 0 : i64, scratch_operands = 0 : i64, tpu.core_type = #tpu.core_type<tc>, window_params = [{pipeline_mode = #tpu.pipeline_mode<synchronous>, transform_indices = @transform_0, window_bounds = array<i64: 196, 512>}, {pipeline_mode = #tpu.pipeline_mode<synchronous>, transform_indices = @transform_1, window_bounds = array<i64: 1, 512>}, {pipeline_mode = #tpu.pipeline_mode<synchronous>, transform_indices = @transform_2, window_bounds = array<i64: 1, 512>}, {transform_indices = @transform_3, window_bounds = array<i64: 512, 512>}, {transform_indices = @transform_4, window_bounds = array<i64: 1, 512>}, {transform_indices = @transform_5, window_bounds = array<i64: 196, 512>}]} {
    %c0 = arith.constant 0 : index
    %c0_0 = arith.constant 0 : index
    %0 = vector.load %arg1[%c0, %c0_0] : memref<196x512xf32, #tpu.memory_space<vmem>>, vector<196x512xf32>
    %cst = arith.constant dense<0.000000e+00> : vector<196xf32>
    %1 = vector.multi_reduction <add>, %0, %cst [1] : vector<196x512xf32> to vector<196xf32>
    %2 = vector.shape_cast %1 : vector<196xf32> to vector<196x1xf32>
    %cst_1 = arith.constant 5.120000e+02 : f32
    %3 = vector.broadcast %cst_1 : f32 to vector<196x1xf32>
    %4 = arith.divf %2, %3 : vector<196x1xf32>
    %5 = vector.broadcast %4 : vector<196x1xf32> to vector<196x512xf32>
    %6 = arith.subf %0, %5 : vector<196x512xf32>
    %7 = arith.mulf %6, %6 : vector<196x512xf32>
    %cst_2 = arith.constant dense<0.000000e+00> : vector<196xf32>
    %8 = vector.multi_reduction <add>, %7, %cst_2 [1] : vector<196x512xf32> to vector<196xf32>
    %9 = vector.shape_cast %8 : vector<196xf32> to vector<196x1xf32>
    %cst_3 = arith.constant 5.120000e+02 : f32
    %10 = vector.broadcast %cst_3 : f32 to vector<196x1xf32>
    %11 = arith.divf %9, %10 : vector<196x1xf32>
    %cst_4 = arith.constant 9.99999997E-7 : f32
    %12 = vector.broadcast %cst_4 : f32 to vector<196x1xf32>
    %13 = arith.addf %11, %12 : vector<196x1xf32>
    %14 = math.rsqrt %13 : vector<196x1xf32>
    %15 = vector.broadcast %14 : vector<196x1xf32> to vector<196x512xf32>
    %16 = arith.mulf %6, %15 : vector<196x512xf32>
    %c0_5 = arith.constant 0 : index
    %c0_6 = arith.constant 0 : index
    %17 = vector.load %arg2[%c0_5, %c0_6] : memref<1x512xf32, #tpu.memory_space<vmem>>, vector<1x512xf32>
    %18 = vector.broadcast %17 : vector<1x512xf32> to vector<196x512xf32>
    %19 = arith.mulf %16, %18 : vector<196x512xf32>
    %c0_7 = arith.constant 0 : index
    %c0_8 = arith.constant 0 : index
    %20 = vector.load %arg3[%c0_7, %c0_8] : memref<1x512xf32, #tpu.memory_space<vmem>>, vector<1x512xf32>
    %21 = vector.broadcast %20 : vector<1x512xf32> to vector<196x512xf32>
    %22 = arith.addf %19, %21 : vector<196x512xf32>
    %23 = arith.truncf %22 : vector<196x512xf32> to vector<196x512xbf16>
    %c0_9 = arith.constant 0 : index
    %c0_10 = arith.constant 0 : index
    %24 = vector.load %arg4[%c0_9, %c0_10] : memref<512x512xbf16, #tpu.memory_space<vmem>>, vector<512x512xbf16>
    %cst_11 = arith.constant dense<0.000000e+00> : vector<196x512xf32>
    %25 = tpu.matmul %23, %24, %cst_11 {dimension_numbers = #tpu.dot_dimension_numbers<[1], [0], [0], [1], [0, 0, 1, 1], [], []>} : vector<196x512xbf16>, vector<512x512xbf16>, vector<196x512xf32> -> vector<196x512xf32>
    %c0_12 = arith.constant 0 : index
    %c0_13 = arith.constant 0 : index
    %26 = vector.load %arg5[%c0_12, %c0_13] : memref<1x512xf32, #tpu.memory_space<vmem>>, vector<1x512xf32>
    %27 = vector.broadcast %26 : vector<1x512xf32> to vector<196x512xf32>
    %28 = arith.addf %25, %27 : vector<196x512xf32>
    %cst_14 = arith.constant 5.000000e-01 : f32
    %29 = vector.broadcast %cst_14 : f32 to vector<196x512xf32>
    %30 = arith.mulf %29, %28 : vector<196x512xf32>
    %cst_15 = arith.constant 0.707106769 : f32
    %31 = vector.broadcast %cst_15 : f32 to vector<196x512xf32>
    %32 = arith.mulf %28, %31 : vector<196x512xf32>
    %33 = math.erf %32 : vector<196x512xf32>
    %cst_16 = arith.constant 1.000000e+00 : f32
    %34 = vector.broadcast %cst_16 : f32 to vector<196x512xf32>
    %35 = arith.addf %34, %33 : vector<196x512xf32>
    %36 = arith.mulf %30, %35 : vector<196x512xf32>
    %c0_17 = arith.constant 0 : index
    %c0_18 = arith.constant 0 : index
    %37 = vector.load %arg6[%c0_17, %c0_18] : memref<196x512xf32, #tpu.memory_space<vmem>>, vector<196x512xf32>
    tpu.vector_store %arg6[%c0_17, %c0_18], %36 {strides = array<i32>} : memref<196x512xf32, #tpu.memory_space<vmem>>, vector<196x512xf32>,
    return
  }
  func.func @transform_0(%arg0: i32) -> (i32, i32) {
    %c0_i32 = arith.constant 0 : i32
    %c0_i32_0 = arith.constant 0 : i32
    %c0_i32_1 = arith.constant 0 : i32
    return %c0_i32, %c0_i32_0 : i32, i32
  }
  func.func @transform_1(%arg0: i32) -> (i32, i32) {
    %c0_i32 = arith.constant 0 : i32
    %c0_i32_0 = arith.constant 0 : i32
    %c0_i32_1 = arith.constant 0 : i32
    return %c0_i32, %c0_i32_0 : i32, i32
  }
  func.func @transform_2(%arg0: i32) -> (i32, i32) {
    %c0_i32 = arith.constant 0 : i32
    %c0_i32_0 = arith.constant 0 : i32
    %c0_i32_1 = arith.constant 0 : i32
    return %c0_i32, %c0_i32_0 : i32, i32
  }
  func.func @transform_3(%arg0: i32) -> (i32, i32) {
    %c0_i32 = arith.constant 0 : i32
    %c0_i32_0 = arith.constant 0 : i32
    return %c0_i32, %arg0 : i32, i32
  }
  func.func @transform_4(%arg0: i32) -> (i32, i32) {
    %c0_i32 = arith.constant 0 : i32
    %c0_i32_0 = arith.constant 0 : i32
    return %c0_i32, %arg0 : i32, i32
  }
  func.func @transform_5(%arg0: i32) -> (i32, i32) {
    %c0_i32 = arith.constant 0 : i32
    %c0_i32_0 = arith.constant 0 : i32
    return %c0_i32, %arg0 : i32, i32
  }
}

</mosaic_0001>

<bundles_post_ra>
// kernel: layernorm_linear_gelu.1
= control target key start
LH: loop header
LB: loop body
LE: loop exit
PB: predicated region body
PF: predicated region fallthrough
CT: control target
= control target key end

     0   :  { %10 = vsyncpa [#allocation3], 0  ;;  %s7659_s0 = inlined_call_operand.vmem [shape: f32[196,512], index: 0, kind: input, shape index: {}]   ;;  %s7660_s1 = inlined_call_operand.vmem [shape: f32[1,512], index: 1, kind: input, shape index: {}]   ;;  %s7661_s2 = inlined_call_operand.vmem [shape: f32[1,512], index: 2, kind: input, shape index: {}]   ;;  %s7662_s3 = inlined_call_operand.hbm [shape: bf16[512,2048], index: 3, kind: input, shape index: {}]   ;;  %s7663_s4 = inlined_call_operand.vmem [shape: f32[1,2048], index: 4, kind: input, shape index: {}]   ;;  %s7664_s5 = inlined_call_operand.vmem [shape: f32[196,2048], index: 5, kind: output, shape index: {}]  }
   0x1   :  { %12 = vsyncpa [#allocation3 + $0x1], 0  ;;  %s4602_s18 = smov 0   ;;  %s4604_s19 = smov 0  }
   0x2   :  { %s4606_s20 = smov 0   ;;  %s4608_s21 = smov 0  }
   0x3 LB: > { %s4621_s22 = sadd.s32 4294967295, %s4566_s21   ;;  %s4624_s23 = sadd.s32 1, %s4566_s21   ;;  %s4566_s21 = sphi %s4608_s21, %s7976_s21   ;;  %s4562_s20 = sphi %s4606_s20, %s7975_s20   ;;  %s4558_s19 = sphi %s4604_s19, %s7974_s19   ;;  %s4554_s18 = sphi %s4602_s18, %s7973_s18  }
   0x4   : > { %s85_s24 = ssub.s32 %s4566_s21, %s4624_s23  ;;  %s88_s25 = sadd.s32 1, %s4562_s20 }
   0x5   : > { %p86_p0 = scmp.eq.s32.totalorder %s85_s24, 0  ;;  %p95_p1 = scmp.ne.s32.totalorder %s4562_s20, %s4558_s19 }
   0x6   : > { %p96_p2 = scmp.eq.s32.totalorder %s4566_s21, 0  ;;  %p101_p3 = scmp.ne.s32.totalorder %s4558_s19, %s4554_s18 }
   0x7   : > { %s4634_s26 = scalar_select %p86_p0, %s4562_s20, %s88_s25  }
   0x8   : > { %p4636_p4 = por %p96_p2, %p95_p1  ;;  %p102_p5 = scmp.eq.s32.totalorder %s4621_s22, 0 }
   0x9   : > { %p151_p6 = scmp.eq.s32.totalorder %s4621_s22, 3  ;;  %p4000_p8 = scmp.lt.s32.totalorder %s4566_s21, 4 }
   0xa   : > { %p4642_p7 = por %p102_p5, %p101_p3  ;;  %s186_s30 = sand.u32 1, %s4562_s20  }
   0xb   : > { %p4647_p9 = por %p151_p6, %p95_p1  ;;  %s3649_s6 = sshll.u32 %s186_s30, 10 }
   0xc   : > { %s3787_s7 = sshll.u32 %s4566_s21, 8  ;;  %s190_s11 = scalar_lea.vmem [#allocation2], %s3649_s6 }
   0xd   : > { %s7768_s29 = scalar_select %p4647_p9, 1, 0 }
   0xe   : > { %s4656_s10 = scalar_lea.hbm %s7662_s3, %s3787_s7  ;;  %s197_s12 = sshll.u32 %s190_s11, 4  ;;  %s4658_s12 = int_to_ptr.vmem [resolvable:$true] %s197_s12 }
   0xf   : > { %p4662_p10 = pnand %p4000_p8, %p4636_p4  ;;  %s4666_s14 = scalar_lea.sflag [#allocation3], %s186_s30 }
  0x10   : > { %s4502_s15 = scalar_lea.hbm %s4656_s10, 16384  ;;  %s4507_s18 = scalar_lea.hbm %s7662_s3, 65536 }
  0x11   : > { %p4503_p11 = scmp.ne.s32.totalorder %s4656_s10, %s4502_s15  ;;  %p4504_p12 = pneg %p4662_p10 }
  0x12   : > { %p4508_p1 = scmp.lt.u32.totalorder %s4656_s10, %s7662_s3  ;;  %p4509_p2 = scmp.lt.u32.totalorder %s4507_s18, %s4502_s15 }
  0x13   : > { %p4505_p13 = pnand %p4504_p12, %p4503_p11  ;;  %p4511_p4 = scmp.lt.u32.totalorder %s4502_s15, %s4656_s10 }
  0x14   : > { %p4510_p3 = por %p4509_p2, %p4508_p1 }
  0x15   : > { %p4506_p0 = pneg %p4505_p13 }
  0x16   : > { %p4512_p5 = por %p4511_p4, %p4510_p3 }
  0x18   : > { %p4513_p6 = pnand %p4512_p5, %p4506_p0 }
  0x1a   : > { %4516 = shalt.err (!%p4513_p6)
}
  0x1b   : > { %s4517_s27 = scalar_lea.vmem %s4658_s12, 16384  ;;  %s4568_s30 = smov [#allocation2]  }
  0x1c   : > { %p4518_p8 = scmp.ne.s32.totalorder %s4658_s12, %s4517_s27  ;;  %s4522_s6 = sshll.u32 %s4568_s30, 4  ;;  %s4523_s6 = int_to_ptr.vmem [resolvable:$false] %s4522_s6 }
  0x1d   : > { %s4524_s7 = scalar_lea.vmem %s4523_s6, 32768  ;;  %p4525_p9 = scmp.lt.s32.totalorder %s4658_s12, %s4523_s6 }
  0x1e   : > { %p4520_p11 = pnand %p4518_p8, %p4504_p12  ;;  %p4526_p1 = scmp.lt.s32.totalorder %s4524_s7, %s4517_s27 }
  0x20   : > { %p4521_p13 = pneg %p4520_p11  ;;  %p4527_p2 = por %p4526_p1, %p4525_p9 }
  0x22   : > { %p4528_p3 = pnand %p4527_p2, %p4521_p13 }
  0x24   : > { %4531 = shalt.err (!%p4528_p3)
}
  0x25   : > { %s4569_s8 = smov 1024   ;;  %s4570_s9 = smov 256  }
  0x26   : > { %s4571_s11 = smov 16   ;;  %p3652_p12 = scmp.ge.s32.totalorder %s4566_s21, 1 }
  0x27   : > { %3999 = dma.hbm_to_vmem [thread:$0]  (!%p4662_p10), %s4656_s10, 16384, %s4658_s12, %s4666_s14, %s4569_s8, %s4570_s9, %s4571_s11  }
  0x28   : > { %p213_p0 = scmp.lt.s32.totalorder %s4566_s21, 5 }
  0x2a   : > { %p214_p4 = pnand %p3652_p12, %p213_p0 }
  0x2c   : > { %217 = sbr.rel (%p214_p4) target bundleno = 974 (0x3ce), region = 40 }
  0x33   : > { %s4697_s15 = sand.u32 1, %s4558_s19  }
  0x34   : > { %s3653_s16 = sshll.u32 %s4697_s15, 10  ;;  %s220_s17 = scalar_lea.sflag [#allocation3], %s4697_s15 }
  0x35   : > { %s4701_s18 = scalar_lea.vmem [#allocation2], %s3653_s16 }
  0x36   : > { %4549 = dma.done.wait (%p4642_p7), %s220_s17, 16384  }
  0x37   : > { %4551 = vsyncadd (%p4642_p7), %s220_s17, 4294950912  ;;  %v4710_v0 = vld [vmem:[%s7659_s0] sm:$0xff]  ;;  %v4715_v1 = vld [vmem:[%s7659_s0 + $0x8] sm:$0xff]  ;;  %vm480_vm0 = vcmask 1043456   ;;  %s3993_s10 = smul.u32 800, %s4697_s15  ;;  %p7972_p9 = scmp.ne.s32.totalorder %s7768_s29, 0 }
  0x38   : > { %v4720_v2 = vld [vmem:[%s7659_s0 + $0x10] sm:$0xff]  ;;  %v360_v3 = vadd.f32 %v4715_v1, %v4710_v0  ;;  %v4727_v4 = vld [vmem:[%s7659_s0 + $0x20] sm:$0xff]  ;;  %v4732_v5 = vld [vmem:[%s7659_s0 + $0x28] sm:$0xff]  ;;  %s3788_s15 = sshll.u32 (%p7972_p9), %s4621_s22, 5 }
  0x39   : > { %v4737_v6 = vld [vmem:[%s7659_s0 + $0x18] sm:$0xff]  ;;  %v4742_v7 = vld [vmem:[%s7659_s0 + $0x30] sm:$0xff]  ;;  %v365_v8 = vadd.f32 %v4732_v5, %v4727_v4  ;;  %v4749_v9 = vld [vmem:[%s7659_s0 + $0x40] sm:$0xff]  ;;  %s6689_s12 = scalar_lea.vmem [#allocation4], %s3993_s10  ;;  %s7447_s14 = scalar_lea.vmem (%p7972_p9), %s7664_s5, %s3788_s15 }
  0x3a   : > { %v361_v10 = vadd.f32 %v360_v3, %v4720_v2  ;;  %v4755_v11 = vld [vmem:[%s7659_s0 + $0x38] sm:$0xff]  ;;  %v4760_v12 = vld [vmem:[%s7659_s0 + $0x48] sm:$0xff]  ;;  %v4765_v13 = vld [vmem:[%s7659_s0 + $0x50] sm:$0xff] }
  0x3b   : > { %v366_v14 = vadd.f32 %v365_v8, %v4742_v7  ;;  %v370_v15 = vadd.f32 %v4760_v12, %v4749_v9  ;;  %v4773_v16 = vld [vmem:[%s7659_s0 + $0x60] sm:$0xff]  ;;  %v4778_v17 = vld [vmem:[%s7659_s0 + $0x68] sm:$0xff]  ;;  %v4783_v18 = vld [vmem:[%s7659_s0 + $0x70] sm:$0xff] }
  0x3c   : > { %v362_v19 = vadd.f32 %v361_v10, %v4737_v6  ;;  %v4789_v20 = vld [vmem:[%s7659_s0 + $0x58] sm:$0xff]  ;;  %v375_v21 = vadd.f32 %v4778_v17, %v4773_v16  ;;  %v4796_v22 = vld [vmem:[%s7659_s0 + $0xa0] sm:$0xff]  ;;  %v4801_v23 = vld [vmem:[%s7659_s0 + $0xa8] sm:$0xff] }
  0x3d   : > { %v371_v24 = vadd.f32 %v370_v15, %v4765_v13  ;;  %v4807_v25 = vld [vmem:[%s7659_s0 + $0xb0] sm:$0xff]  ;;  %v385_v26 = vadd.f32 %v4801_v23, %v4796_v22  ;;  %v4814_v27 = vld [vmem:[%s7659_s0 + $0x80] sm:$0xff]  ;;  %v367_v28 = vadd.f32 %v366_v14, %v4755_v11  ;;  %v4820_v29 = vld [vmem:[%s7659_s0 + $0x78] sm:$0xff] }
  0x3e   : > { %363 = vadd.xlane.f32.xlu0 %v362_v19  ;;  %v376_v30 = vadd.f32 %v375_v21, %v4783_v18  ;;  %v4826_v31 = vld [vmem:[%s7659_s0 + $0x88] sm:$0xff]  ;;  %v4831_v32 = vld [vmem:[%s7659_s0 + $0x90] sm:$0xff]  ;;  %v4839_v35 = vld [vmem:[%s7659_s0 + $0xe0] sm:$0xff] }
  0x3f   : > { %v372_v33 = vadd.f32 %v371_v24, %v4789_v20  ;;  %v380_v34 = vadd.f32 %v4826_v31, %v4814_v27  ;;  %v4844_v36 = vld [vmem:[%s7659_s0 + $0xe8] sm:$0xff]  ;;  %v386_v37 = vadd.f32 %v385_v26, %v4807_v25  ;;  %v4850_v38 = vld [vmem:[%s7659_s0 + $0x98] sm:$0xff]  ;;  %v4855_v39 = vld [vmem:[%s7659_s0 + $0xc0] sm:$0xff] }
  0x40   : > { %v4860_v40 = vld [vmem:[%s7659_s0 + $0xc8] sm:$0xff]  ;;  %v377_v41 = vadd.f32 %v376_v30, %v4820_v29  ;;  %v4866_v42 = vld [vmem:[%s7659_s0 + $0xb8] sm:$0xff]  ;;  %v4872_v44 = vld [vmem:[%s7659_s0 + $0xf0] sm:$0xff]  ;;  %v395_v45 = vadd.f32 %v4844_v36, %v4839_v35 }
  0x41   : > { %373 = vadd.xlane.f32.xlu1 %v372_v33  ;;  %v381_v43 = vadd.f32 %v380_v34, %v4831_v32  ;;  %v4879_v46 = vld [vmem:[%s7659_s0 + $0xd0] sm:$0xff]  ;;  %v390_v47 = vadd.f32 %v4860_v40, %v4855_v39  ;;  %v4886_v48 = vld [vmem:[%s7659_s0 + $0xd8] sm:$0xff]  ;;  %v4891_v49 = vld [vmem:[%s7659_s0 + $0x120] sm:$0xff]  ;;  %v387_v57 = vadd.f32 %v386_v37, %v4866_v42 }
  0x42   : > { %7770 = vst [vmem:[#allocation6_spill] sm:$0xff] %v4879_v46  ;;  %368 = vadd.xlane.f32.xlu0 %v367_v28  ;;  %7771 = vst [vmem:[#allocation7_spill] sm:$0xff] %v4886_v48  ;;  %v4896_v50 = vld [vmem:[%s7659_s0 + $0x128] sm:$0xff]  ;;  %v4903_v53 = vld [vmem:[%s7659_s0 + $0x100] sm:$0xff]  ;;  %v396_v59 = vadd.f32 %v395_v45, %v4872_v44 }
  0x43   : > { %v382_v51 = vadd.f32 %v381_v43, %v4850_v38  ;;  %v391_v52 = vadd.f32 %v390_v47, %v4879_v46  ;;  %v4908_v54 = vld [vmem:[%s7659_s0 + $0x108] sm:$0xff]  ;;  %v4913_v55 = vld [vmem:[%s7659_s0 + $0x110] sm:$0xff]  ;;  %v4921_v58 = vld [vmem:[%s7659_s0 + $0xf8] sm:$0xff]  ;;  %v405_v61 = vadd.f32 %v4896_v50, %v4891_v49 }
  0x44   : > { %7772 = vst [vmem:[#allocation8_spill] sm:$0xff] %v4913_v55  ;;  %v400_v56 = vadd.f32 %v4908_v54, %v4903_v53  ;;  %v4927_v60 = vld [vmem:[%s7659_s0 + $0x130] sm:$0xff]  ;;  %v4934_v62 = vld [vmem:[%s7659_s0 + $0x140] sm:$0xff]  ;;  %v4946_v10 = vld [vmem:[%s7659_s0 + $0x168] sm:$0xff]  ;;  %v397_v28 = vadd.f32 %v396_v59, %v4921_v58 }
  0x45   : > { %378 = vadd.xlane.f32.xlu1 %v377_v41  ;;  %7773 = vst [vmem:[#allocation9_spill] sm:$0xff] %v4927_v60  ;;  %v392_v63 = vadd.f32 %v391_v52, %v4886_v48  ;;  %v4941_v8 = vld [vmem:[%s7659_s0 + $0x160] sm:$0xff]  ;;  %v4951_v14 = vld [vmem:[%s7659_s0 + $0x148] sm:$0xff]  ;;  %v4956_v15 = vld [vmem:[%s7659_s0 + $0x118] sm:$0xff]  ;;  %v406_v33 = vadd.f32 %v405_v61, %v4927_v60 }
  0x46   : > { %383 = vadd.xlane.f32.xlu0 %v382_v51  ;;  %v401_v3 = vadd.f32 %v400_v56, %v4913_v55  ;;  %7774 = vst [vmem:[#allocation10_spill] sm:$0xff] %v4956_v15  ;;  %v302_v19 = vld [vmem:[%s7659_s0 + $0x150] sm:$0xff]  ;;  %v410_v21 = vadd.f32 %v4951_v14, %v4934_v62  ;;  %v4966_v24 = vld [vmem:[%s7659_s0 + $0x180] sm:$0xff]  ;;  %v4971_v26 = vld [vmem:[%s7659_s0 + $0x188] sm:$0xff]  ;;  %v415_v37 = vadd.f32 %v4946_v10, %v4941_v8 }
  0x47   : > { %7775 = vst [vmem:[#allocation11_spill] sm:$0xff] %v4966_v24  ;;  %7776 = vst [vmem:[#allocation12_spill] sm:$0xff] %v4971_v26  ;;  %v4977_v30 = vld [vmem:[%s7659_s0 + $0x138] sm:$0xff]  ;;  %v4983_v34 = vld [vmem:[%s7659_s0 + $0x170] sm:$0xff]  ;;  %v420_v52 = vadd.f32 %v4971_v26, %v4966_v24 }
  0x48   : > { %7777 = vst [vmem:[#allocation13_spill] sm:$0xff] %v4977_v30  ;;  %7778 = vst [vmem:[#allocation14_spill] sm:$0xff] %v4983_v34  ;;  %v402_v41 = vadd.f32 %v401_v3, %v4956_v15  ;;  %v303_v43 = vld [vmem:[%s7659_s0 + $0x158] sm:$0xff]  ;;  %v411_v45 = vadd.f32 %v410_v21, %v302_v19  ;;  %v4994_v47 = vld [vmem:[%s7659_s0 + $0x1a0] sm:$0xff]  ;;  %v407_v61 = vadd.f32 %v406_v33, %v4977_v30 }
  0x49   : > { %388 = vadd.xlane.f32.xlu1 %v387_v57  ;;  %7779 = vst [vmem:[#allocation15_spill] sm:$0xff] %v4994_v47  ;;  %v4999_v51 = vld [vmem:[%s7659_s0 + $0x1a8] sm:$0xff]  ;;  %v310_v56 = vld [vmem:[%s7659_s0 + $0x190] sm:$0xff]  ;;  %v5009_v57 = vld [vmem:[%s7659_s0 + $0x1c0] sm:$0xff]  ;;  %v416_v3 = vadd.f32 %v415_v37, %v4983_v34 }
  0x4a   : > { %393 = vadd.xlane.f32.xlu0 %v392_v63  ;;  %7780 = vst [vmem:[#allocation16_spill] sm:$0xff] %v4999_v51  ;;  %7781 = vst [vmem:[#allocation17_spill] sm:$0xff] %v5009_v57  ;;  %v5014_v59 = vld [vmem:[%s7659_s0 + $0x1c8] sm:$0xff]  ;;  %v5020_v63 = vld [vmem:[%s7659_s0 + $0x178] sm:$0xff]  ;;  %v425_v21 = vadd.f32 %v4999_v51, %v4994_v47  ;;  %v412_v15 = vadd.f32 %v411_v45, %v303_v43  ;;  %v421_v33 = vadd.f32 %v420_v52, %v310_v56 }
  0x4b   : > { %7782 = vst [vmem:[#allocation18_spill] sm:$0xff] %v5014_v59  ;;  %7783 = vst [vmem:[#allocation19_spill] sm:$0xff] %v5020_v63  ;;  %v314_v19 = vld [vmem:[%s7659_s0 + $0x1b0] sm:$0xff]  ;;  %v5034_v55 = vld [vmem:[%s7659_s0 + $0x1e0] sm:$0xff]  ;;  %v430_v34 = vadd.f32 %v5014_v59, %v5009_v57  ;;  %v417_v52 = vadd.f32 %v416_v3, %v5020_v63 }
  0x4c   : > { %7784 = vst [vmem:[#allocation20_spill] sm:$0xff] %v5034_v55  ;;  %v5039_v37 = vld [vmem:[%s7659_s0 + $0x1e8] sm:$0xff]  ;;  %v5049_v43 = vld [vmem:[%s7659_s0 + $0x200] sm:$0xff]  ;;  %v315_v56 = vld [vmem:[%s7659_s0 + $0x1b8] sm:$0xff]  ;;  %v426_v30 = vadd.f32 %v425_v21, %v314_v19 }
  0x4d   : > { %398 = vadd.xlane.f32.xlu1 %v397_v28  ;;  %v311_v28 = vld [vmem:[%s7659_s0 + $0x198] sm:$0xff]  ;;  %7785 = vst [vmem:[#allocation21_spill] sm:$0xff] %v5039_v37  ;;  %7786 = vst [vmem:[#allocation22_spill] sm:$0xff] %v5049_v43  ;;  %v5054_v45 = vld [vmem:[%s7659_s0 + $0x208] sm:$0xff]  ;;  %v435_v59 = vadd.f32 %v5039_v37, %v5034_v55 }
  0x4e   : > { %403 = vadd.xlane.f32.xlu0 %v402_v41  ;;  %v318_v41 = vld [vmem:[%s7659_s0 + $0x1d0] sm:$0xff]  ;;  %7787 = vst [vmem:[#allocation23_spill] sm:$0xff] %v5054_v45  ;;  %v422_v57 = vadd.f32 %v421_v33, %v311_v28  ;;  %v5071_v3 = vld [vmem:[%s7659_s0 + $0x220] sm:$0xff]  ;;  %v5076_v19 = vld [vmem:[%s7659_s0 + $0x228] sm:$0xff]  ;;  %v440_v21 = vadd.f32 %v5054_v45, %v5049_v43  ;;  %v427_v63 = vadd.f32 %v426_v30, %v315_v56 }
  0x4f   : > { %v322_v60 = vld [vmem:[%s7659_s0 + $0x1f0] sm:$0xff]  ;;  %v431_v51 = vadd.f32 %v430_v34, %v318_v41  ;;  %v5086_v34 = vld [vmem:[%s7659_s0 + $0x240] sm:$0xff]  ;;  %v5091_v28 = vld [vmem:[%s7659_s0 + $0x248] sm:$0xff]  ;;  %v445_v55 = vadd.f32 %v5076_v19, %v5071_v3 }
  0x50   : > { %7788 = vst [vmem:[#allocation24_spill] sm:$0xff] %v5086_v34  ;;  %7789 = vst [vmem:[#allocation25_spill] sm:$0xff] %v5091_v28  ;;  %v323_v33 = vld [vmem:[%s7659_s0 + $0x1f8] sm:$0xff]  ;;  %v330_v41 = vld [vmem:[%s7659_s0 + $0x230] sm:$0xff]  ;;  %v436_v37 = vadd.f32 %v435_v59, %v322_v60  ;;  %v450_v24 = vadd.f32 %v5091_v28, %v5086_v34 }
  0x51   : > { %408 = vadd.xlane.f32.xlu1 %v407_v61  ;;  %v319_v61 = vld [vmem:[%s7659_s0 + $0x1d8] sm:$0xff]  ;;  %v5102_v45 = vld [vmem:[%s7659_s0 + $0x260] sm:$0xff]  ;;  %v5107_v43 = vld [vmem:[%s7659_s0 + $0x268] sm:$0xff] }
  0x52   : > { %413 = vadd.xlane.f32.xlu0 %v412_v15  ;;  %v326_v15 = vld [vmem:[%s7659_s0 + $0x210] sm:$0xff]  ;;  %v327_v47 = vld [vmem:[%s7659_s0 + $0x218] sm:$0xff]  ;;  %v432_v46 = vadd.f32 %v431_v51, %v319_v61  ;;  %v340_v60 = vld [vmem:[%s7659_s0 + $0x280] sm:$0xff]  ;;  %v455_v56 = vadd.f32 %v5107_v43, %v5102_v45 }
  0x53   : > { %v334_v48 = vld [vmem:[%s7659_s0 + $0x250] sm:$0xff]  ;;  %v441_v26 = vadd.f32 %v440_v21, %v326_v15  ;;  %v341_v30 = vld [vmem:[%s7659_s0 + $0x288] sm:$0xff]  ;;  %v331_v59 = vld [vmem:[%s7659_s0 + $0x238] sm:$0xff] }
  0x54   : > { %v338_v51 = vld [vmem:[%s7659_s0 + $0x270] sm:$0xff]  ;;  %v335_v61 = vld [vmem:[%s7659_s0 + $0x258] sm:$0xff]  ;;  %v5139_v21 = vld [vmem:[%s7659_s0 + $0x2a0] sm:$0xff]  ;;  %v451_v28 = vadd.f32 %v450_v24, %v334_v48 }
  0x55   : > { %418 = vadd.xlane.f32.xlu1 %v417_v52  ;;  %v446_v52 = vadd.f32 %v445_v55, %v330_v41  ;;  %v442_v15 = vadd.f32 %v441_v26, %v327_v47  ;;  %v342_v55 = vld [vmem:[%s7659_s0 + $0x290] sm:$0xff]  ;;  %v339_v41 = vld [vmem:[%s7659_s0 + $0x278] sm:$0xff]  ;;  %v456_v34 = vadd.f32 %v455_v56, %v338_v51 }
  0x56   : > { %423 = vadd.xlane.f32.xlu0 %v422_v57  ;;  %v437_v57 = vadd.f32 %v436_v37, %v323_v33  ;;  %v460_v37 = vadd.f32 %v341_v30, %v340_v60  ;;  %v452_v48 = vadd.f32 %v451_v28, %v335_v61  ;;  %v346_v24 = vld [vmem:[%s7659_s0 + $0x2b0] sm:$0xff]  ;;  %v343_v47 = vld [vmem:[%s7659_s0 + $0x298] sm:$0xff] }
  0x57   : > { %v447_v33 = vadd.f32 %v446_v52, %v331_v59  ;;  %v457_v60 = vadd.f32 %v456_v34, %v339_v41  ;;  %v347_v30 = vld [vmem:[%s7659_s0 + $0x2b8] sm:$0xff]  ;;  %v4040_v56 = vld [vmem:[%s4701_s18] ss:$16 sps:$4 sm:$0xff]   ;;  %v4042_v61 = vld [vmem:[%s4701_s18 + $0x24] ss:$16 sps:$4 sm:$0xff]  }
  0x58   : > { %v461_v26 = vadd.f32 %v460_v37, %v342_v55  ;;  %v4038_v52 = vld [vmem:[%s4701_s18 + $0xc] ss:$16 sps:$4 sm:$0xff]   ;;  %v4041_v34 = vld [vmem:[%s4701_s18 + $0x8] ss:$16 sps:$4 sm:$0xff]   ;;  %v4046_v55 = vld [vmem:[%s4701_s18 + $0x20] ss:$16 sps:$4 sm:$0xff]  }
  0x59   : > { %428 = vadd.xlane.f32.xlu1 %v427_v63  ;;  %v5144_v63 = vld [vmem:[%s7659_s0 + $0x2a8] sm:$0xff]  ;;  %2428 = vmatprep.subr.bf16.mxu1 %v4038_v52 }
  0x5a   : > { %433 = vadd.xlane.f32.xlu0 %v432_v46  ;;  %v465_v46 = vadd.f32 %v5144_v63, %v5139_v21  ;;  %v462_v59 = vadd.f32 %v461_v26, %v343_v47  ;;  %2429 = vmatpush1.bf16.msra.mxu1 %v4041_v34  ;;  %v4047_v37 = vld [vmem:[%s4701_s18 + $0x28] ss:$16 sps:$4 sm:$0xff]   ;;  %v4050_v41 = vld [vmem:[%s4701_s18 + $0x4c] ss:$16 sps:$4 sm:$0xff]   ;;  %v4058_v47 = vld [vmem:[%s4701_s18 + $0x60] ss:$16 sps:$4 sm:$0xff]  }
  0x5b   : > { %v4056_v26 = vld [vmem:[%s4701_s18 + $0x6c] ss:$16 sps:$4 sm:$0xff]   ;;  %v4071_v34 = vld [vmem:[%s4701_s18 + $0xa8] ss:$16 sps:$4 sm:$0xff]  }
  0x5c   : > { %v466_v28 = vadd.f32 %v465_v46, %v346_v24  ;;  %v4052_v46 = vld [vmem:[%s4701_s18 + $0x40] ss:$16 sps:$4 sm:$0xff]   ;;  %v4054_v24 = vld [vmem:[%s4701_s18 + $0x64] ss:$16 sps:$4 sm:$0xff]   ;;  %v4068_v52 = vld [vmem:[%s4701_s18 + $0xac] ss:$16 sps:$4 sm:$0xff]  }
  0x5d   : > { %438 = vadd.xlane.f32.xlu1 %v437_v57  ;;  %v4036_v57 = vld [vmem:[%s4701_s18 + $0x4] ss:$16 sps:$4 sm:$0xff]  }
  0x5e   : > { %443 = vadd.xlane.f32.xlu0 %v442_v15  ;;  %v467_v51 = vadd.f32 %v466_v28, %v347_v30  ;;  %v4044_v15 = vld [vmem:[%s4701_s18 + $0x2c] ss:$16 sps:$4 sm:$0xff]   ;;  %2106 = vmatprep.subr.bf16.mxu0 %v4036_v57  ;;  %v4060_v30 = vld [vmem:[%s4701_s18 + $0x84] ss:$16 sps:$4 sm:$0xff]  }
  0x5f   : > { %2107 = vmatpush1.bf16.msra.mxu0 %v4040_v56  ;;  %2430 = vmatprep.subr.bf16.mxu1 %v4044_v15  ;;  %v4062_v28 = vld [vmem:[%s4701_s18 + $0x8c] ss:$16 sps:$4 sm:$0xff]   ;;  %v4066_v57 = vld [vmem:[%s4701_s18 + $0xa4] ss:$16 sps:$4 sm:$0xff]   ;;  %v4070_v56 = vld [vmem:[%s4701_s18 + $0xa0] ss:$16 sps:$4 sm:$0xff]  }
  0x60   : > { %2108 = vmatprep.subr.bf16.mxu0 %v4042_v61  ;;  %2431 = vmatpush1.bf16.msra.mxu1 %v4047_v37  ;;  %v4072_v61 = vld [vmem:[%s4701_s18 + $0xc4] ss:$16 sps:$4 sm:$0xff]   ;;  %v4074_v15 = vld [vmem:[%s4701_s18 + $0xcc] ss:$16 sps:$4 sm:$0xff]   ;;  %v4077_v37 = vld [vmem:[%s4701_s18 + $0xc8] ss:$16 sps:$4 sm:$0xff]  }
  0x61   : > { %448 = vadd.xlane.f32.xlu1 %v447_v33  ;;  %v4048_v33 = vld [vmem:[%s4701_s18 + $0x44] ss:$16 sps:$4 sm:$0xff]   ;;  %2432 = vmatprep.subr.bf16.mxu1 %v4050_v41  ;;  %v4080_v41 = vld [vmem:[%s4701_s18 + $0xec] ss:$16 sps:$4 sm:$0xff]  }
  0x62   : > { %453 = vadd.xlane.f32.xlu0 %v452_v48  ;;  %v4053_v48 = vld [vmem:[%s4701_s18 + $0x48] ss:$16 sps:$4 sm:$0xff]  }
  0x63   : > { %2109 = vmatpush1.bf16.msra.mxu0 %v4046_v55  ;;  %v4076_v55 = vld [vmem:[%s4701_s18 + $0xc0] ss:$16 sps:$4 sm:$0xff]  }
  0x64   : > { %2110 = vmatprep.subr.bf16.mxu0 %v4048_v33  ;;  %2433 = vmatpush1.bf16.msra.mxu1 %v4053_v48  ;;  %v4078_v33 = vld [vmem:[%s4701_s18 + $0xe4] ss:$16 sps:$4 sm:$0xff]   ;;  %v4083_v48 = vld [vmem:[%s4701_s18 + $0xe8] ss:$16 sps:$4 sm:$0xff]  }
  0x65   : > { %458 = vadd.xlane.f32.xlu1 %v457_v60  ;;  %v4059_v60 = vld [vmem:[%s4701_s18 + $0x68] ss:$16 sps:$4 sm:$0xff]   ;;  %2434 = vmatprep.subr.bf16.mxu1 %v4056_v26  ;;  %v4086_v26 = vld [vmem:[%s4701_s18 + $0x10c] ss:$16 sps:$4 sm:$0xff]  }
  0x66   : > { %463 = vadd.xlane.f32.xlu0 %v462_v59  ;;  %v4064_v59 = vld [vmem:[%s4701_s18 + $0x80] ss:$16 sps:$4 sm:$0xff]  }
  0x67   : > { %2111 = vmatpush1.bf16.msra.mxu0 %v4052_v46  ;;  %v4082_v46 = vld [vmem:[%s4701_s18 + $0xe0] ss:$16 sps:$4 sm:$0xff]  }
  0x68   : > { %2112 = vmatprep.subr.bf16.mxu0 %v4054_v24  ;;  %2435 = vmatpush1.bf16.msra.mxu1 %v4059_v60  ;;  %v4084_v24 = vld [vmem:[%s4701_s18 + $0x104] ss:$16 sps:$4 sm:$0xff]   ;;  %v4089_v60 = vld [vmem:[%s4701_s18 + $0x108] ss:$16 sps:$4 sm:$0xff]  }
  0x69   : > { %468 = vadd.xlane.f32.xlu1 %v467_v51  ;;  %v4065_v51 = vld [vmem:[%s4701_s18 + $0x88] ss:$16 sps:$4 sm:$0xff]   ;;  %2436 = vmatprep.subr.bf16.mxu1 %v4062_v28 }
  0x6a   : > { %v5207_v28 = vld [vmem:[%s7659_s0 + $0x308] sm:$0xf] }
  0x6b   : > { %2113 = vmatpush1.bf16.msra.mxu0 %v4058_v47  ;;  %v4088_v47 = vld [vmem:[%s4701_s18 + $0x100] ss:$16 sps:$4 sm:$0xff]   ;;  %7791 = vst [vmem:[#allocation27_spill] sm:$0xff] %v5207_v28 }
  0x6c   : > { %2114 = vmatprep.subr.bf16.mxu0 %v4060_v30  ;;  %2437 = vmatpush1.bf16.msra.mxu1 %v4065_v51  ;;  %v5202_v30 = vld [vmem:[%s7659_s0 + $0x300] sm:$0xf]  ;;  %v5217_v51 = vld [vmem:[%s7659_s0 + $0x2c8] sm:$0xff] }
  0x6d   : > { %2438 = vmatprep.subr.bf16.mxu1 %v4068_v52  ;;  %7790 = vst [vmem:[#allocation26_spill] sm:$0xff] %v5202_v30  ;;  %v5227_v52 = vld [vmem:[%s7659_s0 + $0x2e8] sm:$0xff] }
  0x6e   : > { %7793 = vst [vmem:[#allocation29_spill] sm:$0xff] %v5227_v52 }
  0x6f   : > { %2115 = vmatpush1.bf16.msra.mxu0 %v4064_v59  ;;  %v5212_v59 = vld [vmem:[%s7659_s0 + $0x2c0] sm:$0xff] }
  0x70   : > { %2116 = vmatprep.subr.bf16.mxu0 %v4066_v57  ;;  %2439 = vmatpush1.bf16.msra.mxu1 %v4071_v34  ;;  %v5222_v57 = vld [vmem:[%s7659_s0 + $0x2e0] sm:$0xff]  ;;  %v482_v34 = vsel %vm480_vm0, %v5207_v28, 0.0 }
  0x71   : > { %2440 = vmatprep.subr.bf16.mxu1 %v4074_v15  ;;  %7792 = vst [vmem:[#allocation28_spill] sm:$0xff] %v5222_v57  ;;  %v470_v15 = vadd.f32 %v5217_v51, %v5212_v59 }
  0x73   : > { %2117 = vmatpush1.bf16.msra.mxu0 %v4070_v56  ;;  %v481_v56 = vsel %vm480_vm0, %v5202_v30, 0.0 }
  0x74   : > { %2118 = vmatprep.subr.bf16.mxu0 %v4072_v61  ;;  %2441 = vmatpush1.bf16.msra.mxu1 %v4077_v37  ;;  %v5236_v61 = vld [vmem:[%s7659_s0 + $0x310] sm:$0xf]  ;;  %v483_v37 = vadd.f32 %v482_v34, %v481_v56  ;;  %v5264_v34 = vld [vmem:[%s7659_s0 + $0x2d8] sm:$0xff] }
  0x75   : > { %2442 = vmatprep.subr.bf16.mxu1 %v4080_v41  ;;  %7794 = vst [vmem:[#allocation30_spill] sm:$0xff] %v5236_v61  ;;  %v5250_v41 = vld [vmem:[%s7659_s0 + $0x2f0] sm:$0xff] }
  0x76   : > { %7795 = vst [vmem:[#allocation31_spill] sm:$0xff] %v5250_v41 }
  0x77   : > { %2119 = vmatpush1.bf16.msra.mxu0 %v4076_v55  ;;  %v475_v55 = vadd.f32 %v5227_v52, %v5222_v57 }
  0x78   : > { %2120 = vmatprep.subr.bf16.mxu0 %v4078_v33  ;;  %2443 = vmatpush1.bf16.msra.mxu1 %v4083_v48  ;;  %v5245_v33 = vld [vmem:[%s7659_s0 + $0x2d0] sm:$0xff]  ;;  %v5257_v48 = vld [vmem:[%s7659_s0 + $0x318] sm:$0xf] }
  0x79   : > { %2444 = vmatprep.subr.bf16.mxu1 %v4086_v26  ;;  %7796 = vst [vmem:[#allocation32_spill] sm:$0xff] %v5257_v48  ;;  %v471_v26 = vadd.f32 %v470_v15, %v5245_v33  ;;  %v486_v28 = vsel %vm480_vm0, %v5257_v48, 0.0 }
  0x7b   : > { %2121 = vmatpush1.bf16.msra.mxu0 %v4082_v46  ;;  %v484_v46 = vsel %vm480_vm0, %v5236_v61, 0.0  ;;  %v5269_v61 = vld [vmem:[%s7659_s0 + $0x2f8] sm:$0xff]  ;;  %v472_v52 = vadd.f32 %v471_v26, %v5264_v34 }
  0x7c   : > { %2122 = vmatprep.subr.bf16.mxu0 %v4084_v24  ;;  %2445 = vmatpush1.bf16.msra.mxu1 %v4089_v60  ;;  %v485_v60 = vadd.f32 %v484_v46, %v483_v37  ;;  %7797 = vst [vmem:[#allocation33_spill] sm:$0xff] %v5269_v61 }
  0x7e   : > { %v5289_v48 = vadd.f32 %v486_v28, %v485_v60 }
  0x7f   : > { %2123 = vmatpush1.bf16.msra.mxu0 %v4088_v47  ;;  %v476_v47 = vadd.f32 %v475_v55, %v5250_v41 }
  0x81   : > { %v5287_v57 = vadd.f32 %v476_v47, %v5269_v61 }
  0xcb   : > { %v364_v24 = vpop.xlane.xlu0 %363 }
  0xcc   : > { %v491_v56 = vmul.f32 0.001953125, %v364_v24 }
  0xce   : > { %v5274_v30 = vsub.f32 %v4710_v0, %v491_v56  ;;  %v5277_v15 = vsub.f32 %v4715_v1, %v491_v56  ;;  %v374_v55 = vpop.xlane.xlu1 %373  ;;  %v5280_v37 = vsub.f32 %v4720_v2, %v491_v56  ;;  %v5283_v46 = vsub.f32 %v4737_v6, %v491_v56 }
  0xcf   : > { %v369_v24 = vpop.xlane.xlu0 %368  ;;  %v493_v41 = vmul.f32 0.001953125, %v374_v55 }
  0xd0   : > { %7798 = vst [vmem:[#allocation34_spill] sm:$0xff] %v5274_v30  ;;  %7799 = vst [vmem:[#allocation35_spill] sm:$0xff] %v5277_v15  ;;  %v492_v0 = vmul.f32 0.001953125, %v369_v24  ;;  %v616_v1 = vmul.f32 %v5274_v30, %v5274_v30  ;;  %v617_v2 = vmul.f32 %v5277_v15, %v5277_v15  ;;  %v618_v6 = vmul.f32 %v5280_v37, %v5280_v37 }
  0xd1   : > { %7800 = vst [vmem:[#allocation36_spill] sm:$0xff] %v5280_v37  ;;  %7801 = vst [vmem:[#allocation37_spill] sm:$0xff] %v5283_v46  ;;  %v5298_v56 = vsub.f32 %v4749_v9, %v493_v41  ;;  %v5301_v26 = vsub.f32 %v4760_v12, %v493_v41  ;;  %v619_v28 = vmul.f32 %v5283_v46, %v5283_v46 }
  0xd2   : > { %v5306_v47 = vsub.f32 %v4765_v13, %v493_v41  ;;  %v5309_v60 = vsub.f32 %v4727_v4, %v492_v0  ;;  %v5312_v55 = vsub.f32 %v4732_v5, %v492_v0  ;;  %v379_v24 = vpop.xlane.xlu1 %378  ;;  %v716_v37 = vadd.f32 %v617_v2, %v616_v1 }
  0xd3   : > { %7802 = vst [vmem:[#allocation38_spill] sm:$0xff] %v5298_v56  ;;  %v5315_v9 = vsub.f32 %v4742_v7, %v492_v0  ;;  %v494_v30 = vmul.f32 0.001953125, %v379_v24  ;;  %v384_v12 = vpop.xlane.xlu0 %383  ;;  %v5318_v15 = vsub.f32 %v4755_v11, %v492_v0  ;;  %v5321_v46 = vsub.f32 %v4789_v20, %v493_v41 }
  0xd4   : > { %7803 = vst [vmem:[#allocation39_spill] sm:$0xff] %v5306_v47  ;;  %v624_v4 = vmul.f32 %v5298_v56, %v5298_v56  ;;  %v717_v13 = vadd.f32 %v716_v37, %v618_v6  ;;  %v495_v61 = vmul.f32 0.001953125, %v384_v12  ;;  %v620_v5 = vmul.f32 %v5309_v60, %v5309_v60 }
  0xd5   : > { %7804 = vst [vmem:[#allocation40_spill] sm:$0xff] %v5315_v9  ;;  %v621_v7 = vmul.f32 %v5312_v55, %v5312_v55  ;;  %v5330_v1 = vsub.f32 %v4773_v16, %v494_v30  ;;  %v5333_v11 = vsub.f32 %v4778_v17, %v494_v30  ;;  %v622_v20 = vmul.f32 %v5315_v9, %v5315_v9 }
  0xd6   : > { %v623_v41 = vmul.f32 %v5318_v15, %v5318_v15  ;;  %v718_v37 = vadd.f32 %v717_v13, %v619_v28  ;;  %v389_v0 = vpop.xlane.xlu1 %388  ;;  %v5340_v2 = vsub.f32 %v4814_v27, %v495_v61  ;;  %v5343_v6 = vsub.f32 %v4826_v31, %v495_v61 }
  0xd7   : > { %v721_v24 = vadd.f32 %v621_v7, %v620_v5  ;;  %v496_v16 = vmul.f32 0.001953125, %v389_v0  ;;  %v394_v12 = vpop.xlane.xlu0 %393  ;;  %v625_v17 = vmul.f32 %v5301_v26, %v5301_v26  ;;  %v626_v9 = vmul.f32 %v5306_v47, %v5306_v47 }
  0xd8   : > { %v627_v56 = vmul.f32 %v5321_v46, %v5321_v46  ;;  %719 = vadd.xlane.f32.xlu0 %v718_v37  ;;  %v5351_v13 = vmul.f32 0.001953125, %v394_v12  ;;  %v5354_v27 = vsub.f32 %v4783_v18, %v494_v30  ;;  %v5357_v31 = vsub.f32 %v4820_v29, %v494_v30 }
  0xd9   : > { %v722_v28 = vadd.f32 %v721_v24, %v622_v20  ;;  %v5360_v5 = vsub.f32 %v4796_v22, %v496_v16  ;;  %v5363_v7 = vsub.f32 %v4801_v23, %v496_v16  ;;  %v726_v0 = vadd.f32 %v625_v17, %v624_v4 }
  0xda   : > { %7805 = vst [vmem:[#allocation41_spill] sm:$0xff] %v5354_v27  ;;  %7806 = vst [vmem:[#allocation42_spill] sm:$0xff] %v5357_v31  ;;  %v628_v47 = vmul.f32 %v5330_v1, %v5330_v1  ;;  %v399_v20 = vpop.xlane.xlu1 %398  ;;  %v5369_v24 = vsub.f32 %v4855_v39, %v5351_v13  ;;  %v5373_v18 = vsub.f32 %v4860_v40, %v5351_v13 }
  0xdb   : > { %v723_v37 = vadd.f32 %v722_v28, %v623_v41  ;;  %v629_v22 = vmul.f32 %v5333_v11, %v5333_v11  ;;  %v498_v29 = vmul.f32 0.001953125, %v399_v20  ;;  %v727_v23 = vadd.f32 %v726_v0, %v626_v9  ;;  %v404_v30 = vpop.xlane.xlu0 %403 }
  0xdc   : > { %7807 = vst [vmem:[#allocation43_spill] sm:$0xff] %v5369_v24  ;;  %7808 = vst [vmem:[#allocation44_spill] sm:$0xff] %v5373_v18  ;;  %v630_v4 = vmul.f32 %v5354_v27, %v5354_v27  ;;  %v631_v41 = vmul.f32 %v5357_v31, %v5357_v31  ;;  %473 = vadd.xlane.f32.xlu0 %v472_v52  ;;  %v5381_v39 = vmul.f32 0.001953125, %v404_v30 }
  0xdd   : > { %724 = vadd.xlane.f32.xlu1 %v723_v37  ;;  %v731_v12 = vadd.f32 %v629_v22, %v628_v47  ;;  %v5384_v40 = vsub.f32 %v4807_v25, %v496_v16  ;;  %v5387_v17 = vsub.f32 %v4866_v42, %v496_v16  ;;  %v5390_v9 = vsub.f32 %v4839_v35, %v498_v29 }
  0xde   : > { %v5393_v28 = vsub.f32 %v4844_v36, %v498_v29  ;;  %v728_v0 = vadd.f32 %v727_v23, %v627_v56  ;;  %v636_v52 = vmul.f32 %v5360_v5, %v5360_v5  ;;  %v409_v37 = vpop.xlane.xlu1 %408  ;;  %v5399_v47 = vsub.f32 %v4903_v53, %v5381_v39 }
  0xdf   : > { %7809 = vst [vmem:[#allocation45_spill] sm:$0xff] %v5384_v40  ;;  %7810 = vst [vmem:[#allocation46_spill] sm:$0xff] %v5387_v17  ;;  %v5403_v25 = vsub.f32 %v4908_v54, %v5381_v39  ;;  %v732_v42 = vadd.f32 %v731_v12, %v630_v4  ;;  %v637_v35 = vmul.f32 %v5363_v7, %v5363_v7  ;;  %v5407_v16 = vmul.f32 0.001953125, %v409_v37  ;;  %v414_v36 = vpop.xlane.xlu0 %413 }
  0xe0   : > { %7811 = vst [vmem:[#allocation47_spill] sm:$0xff] %v5390_v9  ;;  %7812 = vst [vmem:[#allocation48_spill] sm:$0xff] %v5393_v28  ;;  %v638_v56 = vmul.f32 %v5384_v40, %v5384_v40  ;;  %v639_v20 = vmul.f32 %v5387_v17, %v5387_v17  ;;  %v5414_v53 = vsub.f32 %v4831_v32, %v495_v61  ;;  %729 = vadd.xlane.f32.xlu0 %v728_v0 }
  0xe1   : > { %478 = vadd.xlane.f32.xlu1 %v5287_v57  ;;  %v733_v54 = vadd.f32 %v732_v42, %v631_v41  ;;  %v5417_v22 = vmul.f32 0.001953125, %v414_v36  ;;  %v741_v23 = vadd.f32 %v637_v35, %v636_v52  ;;  %v5420_v30 = vsub.f32 %v4850_v38, %v495_v61 }
  0xe2   : > { %7813 = vst [vmem:[#allocation49_spill] sm:$0xff] %v5414_v53  ;;  %v5424_v4 = vsub.f32 %v4891_v49, %v5407_v16  ;;  %v5428_v12 = vsub.f32 %v4896_v50, %v5407_v16  ;;  %v632_v32 = vmul.f32 %v5340_v2, %v5340_v2  ;;  %v633_v57 = vmul.f32 %v5343_v6, %v5343_v6  ;;  %v419_v41 = vpop.xlane.xlu1 %418 }
  0xe3   : > { %7814 = vst [vmem:[#allocation50_spill] sm:$0xff] %v5420_v30  ;;  %v5436_v0 = vsub.f32 %v4934_v62, %v5417_v22  ;;  %v5440_v38 = vsub.f32 %v4951_v14, %v5417_v22  ;;  %v742_v49 = vadd.f32 %v741_v23, %v638_v56  ;;  %v634_v50 = vmul.f32 %v5414_v53, %v5414_v53  ;;  %v424_v42 = vpop.xlane.xlu0 %423 }
  0xe4   : > { %7815 = vst [vmem:[#allocation51_spill] sm:$0xff] %v5424_v4  ;;  %7816 = vst [vmem:[#allocation52_spill] sm:$0xff] %v5428_v12  ;;  %v5444_v61 = vmul.f32 0.001953125, %v419_v41  ;;  %v635_v52 = vmul.f32 %v5420_v30, %v5420_v30  ;;  %v736_v37 = vadd.f32 %v633_v57, %v632_v32  ;;  %v5449_v35 = vsub.f32 %v4872_v44, %v498_v29  ;;  %v4090_v30 = vld [vmem:[%s4701_s18 + $0x124] ss:$16 sps:$4 sm:$0xff]  }
  0xe5   : > { %488 = vadd.xlane.f32.xlu0 %v5289_v48  ;;  %734 = vadd.xlane.f32.xlu1 %v733_v54  ;;  %v743_v62 = vadd.f32 %v742_v49, %v639_v20  ;;  %v5452_v14 = vmul.f32 0.001953125, %v424_v42  ;;  %v5455_v36 = vsub.f32 %v4921_v58, %v498_v29  ;;  %v644_v56 = vmul.f32 %v5390_v9, %v5390_v9  ;;  %v7821_v54 = vld [vmem:[#allocation11_spill] sm:$0xff]  ;;  %v7822_v29 = vld [vmem:[#allocation12_spill] sm:$0xff] }
  0xe6   : > { %7817 = vst [vmem:[#allocation53_spill] sm:$0xff] %v5449_v35  ;;  %v5461_v23 = vsub.f32 %v4941_v8, %v5444_v61  ;;  %v5465_v44 = vsub.f32 %v4946_v10, %v5444_v61  ;;  %v737_v32 = vadd.f32 %v736_v37, %v634_v50  ;;  %v645_v48 = vmul.f32 %v5393_v28, %v5393_v28  ;;  %v429_v20 = vpop.xlane.xlu1 %428  ;;  %v7823_v37 = vld [vmem:[#allocation6_spill] sm:$0xff]  ;;  %v4098_v9 = vld [vmem:[%s4701_s18 + $0x14c] ss:$16 sps:$4 sm:$0xff]  }
  0xe7   : > { %7818 = vst [vmem:[#allocation54_spill] sm:$0xff] %v5455_v36  ;;  %v5471_v58 = vsub.f32 %v7821_v54, %v5452_v14  ;;  %v5475_v57 = vsub.f32 %v7822_v29, %v5452_v14  ;;  %v646_v8 = vmul.f32 %v5449_v35, %v5449_v35  ;;  %v647_v10 = vmul.f32 %v5455_v36, %v5455_v36  ;;  %v434_v54 = vpop.xlane.xlu0 %433  ;;  %v7825_v29 = vld [vmem:[#allocation7_spill] sm:$0xff] }
  0xe8   : > { %7819 = vst [vmem:[#allocation55_spill] sm:$0xff] %v5461_v23  ;;  %7820 = vst [vmem:[#allocation56_spill] sm:$0xff] %v5465_v44  ;;  %v738_v41 = vadd.f32 %v737_v32, %v635_v52  ;;  %v5481_v49 = vmul.f32 0.001953125, %v429_v20  ;;  %v751_v50 = vadd.f32 %v645_v48, %v644_v56  ;;  %v5485_v42 = vsub.f32 %v7823_v37, %v5351_v13  ;;  %v7827_v56 = vld [vmem:[#allocation15_spill] sm:$0xff] }
  0xe9   : > { %744 = vadd.xlane.f32.xlu0 %v743_v62  ;;  %v5489_v40 = vsub.f32 %v7825_v29, %v5351_v13  ;;  %v640_v35 = vmul.f32 %v5369_v24, %v5369_v24  ;;  %v641_v52 = vmul.f32 %v5373_v18, %v5373_v18  ;;  %v5495_v32 = vmul.f32 0.001953125, %v434_v54  ;;  %v7829_v62 = vld [vmem:[#allocation16_spill] sm:$0xff]  ;;  %2124 = vmatprep.subr.bf16.mxu0 %v4090_v30  ;;  %v7841_v30 = vld [vmem:[#allocation10_spill] sm:$0xff] }
  0xea   : > { %7824 = vst [vmem:[#allocation11_spill] sm:$0xff] %v5485_v42  ;;  %739 = vadd.xlane.f32.xlu1 %v738_v41  ;;  %v5499_v48 = vsub.f32 %v7827_v56, %v5481_v49  ;;  %v5503_v20 = vsub.f32 %v7829_v62, %v5481_v49  ;;  %v752_v13 = vadd.f32 %v751_v50, %v646_v8  ;;  %v439_v36 = vpop.xlane.xlu1 %438  ;;  %v7831_v41 = vld [vmem:[#allocation17_spill] sm:$0xff]  ;;  %v7832_v56 = vld [vmem:[#allocation18_spill] sm:$0xff] }
  0xeb   : > { %7826 = vst [vmem:[#allocation12_spill] sm:$0xff] %v5489_v40  ;;  %v642_v37 = vmul.f32 %v5485_v42, %v5485_v42  ;;  %v643_v29 = vmul.f32 %v5489_v40, %v5489_v40  ;;  %v746_v54 = vadd.f32 %v641_v52, %v640_v35  ;;  %v5511_v53 = vsub.f32 %v7831_v41, %v5495_v32  ;;  %v4092_v62 = vld [vmem:[%s4701_s18 + $0x12c] ss:$16 sps:$4 sm:$0xff]   ;;  %v4094_v40 = vld [vmem:[%s4701_s18 + $0x120] ss:$16 sps:$4 sm:$0xff]  }
  0xec   : > { %7828 = vst [vmem:[#allocation6_spill] sm:$0xff] %v5499_v48  ;;  %7830 = vst [vmem:[#allocation7_spill] sm:$0xff] %v5503_v20  ;;  %v5515_v17 = vsub.f32 %v7832_v56, %v5495_v32  ;;  %v753_v27 = vadd.f32 %v752_v13, %v647_v10  ;;  %v5519_v8 = vmul.f32 0.001953125, %v439_v36  ;;  %v7833_v50 = vld [vmem:[#allocation9_spill] sm:$0xff]  ;;  %v652_v56 = vmul.f32 %v5424_v4, %v5424_v4  ;;  %v7837_v36 = vld [vmem:[#allocation8_spill] sm:$0xff] }
  0xed   : > { %v5523_v42 = vsub.f32 %v7833_v50, %v5407_v16  ;;  %v7835_v35 = vld [vmem:[#allocation13_spill] sm:$0xff]  ;;  %v747_v31 = vadd.f32 %v746_v54, %v642_v37  ;;  %v653_v10 = vmul.f32 %v5428_v12, %v5428_v12  ;;  %v5537_v13 = vsub.f32 %v7837_v36, %v5381_v39  ;;  %v444_v50 = vpop.xlane.xlu0 %443  ;;  %2446 = vmatprep.subr.bf16.mxu1 %v4092_v62 }
  0xee   : > { %v5527_v52 = vsub.f32 %v7835_v35, %v5407_v16  ;;  %v4095_v41 = vld [vmem:[%s4701_s18 + $0x128] ss:$16 sps:$4 sm:$0xff]   ;;  %754 = vadd.xlane.f32.xlu0 %v753_v27  ;;  %v7839_v16 = vld [vmem:[#allocation20_spill] sm:$0xff]  ;;  %v5553_v27 = vsub.f32 %v7841_v30, %v5381_v39  ;;  %v449_v18 = vpop.xlane.xlu1 %448  ;;  %2125 = vmatpush1.bf16.msra.mxu0 %v4094_v40 }
  0xef   : > { %7834 = vst [vmem:[#allocation15_spill] sm:$0xff] %v5523_v42  ;;  %7838 = vst [vmem:[#allocation17_spill] sm:$0xff] %v5537_v13  ;;  %v5541_v35 = vsub.f32 %v7839_v16, %v5519_v8  ;;  %v7840_v37 = vld [vmem:[#allocation21_spill] sm:$0xff]  ;;  %v654_v4 = vmul.f32 %v5523_v42, %v5523_v42  ;;  %v748_v36 = vadd.f32 %v747_v31, %v643_v29  ;;  %v5563_v31 = vmul.f32 0.001953125, %v449_v18  ;;  %v4100_v39 = vld [vmem:[%s4701_s18 + $0x140] ss:$16 sps:$4 sm:$0xff]  }
  0xf0   : > { %7836 = vst [vmem:[#allocation16_spill] sm:$0xff] %v5527_v52  ;;  %v5545_v54 = vsub.f32 %v7840_v37, %v5519_v8  ;;  %v655_v12 = vmul.f32 %v5527_v52, %v5527_v52  ;;  %v761_v24 = vadd.f32 %v653_v10, %v652_v56  ;;  %7842 = vst [vmem:[#allocation18_spill] sm:$0xff] %v5553_v27  ;;  %v4096_v37 = vld [vmem:[%s4701_s18 + $0x144] ss:$16 sps:$4 sm:$0xff]   ;;  %v5565_v29 = vmul.f32 0.001953125, %v444_v50  ;;  %v7848_v52 = vld [vmem:[#allocation23_spill] sm:$0xff] }
  0xf1   : > { %v648_v16 = vmul.f32 %v5399_v47, %v5399_v47  ;;  %v649_v42 = vmul.f32 %v5403_v25, %v5403_v25  ;;  %v650_v28 = vmul.f32 %v5537_v13, %v5537_v13  ;;  %2447 = vmatpush1.bf16.msra.mxu1 %v4095_v41  ;;  %749 = vadd.xlane.f32.xlu1 %v748_v36  ;;  %v7843_v10 = vld [vmem:[#allocation14_spill] sm:$0xff]  ;;  %v7845_v13 = vld [vmem:[#allocation19_spill] sm:$0xff] }
  0xf2   : > { %v762_v56 = vadd.f32 %v761_v24, %v654_v4  ;;  %v651_v62 = vmul.f32 %v5553_v27, %v5553_v27  ;;  %v5572_v30 = vsub.f32 %v7843_v10, %v5444_v61  ;;  %v5576_v18 = vsub.f32 %v7845_v13, %v5444_v61  ;;  %v7847_v4 = vld [vmem:[#allocation22_spill] sm:$0xff]  ;;  %2126 = vmatprep.subr.bf16.mxu0 %v4096_v37  ;;  %v4101_v36 = vld [vmem:[%s4701_s18 + $0x148] ss:$16 sps:$4 sm:$0xff]   ;;  %v459_v13 = vpop.xlane.xlu1 %458  ;;  %v4478_v37 = vld [vmem:[%s7659_s0 + $0x150] sm:$0xff] }
  0xf3   : > { %v756_v50 = vadd.f32 %v649_v42, %v648_v16  ;;  %v5580_v40 = vsub.f32 %v5071_v3, %v5563_v31  ;;  %v5584_v24 = vsub.f32 %v5076_v19, %v5563_v31  ;;  %v5588_v41 = vsub.f32 %v7847_v4, %v5565_v29  ;;  %v454_v19 = vpop.xlane.xlu0 %453  ;;  %2448 = vmatprep.subr.bf16.mxu1 %v4098_v9  ;;  %v4102_v16 = vld [vmem:[%s4701_s18 + $0x164] ss:$16 sps:$4 sm:$0xff]   ;;  %v4104_v4 = vld [vmem:[%s4701_s18 + $0x16c] ss:$16 sps:$4 sm:$0xff]  }
  0xf4   : > { %7844 = vst [vmem:[#allocation9_spill] sm:$0xff] %v5572_v30  ;;  %7846 = vst [vmem:[#allocation13_spill] sm:$0xff] %v5576_v18  ;;  %v763_v10 = vadd.f32 %v762_v56, %v655_v12  ;;  %v5593_v61 = vsub.f32 %v7848_v52, %v5565_v29  ;;  %v660_v42 = vmul.f32 %v5461_v23, %v5461_v23  ;;  %2127 = vmatpush1.bf16.msra.mxu0 %v4100_v39  ;;  %v4106_v23 = vld [vmem:[%s4701_s18 + $0x160] ss:$16 sps:$4 sm:$0xff]  }
  0xf5   : > { %v661_v3 = vmul.f32 %v5465_v44, %v5465_v44  ;;  %v757_v27 = vadd.f32 %v756_v50, %v650_v28  ;;  %v662_v12 = vmul.f32 %v5572_v30, %v5572_v30  ;;  %v663_v52 = vmul.f32 %v5576_v18, %v5576_v18  ;;  %v4479_v28 = vld [vmem:[%s7659_s0 + $0x158] sm:$0xff]  ;;  %2449 = vmatpush1.bf16.msra.mxu1 %v4101_v36 }
  0xf6   : > { %v5609_v56 = vsub.f32 %v4478_v37, %v5417_v22  ;;  %764 = vadd.xlane.f32.xlu0 %v763_v10  ;;  %v5615_v50 = vsub.f32 %v4479_v28, %v5417_v22  ;;  %v656_v30 = vmul.f32 %v5436_v0, %v5436_v0  ;;  %v657_v18 = vmul.f32 %v5440_v38, %v5440_v38  ;;  %v4107_v22 = vld [vmem:[%s4701_s18 + $0x168] ss:$16 sps:$4 sm:$0xff]  }
  0xf7   : > { %v771_v9 = vadd.f32 %v661_v3, %v660_v42  ;;  %v758_v44 = vadd.f32 %v757_v27, %v651_v62  ;;  %v5624_v10 = vmul.f32 0.001953125, %v459_v13  ;;  %v5626_v42 = vmul.f32 0.001953125, %v454_v19  ;;  %2128 = vmatprep.subr.bf16.mxu0 %v4102_v16  ;;  %v4480_v27 = vld [vmem:[%s7659_s0 + $0x1b0] sm:$0xff]  ;;  %2450 = vmatprep.subr.bf16.mxu1 %v4104_v4  ;;  %v7853_v19 = vld [vmem:[#allocation25_spill] sm:$0xff] }
  0xf8   : > { %7849 = vst [vmem:[#allocation8_spill] sm:$0xff] %v5609_v56  ;;  %7850 = vst [vmem:[#allocation20_spill] sm:$0xff] %v5615_v50  ;;  %v658_v39 = vmul.f32 %v5609_v56, %v5609_v56  ;;  %v659_v37 = vmul.f32 %v5615_v50, %v5615_v50  ;;  %v766_v28 = vadd.f32 %v657_v18, %v656_v30  ;;  %v7852_v30 = vld [vmem:[#allocation24_spill] sm:$0xff]  ;;  %2129 = vmatpush1.bf16.msra.mxu0 %v4106_v23 }
  0xf9   : > { %v772_v3 = vadd.f32 %v771_v9, %v662_v12  ;;  %v5635_v62 = vsub.f32 %v4480_v27, %v5481_v49  ;;  %759 = vadd.xlane.f32.xlu1 %v758_v44  ;;  %v5639_v36 = vsub.f32 %v5102_v45, %v5624_v10  ;;  %v5643_v13 = vsub.f32 %v5107_v43, %v5624_v10  ;;  %v4108_v12 = vld [vmem:[%s4701_s18 + $0x184] ss:$16 sps:$4 sm:$0xff]   ;;  %v4110_v9 = vld [vmem:[%s4701_s18 + $0x18c] ss:$16 sps:$4 sm:$0xff]   ;;  %v4112_v56 = vld [vmem:[%s4701_s18 + $0x180] ss:$16 sps:$4 sm:$0xff]  }
  0xfa   : > { %v5647_v18 = vsub.f32 %v7852_v30, %v5626_v42  ;;  %v5651_v16 = vsub.f32 %v7853_v19, %v5626_v42  ;;  %v767_v44 = vadd.f32 %v766_v28, %v658_v39  ;;  %v4481_v45 = vld [vmem:[%s7659_s0 + $0x1b8] sm:$0xff]  ;;  %v668_v27 = vmul.f32 %v5499_v48, %v5499_v48  ;;  %v469_v30 = vpop.xlane.xlu1 %468  ;;  %v4482_v39 = vld [vmem:[%s7659_s0 + $0x190] sm:$0xff]  ;;  %v464_v28 = vpop.xlane.xlu0 %463  ;;  %2451 = vmatpush1.bf16.msra.mxu1 %v4107_v22 }
  0xfb   : > { %7851 = vst [vmem:[#allocation21_spill] sm:$0xff] %v5635_v62  ;;  %v773_v4 = vadd.f32 %v772_v3, %v663_v52  ;;  %v5659_v43 = vsub.f32 %v4481_v45, %v5481_v49  ;;  %v669_v19 = vmul.f32 %v5503_v20, %v5503_v20  ;;  %v670_v52 = vmul.f32 %v5635_v62, %v5635_v62  ;;  %v4483_v49 = vld [vmem:[%s7659_s0 + $0x198] sm:$0xff] }
  0xfc   : > { %v5672_v3 = vsub.f32 %v4482_v39, %v5452_v14  ;;  %v5678_v23 = vsub.f32 %v4483_v49, %v5452_v14  ;;  %v4113_v45 = vld [vmem:[%s4701_s18 + $0x188] ss:$16 sps:$4 sm:$0xff]   ;;  %v768_v62 = vadd.f32 %v767_v44, %v659_v37  ;;  %v664_v39 = vmul.f32 %v5471_v58, %v5471_v58  ;;  %2130 = vmatprep.subr.bf16.mxu0 %v4108_v12  ;;  %v4114_v37 = vld [vmem:[%s4701_s18 + $0x1a4] ss:$16 sps:$4 sm:$0xff]  }
  0xfd   : > { %7854 = vst [vmem:[#allocation10_spill] sm:$0xff] %v5659_v43  ;;  %774 = vadd.xlane.f32.xlu0 %v773_v4  ;;  %v671_v50 = vmul.f32 %v5659_v43, %v5659_v43  ;;  %v665_v48 = vmul.f32 %v5475_v57, %v5475_v57  ;;  %v781_v20 = vadd.f32 %v669_v19, %v668_v27  ;;  %v5691_v49 = vmul.f32 0.001953125, %v469_v30  ;;  %v4116_v4 = vld [vmem:[%s4701_s18 + $0x1ac] ss:$16 sps:$4 sm:$0xff]   ;;  %v4484_v27 = vld [vmem:[%s7659_s0 + $0x1f0] sm:$0xff] }
  0xfe   : > { %7855 = vst [vmem:[#allocation14_spill] sm:$0xff] %v5672_v3  ;;  %7856 = vst [vmem:[#allocation19_spill] sm:$0xff] %v5678_v23  ;;  %v666_v14 = vmul.f32 %v5672_v3, %v5672_v3  ;;  %v667_v22 = vmul.f32 %v5678_v23, %v5678_v23  ;;  %2452 = vmatprep.subr.bf16.mxu1 %v4110_v9  ;;  %769 = vadd.xlane.f32.xlu1 %v768_v62  ;;  %v5695_v43 = vmul.f32 0.001953125, %v464_v28  ;;  %v4485_v30 = vld [vmem:[%s7659_s0 + $0x1f8] sm:$0xff]  ;;  %v4118_v9 = vld [vmem:[%s4701_s18 + $0x1a0] ss:$16 sps:$4 sm:$0xff]  }
  0xff   : > { %v776_v44 = vadd.f32 %v665_v48, %v664_v39  ;;  %v5701_v19 = vsub.f32 %v4484_v27, %v5519_v8  ;;  %v5707_v12 = vsub.f32 %v4485_v30, %v5519_v8  ;;  %2131 = vmatpush1.bf16.msra.mxu0 %v4112_v56  ;;  %v782_v62 = vadd.f32 %v781_v20, %v670_v52  ;;  %v4486_v8 = vld [vmem:[%s7659_s0 + $0x280] sm:$0xff] }
 0x100   : > { %v5712_v48 = vsub.f32 %v5139_v21, %v5691_v49  ;;  %v5716_v28 = vsub.f32 %v5144_v63, %v5691_v49  ;;  %v676_v39 = vmul.f32 %v5541_v35, %v5541_v35  ;;  %2453 = vmatpush1.bf16.msra.mxu1 %v4113_v45  ;;  %v5724_v20 = vsub.f32 %v4486_v8, %v5695_v43  ;;  %v4487_v21 = vld [vmem:[%s7659_s0 + $0x288] sm:$0xff] }
 0x101   : > { %7857 = vst [vmem:[#allocation22_spill] sm:$0xff] %v5701_v19  ;;  %7858 = vst [vmem:[#allocation23_spill] sm:$0xff] %v5707_v12  ;;  %v777_v27 = vadd.f32 %v776_v44, %v666_v14  ;;  %v5730_v63 = vsub.f32 %v4487_v21, %v5695_v43  ;;  %v677_v56 = vmul.f32 %v5545_v54, %v5545_v54  ;;  %2132 = vmatprep.subr.bf16.mxu0 %v4114_v37  ;;  %v4488_v44 = vld [vmem:[%s7659_s0 + $0x1d0] sm:$0xff]  ;;  %v4119_v8 = vld [vmem:[%s4701_s18 + $0x1a8] ss:$16 sps:$4 sm:$0xff]  }
 0x102   : > { %7859 = vst [vmem:[#allocation24_spill] sm:$0xff] %v5724_v20  ;;  %v783_v52 = vadd.f32 %v782_v62, %v671_v50  ;;  %v678_v45 = vmul.f32 %v5701_v19, %v5701_v19  ;;  %v679_v14 = vmul.f32 %v5707_v12, %v5707_v12  ;;  %v5742_v30 = vsub.f32 %v4488_v44, %v5495_v32  ;;  %v4489_v50 = vld [vmem:[%s7659_s0 + $0x1d8] sm:$0xff] }
 0x103   : > { %7860 = vst [vmem:[#allocation25_spill] sm:$0xff] %v5730_v63  ;;  %2454 = vmatprep.subr.bf16.mxu1 %v4116_v4  ;;  %v778_v21 = vadd.f32 %v777_v27, %v667_v22  ;;  %v791_v3 = vadd.f32 %v677_v56, %v676_v39  ;;  %v5749_v37 = vsub.f32 %v4489_v50, %v5495_v32  ;;  %v4490_v39 = vld [vmem:[%s7659_s0 + $0x230] sm:$0xff]  ;;  %v4491_v32 = vld [vmem:[%s7659_s0 + $0x238] sm:$0xff] }
 0x104   : > { %7861 = vst [vmem:[#allocation57_spill] sm:$0xff] %v5742_v30  ;;  %v672_v62 = vmul.f32 %v5511_v53, %v5511_v53  ;;  %2133 = vmatpush1.bf16.msra.mxu0 %v4118_v9  ;;  %784 = vadd.xlane.f32.xlu0 %v783_v52  ;;  %v673_v4 = vmul.f32 %v5515_v17, %v5515_v17  ;;  %v4122_v19 = vld [vmem:[%s4701_s18 + $0x1cc] ss:$16 sps:$4 sm:$0xff]  }
 0x105   : > { %7862 = vst [vmem:[#allocation58_spill] sm:$0xff] %v5749_v37  ;;  %v674_v22 = vmul.f32 %v5742_v30, %v5742_v30  ;;  %v5761_v27 = vsub.f32 %v4490_v39, %v5563_v31  ;;  %v5767_v9 = vsub.f32 %v4491_v32, %v5563_v31  ;;  %779 = vadd.xlane.f32.xlu1 %v778_v21  ;;  %v4120_v39 = vld [vmem:[%s4701_s18 + $0x1c4] ss:$16 sps:$4 sm:$0xff]   ;;  %v4124_v21 = vld [vmem:[%s4701_s18 + $0x1c0] ss:$16 sps:$4 sm:$0xff]  }
 0x106   : > { %v792_v56 = vadd.f32 %v791_v3, %v678_v45  ;;  %v675_v52 = vmul.f32 %v5749_v37, %v5749_v37  ;;  %v684_v44 = vmul.f32 %v5580_v40, %v5580_v40  ;;  %v685_v50 = vmul.f32 %v5584_v24, %v5584_v24  ;;  %v4492_v3 = vld [vmem:[%s7659_s0 + $0x210] sm:$0xff]  ;;  %2455 = vmatpush1.bf16.msra.mxu1 %v4119_v8 }
 0x107   : > { %7863 = vst [vmem:[#allocation59_spill] sm:$0xff] %v5761_v27  ;;  %7864 = vst [vmem:[#allocation60_spill] sm:$0xff] %v5767_v9  ;;  %v786_v30 = vadd.f32 %v673_v4, %v672_v62  ;;  %v686_v12 = vmul.f32 %v5761_v27, %v5761_v27  ;;  %v687_v31 = vmul.f32 %v5767_v9, %v5767_v9  ;;  %v4493_v62 = vld [vmem:[%s7659_s0 + $0x218] sm:$0xff]  ;;  %2134 = vmatprep.subr.bf16.mxu0 %v4120_v39  ;;  %v4494_v8 = vld [vmem:[%s7659_s0 + $0x270] sm:$0xff] }
 0x108   : > { %v5785_v45 = vsub.f32 %v4492_v3, %v5565_v29  ;;  %v793_v32 = vadd.f32 %v792_v56, %v679_v14  ;;  %v801_v37 = vadd.f32 %v685_v50, %v684_v44  ;;  %v5792_v4 = vsub.f32 %v4493_v62, %v5565_v29  ;;  %v4125_v9 = vld [vmem:[%s4701_s18 + $0x1c8] ss:$16 sps:$4 sm:$0xff]   ;;  %2456 = vmatprep.subr.bf16.mxu1 %v4122_v19 }
 0x109   : > { %v680_v27 = vmul.f32 %v5588_v41, %v5588_v41  ;;  %v787_v23 = vadd.f32 %v786_v30, %v674_v22  ;;  %v681_v3 = vmul.f32 %v5593_v61, %v5593_v61  ;;  %v5805_v56 = vsub.f32 %v4494_v8, %v5624_v10  ;;  %v4495_v30 = vld [vmem:[%s7659_s0 + $0x278] sm:$0xff]  ;;  %2135 = vmatpush1.bf16.msra.mxu0 %v4124_v21 }
 0x10a   : > { %7865 = vst [vmem:[#allocation61_spill] sm:$0xff] %v5785_v45  ;;  %7866 = vst [vmem:[#allocation62_spill] sm:$0xff] %v5792_v4  ;;  %v682_v14 = vmul.f32 %v5785_v45, %v5785_v45  ;;  %794 = vadd.xlane.f32.xlu0 %v793_v32  ;;  %v802_v29 = vadd.f32 %v801_v37, %v686_v12  ;;  %v683_v44 = vmul.f32 %v5792_v4, %v5792_v4  ;;  %v7897_v4 = vld [vmem:[#allocation35_spill] sm:$0xff] }
 0x10b   : > { %7867 = vst [vmem:[#allocation63_spill] sm:$0xff] %v5805_v56  ;;  %v5813_v22 = vsub.f32 %v4495_v30, %v5624_v10  ;;  %v692_v50 = vmul.f32 %v5639_v36, %v5639_v36  ;;  %v788_v39 = vadd.f32 %v787_v23, %v675_v52  ;;  %v796_v62 = vadd.f32 %v681_v3, %v680_v27  ;;  %v4496_v10 = vld [vmem:[%s7659_s0 + $0x250] sm:$0xff]  ;;  %v4497_v27 = vld [vmem:[%s7659_s0 + $0x258] sm:$0xff] }
 0x10c   : > { %v693_v19 = vmul.f32 %v5643_v13, %v5643_v13  ;;  %v694_v12 = vmul.f32 %v5805_v56, %v5805_v56  ;;  %v803_v37 = vadd.f32 %v802_v29, %v687_v31  ;;  %v5827_v23 = vsub.f32 %v4496_v10, %v5626_v42  ;;  %2457 = vmatpush1.bf16.msra.mxu1 %v4125_v9  ;;  %v4126_v29 = vld [vmem:[%s4701_s18 + $0x1e4] ss:$16 sps:$4 sm:$0xff]   ;;  %v4128_v30 = vld [vmem:[%s4701_s18 + $0x1ec] ss:$16 sps:$4 sm:$0xff]  }
 0x10d   : > { %7868 = vst [vmem:[#allocation64_spill] sm:$0xff] %v5813_v22  ;;  %v695_v32 = vmul.f32 %v5813_v22, %v5813_v22  ;;  %v5833_v52 = vsub.f32 %v4497_v27, %v5626_v42  ;;  %789 = vadd.xlane.f32.xlu1 %v788_v39  ;;  %v797_v31 = vadd.f32 %v796_v62, %v682_v14  ;;  %v4498_v9 = vld [vmem:[%s7659_s0 + $0x2b0] sm:$0xff] }
 0x10e   : > { %7869 = vst [vmem:[#allocation65_spill] sm:$0xff] %v5827_v23  ;;  %v811_v21 = vadd.f32 %v693_v19, %v692_v50  ;;  %v688_v3 = vmul.f32 %v5647_v18, %v5647_v18  ;;  %v689_v8 = vmul.f32 %v5651_v16, %v5651_v16  ;;  %804 = vadd.xlane.f32.xlu0 %v803_v37  ;;  %v4499_v50 = vld [vmem:[%s7659_s0 + $0x2b8] sm:$0xff]  ;;  %v4130_v62 = vld [vmem:[%s4701_s18 + $0x1e0] ss:$16 sps:$4 sm:$0xff]  }
 0x10f   : > { %7870 = vst [vmem:[#allocation66_spill] sm:$0xff] %v5833_v52  ;;  %v690_v10 = vmul.f32 %v5827_v23, %v5827_v23  ;;  %v691_v42 = vmul.f32 %v5833_v52, %v5833_v52  ;;  %v5849_v14 = vsub.f32 %v4498_v9, %v5691_v49  ;;  %v5855_v39 = vsub.f32 %v4499_v50, %v5691_v49  ;;  %v4131_v19 = vld [vmem:[%s4701_s18 + $0x1e8] ss:$16 sps:$4 sm:$0xff]   ;;  %v4500_v49 = vld [vmem:[%s7659_s0 + $0x290] sm:$0xff] }
 0x110   : > { %v798_v37 = vadd.f32 %v797_v31, %v683_v44  ;;  %v812_v27 = vadd.f32 %v811_v21, %v694_v12  ;;  %v806_v56 = vadd.f32 %v689_v8, %v688_v3  ;;  %v700_v23 = vmul.f32 %v5712_v48, %v5712_v48  ;;  %2136 = vmatprep.subr.bf16.mxu0 %v4126_v29  ;;  %v4501_v21 = vld [vmem:[%s7659_s0 + $0x298] sm:$0xff] }
 0x111   : > { %7871 = vst [vmem:[#allocation67_spill] sm:$0xff] %v5849_v14  ;;  %7872 = vst [vmem:[#allocation68_spill] sm:$0xff] %v5855_v39  ;;  %v701_v9 = vmul.f32 %v5716_v28, %v5716_v28  ;;  %v702_v22 = vmul.f32 %v5849_v14, %v5849_v14  ;;  %v703_v52 = vmul.f32 %v5855_v39, %v5855_v39  ;;  %2458 = vmatprep.subr.bf16.mxu1 %v4128_v30  ;;  %v7889_v39 = vld [vmem:[#allocation33_spill] sm:$0xff] }
 0x112   : > { %v5871_v44 = vsub.f32 %v4500_v49, %v5695_v43  ;;  %799 = vadd.xlane.f32.xlu1 %v798_v37  ;;  %v813_v12 = vadd.f32 %v812_v27, %v695_v32  ;;  %v807_v31 = vadd.f32 %v806_v56, %v690_v10  ;;  %v5877_v3 = vsub.f32 %v4501_v21, %v5695_v43  ;;  %v4137_v49 = vld [vmem:[%s4701_s18 + $0x20c] ss:$16 sps:$4 sm:$0xff]  }
 0x113   : > { %v696_v8 = vmul.f32 %v5724_v20, %v5724_v20  ;;  %v821_v29 = vadd.f32 %v701_v9, %v700_v23  ;;  %v697_v50 = vmul.f32 %v5730_v63, %v5730_v63  ;;  %2137 = vmatpush1.bf16.msra.mxu0 %v4130_v62  ;;  %2459 = vmatpush1.bf16.msra.mxu1 %v4131_v19  ;;  %v4134_v9 = vld [vmem:[%s4701_s18 + $0x204] ss:$16 sps:$4 sm:$0xff]   ;;  %v1022_v21 = vlaneseq }
 0x114   : > { %7873 = vst [vmem:[#allocation69_spill] sm:$0xff] %v5871_v44  ;;  %7874 = vst [vmem:[#allocation70_spill] sm:$0xff] %v5877_v3  ;;  %v698_v32 = vmul.f32 %v5871_v44, %v5871_v44  ;;  %814 = vadd.xlane.f32.xlu0 %v813_v12  ;;  %v808_v56 = vadd.f32 %v807_v31, %v691_v42  ;;  %v699_v43 = vmul.f32 %v5877_v3, %v5877_v3 }
 0x115   : > { %v822_v30 = vadd.f32 %v821_v29, %v702_v22  ;;  %v816_v10 = vadd.f32 %v697_v50, %v696_v8  ;;  %2267 = vmatprep.subr.bf16.mxu0 %v4134_v9  ;;  %2589 = vmatprep.subr.bf16.mxu1 %v4137_v49  ;;  %v1023_v62 = vshrl.u32 %v1022_v21, 7 }
 0x116   : > { %809 = vadd.xlane.f32.xlu1 %v808_v56 }
 0x117   : > { %v823_v37 = vadd.f32 %v822_v30, %v703_v52  ;;  %v817_v23 = vadd.f32 %v816_v10, %v698_v32  ;;  %v5889_v42 = vsub.s32 1, %v1023_v62  ;;  %v5891_v22 = vsub.s32 2, %v1023_v62  ;;  %v1020_v52 = vld [vmem:[%s7660_s1] sm:$0xf] }
 0x118   : > { %v5896_v50 = vsub.s32 0, %v1023_v62  ;;  %v1142_v30 = vld [vmem:[%s7661_s2] sm:$0xf] }
 0x119   : > { %824 = vadd.xlane.f32.xlu0 %v823_v37  ;;  %v818_v27 = vadd.f32 %v817_v23, %v699_v43  ;;  %7875 = vst [vmem:[#allocation71_spill] sm:$0xff] %v5889_v42  ;;  %7876 = vst [vmem:[#allocation72_spill] sm:$0xff] %v5891_v22  ;;  %v5902_v43 = vrot.slane %v1020_v52, %v5889_v42  ;;  %v5905_v10 = vrot.slane %v1020_v52, %v5891_v22 }
 0x11a   : > { %7877 = vst [vmem:[#allocation73_spill] sm:$0xff] %v5896_v50  ;;  %v5907_v37 = vsub.s32 3, %v1023_v62  ;;  %v5925_v62 = vrot.slane %v1142_v30, %v5891_v22 }
 0x11b   : > { %819 = vadd.xlane.f32.xlu1 %v818_v27 }
 0x11c   : > { %7878 = vst [vmem:[#allocation74_spill] sm:$0xff] %v5907_v37 }
 0x165   : > { %v720_v19 = vpop.xlane.xlu0 %719 }
 0x166   : > { %v845_v12 = vmul.f32 0.001953125, %v720_v19 }
 0x168   : > { %v870_v31 = vadd.f32 1e-06, %v845_v12 }
 0x169   : > { %v474_v29 = vpop.xlane.xlu0 %473 }
 0x16a   : > { %v725_v8 = vpop.xlane.xlu1 %724  ;;  %4228 = vrsqrt.f32 %v870_v31  ;;  %v513_v56 = vmul.f32 0.001953125, %v474_v29  ;;  %v5922_v31 = vrot.slane %v1142_v30, %v5889_v42  ;;  %v7883_v42 = vld [vmem:[#allocation28_spill] sm:$0xff] }
 0x16b   : > { %v846_v32 = vmul.f32 0.001953125, %v725_v8 }
 0x16c   : > { %v5910_v27 = vsub.f32 %v5212_v59, %v513_v56  ;;  %v5913_v9 = vsub.f32 %v5217_v51, %v513_v56  ;;  %v5916_v49 = vsub.f32 %v5245_v33, %v513_v56  ;;  %v5919_v12 = vsub.f32 %v5264_v34, %v513_v56 }
 0x16d   : > { %v871_v23 = vadd.f32 1e-06, %v846_v32  ;;  %v730_v19 = vpop.xlane.xlu0 %729  ;;  %v5928_v59 = vrot.slane %v1020_v52, %v5896_v50  ;;  %v5937_v32 = vrot.slane %v1142_v30, %v5896_v50  ;;  %v5940_v56 = vrot.slane %v1020_v52, %v5907_v37 }
 0x16e   : > { %7879 = vst [vmem:[#allocation75_spill] sm:$0xff] %v5910_v27  ;;  %7880 = vst [vmem:[#allocation76_spill] sm:$0xff] %v5913_v9  ;;  %v479_v21 = vpop.xlane.xlu1 %478  ;;  %v847_v8 = vmul.f32 0.001953125, %v730_v19  ;;  %v704_v33 = vmul.f32 %v5910_v27, %v5910_v27  ;;  %v705_v29 = vmul.f32 %v5913_v9, %v5913_v9  ;;  %v706_v34 = vmul.f32 %v5916_v49, %v5916_v49  ;;  %v7887_v27 = vld [vmem:[#allocation31_spill] sm:$0xff] }
 0x16f   : > { %7881 = vst [vmem:[#allocation77_spill] sm:$0xff] %v5916_v49  ;;  %7882 = vst [vmem:[#allocation78_spill] sm:$0xff] %v5919_v12  ;;  %4230 = vrsqrt.f32 %v871_v23  ;;  %v514_v51 = vmul.f32 0.001953125, %v479_v21  ;;  %v7885_v23 = vld [vmem:[#allocation29_spill] sm:$0xff]  ;;  %v707_v49 = vmul.f32 %v5919_v12, %v5919_v12  ;;  %v5957_v52 = vrot.slane %v1142_v30, %v5907_v37 }
 0x170   : > { %v872_v19 = vadd.f32 1e-06, %v847_v8  ;;  %v826_v50 = vadd.f32 %v705_v29, %v704_v33  ;;  %v7891_v33 = vld [vmem:[#allocation26_spill] sm:$0xff] }
 0x171   : > { %v5943_v22 = vsub.f32 %v7883_v42, %v514_v51  ;;  %v5946_v21 = vsub.f32 %v7885_v23, %v514_v51  ;;  %v5949_v14 = vsub.f32 %v7887_v27, %v514_v51  ;;  %v5954_v3 = vsub.f32 %v7889_v39, %v514_v51 }
 0x172   : > { %v735_v9 = vpop.xlane.xlu1 %734  ;;  %v489_v44 = vpop.xlane.xlu0 %488  ;;  %4232 = vrsqrt.f32 %v872_v19  ;;  %v827_v27 = vadd.f32 %v826_v50, %v706_v34  ;;  %v7893_v19 = vld [vmem:[#allocation30_spill] sm:$0xff] }
 0x173   : > { %7884 = vst [vmem:[#allocation28_spill] sm:$0xff] %v5943_v22  ;;  %7886 = vst [vmem:[#allocation29_spill] sm:$0xff] %v5946_v21  ;;  %v848_v42 = vmul.f32 0.001953125, %v735_v9  ;;  %v515_v23 = vmul.f32 0.001953125, %v489_v44  ;;  %v708_v8 = vmul.f32 %v5943_v22, %v5943_v22  ;;  %v709_v45 = vmul.f32 %v5946_v21, %v5946_v21  ;;  %v7892_v44 = vld [vmem:[#allocation27_spill] sm:$0xff]  ;;  %v7895_v21 = vld [vmem:[#allocation32_spill] sm:$0xff] }
 0x174   : > { %7888 = vst [vmem:[#allocation31_spill] sm:$0xff] %v5949_v14  ;;  %7890 = vst [vmem:[#allocation33_spill] sm:$0xff] %v5954_v3  ;;  %v710_v12 = vmul.f32 %v5949_v14, %v5949_v14  ;;  %v711_v39 = vmul.f32 %v5954_v3, %v5954_v3  ;;  %v5967_v51 = vpop.eup %4228  ;;  %v828_v37 = vadd.f32 %v827_v27, %v707_v49 }
 0x175   : > { %v873_v30 = vadd.f32 1e-06, %v848_v42  ;;  %v5970_v29 = vsub.f32 %v7891_v33, %v515_v23  ;;  %v5973_v9 = vsub.f32 %v7892_v44, %v515_v23  ;;  %v5976_v50 = vsub.f32 %v7893_v19, %v515_v23 }
 0x176   : > { %v745_v34 = vpop.xlane.xlu0 %744  ;;  %v831_v22 = vadd.f32 %v709_v45, %v708_v8  ;;  %v5979_v14 = vsub.f32 %v7895_v21, %v515_v23  ;;  %v921_v3 = vmul.f32 %v5967_v51, %v7897_v4  ;;  %829 = vadd.xlane.f32.xlu1 %v828_v37 }
 0x177   : > { %7894 = vst [vmem:[#allocation26_spill] sm:$0xff] %v5976_v50  ;;  %4234 = vrsqrt.f32 %v873_v30  ;;  %v740_v42 = vpop.xlane.xlu1 %739  ;;  %v850_v20 = vmul.f32 0.001953125, %v745_v34  ;;  %v712_v33 = vmul.f32 %v5970_v29, %v5970_v29  ;;  %v713_v44 = vmul.f32 %v5973_v9, %v5973_v9 }
 0x178   : > { %7896 = vst [vmem:[#allocation27_spill] sm:$0xff] %v5979_v14  ;;  %v849_v19 = vmul.f32 0.001953125, %v740_v42  ;;  %v832_v63 = vadd.f32 %v831_v22, %v710_v12  ;;  %v714_v45 = vmul.f32 %v5976_v50, %v5976_v50  ;;  %v715_v49 = vmul.f32 %v5979_v14, %v5979_v14  ;;  %v7898_v14 = vld [vmem:[#allocation34_spill] sm:$0xff] }
 0x179   : > { %v5991_v21 = vpop.eup %4230  ;;  %v875_v4 = vadd.f32 1e-06, %v850_v20  ;;  %v836_v23 = vsel %vm480_vm0, %v712_v33, 0.0  ;;  %v837_v8 = vsel %vm480_vm0, %v713_v44, 0.0  ;;  %v1043_v27 = vmul.f32 %v5902_v43, %v921_v3 }
 0x17a   : > { %v874_v30 = vadd.f32 1e-06, %v849_v19  ;;  %v833_v34 = vadd.f32 %v832_v63, %v711_v39  ;;  %v838_v42 = vadd.f32 %v837_v8, %v836_v23  ;;  %v839_v22 = vsel %vm480_vm0, %v714_v45, 0.0  ;;  %v7899_v45 = vld [vmem:[#allocation37_spill] sm:$0xff] }
 0x17b   : > { %4236 = vrsqrt.f32 %v875_v4  ;;  %v755_v37 = vpop.xlane.xlu0 %754  ;;  %v841_v12 = vsel %vm480_vm0, %v715_v49, 0.0  ;;  %v925_v50 = vmul.f32 %v5991_v21, %v5312_v55  ;;  %v1165_v20 = vadd.f32 %v5922_v31, %v1043_v27 }
 0x17c   : > { %4238 = vrsqrt.f32 %v874_v30  ;;  %v852_v33 = vmul.f32 0.001953125, %v755_v37  ;;  %834 = vadd.xlane.f32.xlu0 %v833_v34  ;;  %v840_v44 = vadd.f32 %v839_v22, %v838_v42  ;;  %v920_v3 = vmul.f32 %v5967_v51, %v7898_v14  ;;  %v6003_v63 = vpop.eup %4232 }
 0x17d   : > { %v1047_v39 = vmul.f32 %v5902_v43, %v925_v50  ;;  %v924_v19 = vmul.f32 %v5991_v21, %v5309_v60  ;;  %v923_v49 = vmul.f32 %v5967_v51, %v7899_v45  ;;  %v927_v55 = vmul.f32 %v5991_v21, %v5318_v15  ;;  %v7900_v60 = vld [vmem:[#allocation38_spill] sm:$0xff] }
 0x17e   : > { %v750_v4 = vpop.xlane.xlu1 %749  ;;  %v877_v23 = vadd.f32 1e-06, %v852_v33  ;;  %v842_v8 = vadd.f32 %v841_v12, %v840_v44  ;;  %v1042_v27 = vmul.f32 %v5928_v59, %v920_v3  ;;  %v929_v14 = vmul.f32 %v6003_v63, %v5301_v26 }
 0x17f   : > { %v851_v30 = vmul.f32 0.001953125, %v750_v4  ;;  %v1169_v50 = vadd.f32 %v5922_v31, %v1047_v39  ;;  %v1046_v34 = vmul.f32 %v5928_v59, %v924_v19  ;;  %v928_v42 = vmul.f32 %v6003_v63, %v7900_v60 }
 0x180   : > { %4240 = vrsqrt.f32 %v877_v23  ;;  %843 = vadd.xlane.f32.xlu1 %v842_v8  ;;  %v1164_v15 = vadd.f32 %v5937_v32, %v1042_v27  ;;  %v1051_v22 = vmul.f32 %v5902_v43, %v929_v14  ;;  %v1045_v37 = vmul.f32 %v5940_v56, %v923_v49  ;;  %v4132_v49 = vld [vmem:[%s4701_s18 + $0x200] ss:$16 sps:$4 sm:$0xff]   ;;  %v4135_v23 = vld [vmem:[%s4701_s18 + $0x208] ss:$16 sps:$4 sm:$0xff]  }
 0x181   : > { %v6022_v12 = vpop.eup %4234  ;;  %v876_v26 = vadd.f32 1e-06, %v851_v30  ;;  %v1265_v33 = vpack.c.bf16 %v1169_v50, %v1165_v20  ;;  %v1168_v44 = vadd.f32 %v5937_v32, %v1046_v34  ;;  %v1050_v3 = vmul.f32 %v5928_v59, %v928_v42  ;;  %v4140_v30 = vld [vmem:[%s4701_s18 + $0x224] ss:$16 sps:$4 sm:$0xff]   ;;  %v4143_v50 = vld [vmem:[%s4701_s18 + $0x22c] ss:$16 sps:$4 sm:$0xff]  }
 0x182   : > { %v933_v19 = vmul.f32 %v6022_v12, %v5333_v11  ;;  %v1173_v45 = vadd.f32 %v5922_v31, %v1051_v22  ;;  %v932_v4 = vmul.f32 %v6022_v12, %v5330_v1  ;;  %v1049_v8 = vmul.f32 %v5940_v56, %v927_v55 }
 0x183   : > { %v765_v39 = vpop.xlane.xlu0 %764  ;;  %4242 = vrsqrt.f32 %v876_v26  ;;  %2138 = vmatprep.mubr.bf16.mxu0 %v1265_v33  ;;  %2460 = vmatprep.mubr.bf16.mxu1 %v1265_v33  ;;  %v1264_v27 = vpack.c.bf16 %v1168_v44, %v1164_v15  ;;  %v1172_v14 = vadd.f32 %v5937_v32, %v1050_v3  ;;  %v1167_v60 = vadd.f32 %v5957_v52, %v1045_v37  ;;  %v7901_v15 = vld [vmem:[#allocation36_spill] sm:$0xff] }
 0x184   : > { %v854_v20 = vmul.f32 0.001953125, %v765_v39  ;;  %v1055_v11 = vmul.f32 %v5902_v43, %v933_v19  ;;  %v1054_v34 = vmul.f32 %v5928_v59, %v932_v4  ;;  %v1171_v1 = vadd.f32 %v5957_v52, %v1049_v8  ;;  %v7902_v33 = vld [vmem:[#allocation40_spill] sm:$0xff] }
 0x185   : > { %v6041_v42 = vpop.eup %4236  ;;  %2139 = vmatmul.mubr.bf16.vlgmr.msra.gmra.mrb[0].mxu0 %v1264_v27  ;;  %2461 = vmatmul.mubr.bf16.vlgmr.msra.gmra.mrb[0].mxu1 %v1264_v27  ;;  %v922_v26 = vmul.f32 %v5967_v51, %v7901_v15  ;;  %v926_v44 = vmul.f32 %v5991_v21, %v7902_v33  ;;  %v6049_v3 = vmul.f32 %v6003_v63, %v5321_v46  ;;  %v4141_v27 = vld [vmem:[%s4701_s18 + $0x228] ss:$16 sps:$4 sm:$0xff]  }
 0x186   : > { %v760_v55 = vpop.xlane.xlu1 %759  ;;  %v879_v22 = vadd.f32 1e-06, %v854_v20  ;;  %v6051_v37 = vpop.eup %4238  ;;  %v1177_v19 = vadd.f32 %v5922_v31, %v1055_v11  ;;  %v1176_v4 = vadd.f32 %v5937_v32, %v1054_v34  ;;  %v941_v8 = vmul.f32 %v6041_v42, %v5363_v7  ;;  %2268 = vmatpush1.bf16.msra.mxu0 %v4132_v49  ;;  %2590 = vmatpush1.bf16.msra.mxu1 %v4135_v23  ;;  %v4138_v20 = vld [vmem:[%s4701_s18 + $0x220] ss:$16 sps:$4 sm:$0xff]  }
 0x187   : > { %v853_v39 = vmul.f32 0.001953125, %v760_v55  ;;  %v937_v51 = vmul.f32 %v6051_v37, %v5343_v6  ;;  %v936_v46 = vmul.f32 %v6051_v37, %v5340_v2  ;;  %v940_v21 = vmul.f32 %v6041_v42, %v5360_v5  ;;  %2269 = vmatprep.subr.bf16.mxu0 %v4140_v30  ;;  %2591 = vmatprep.subr.bf16.mxu1 %v4143_v50  ;;  %v4146_v55 = vld [vmem:[%s4701_s18 + $0x244] ss:$16 sps:$4 sm:$0xff]  }
 0x188   : > { %4244 = vrsqrt.f32 %v879_v22  ;;  %v1269_v34 = vpack.c.bf16 %v1177_v19, %v1173_v45  ;;  %v1268_v49 = vpack.c.bf16 %v1176_v4, %v1172_v14  ;;  %v1063_v23 = vmul.f32 %v5902_v43, %v941_v8  ;;  %v4149_v22 = vld [vmem:[%s4701_s18 + $0x24c] ss:$16 sps:$4 sm:$0xff]  }
 0x189   : > { %v878_v11 = vadd.f32 1e-06, %v853_v39  ;;  %v1059_v6 = vmul.f32 %v5902_v43, %v937_v51  ;;  %v1058_v2 = vmul.f32 %v5928_v59, %v936_v46  ;;  %v1062_v33 = vmul.f32 %v5928_v59, %v940_v21  ;;  %v7904_v46 = vld [vmem:[#allocation48_spill] sm:$0xff] }
 0x18a   : > { %v775_v7 = vpop.xlane.xlu0 %774  ;;  %v6071_v5 = vpop.eup %4240  ;;  %2148 = vmatprep.mubr.bf16.mxu0 %v1269_v34  ;;  %2470 = vmatprep.mubr.bf16.mxu1 %v1269_v34  ;;  %v1185_v45 = vadd.f32 %v5922_v31, %v1063_v23  ;;  %v6074_v14 = vpack.c.bf16 %v1171_v1, %v1167_v60  ;;  %v1044_v50 = vmul.f32 %v5905_v10, %v922_v26  ;;  %v4144_v1 = vld [vmem:[%s4701_s18 + $0x240] ss:$16 sps:$4 sm:$0xff]   ;;  %v4147_v26 = vld [vmem:[%s4701_s18 + $0x248] ss:$16 sps:$4 sm:$0xff]   ;;  %v4155_v23 = vld [vmem:[%s4701_s18 + $0x26c] ss:$16 sps:$4 sm:$0xff]  }
 0x18b   : > { %v856_v15 = vmul.f32 0.001953125, %v775_v7  ;;  %4246 = vrsqrt.f32 %v878_v11  ;;  %v770_v30 = vpop.xlane.xlu1 %769  ;;  %v1181_v4 = vadd.f32 %v5922_v31, %v1059_v6  ;;  %v1180_v8 = vadd.f32 %v5937_v32, %v1058_v2  ;;  %2270 = vmatpush1.bf16.msra.mxu0 %v4138_v20  ;;  %2592 = vmatpush1.bf16.msra.mxu1 %v4141_v27  ;;  %v7905_v11 = vld [vmem:[#allocation47_spill] sm:$0xff]  ;;  %v4152_v27 = vld [vmem:[%s4701_s18 + $0x264] ss:$16 sps:$4 sm:$0xff]  }
 0x18c   : > { %7903 = vst [vmem:[#allocation30_spill] sm:$0xff] %v6074_v14  ;;  %v855_v39 = vmul.f32 0.001953125, %v770_v30  ;;  %v1184_v51 = vadd.f32 %v5937_v32, %v1062_v33  ;;  %v949_v21 = vmul.f32 %v6071_v5, %v7904_v46  ;;  %v948_v60 = vmul.f32 %v6071_v5, %v7905_v11  ;;  %2271 = vmatprep.subr.bf16.mxu0 %v4146_v55  ;;  %v7906_v2 = vld [vmem:[#allocation44_spill] sm:$0xff]  ;;  %v7907_v55 = vld [vmem:[#allocation43_spill] sm:$0xff] }
 0x18d   : > { %v881_v19 = vadd.f32 1e-06, %v856_v15  ;;  %2593 = vmatprep.subr.bf16.mxu1 %v4149_v22  ;;  %v6086_v7 = vpop.eup %4242  ;;  %2149 = vmatmul.mubr.bf16.gmra.mrb[4].mxu0 %v1268_v49  ;;  %v1273_v20 = vpack.c.bf16 %v1185_v45, %v1181_v4  ;;  %v1048_v15 = vmul.f32 %v5905_v10, %v926_v44  ;;  %v1166_v45 = vadd.f32 %v5925_v62, %v1044_v50  ;;  %v4153_v11 = vld [vmem:[%s4701_s18 + $0x268] ss:$16 sps:$4 sm:$0xff]  }
 0x18e   : > { %v880_v34 = vadd.f32 1e-06, %v855_v39  ;;  %2471 = vmatmul.mubr.bf16.gmra.mrb[4].mxu1 %v1268_v49  ;;  %v1272_v6 = vpack.c.bf16 %v1184_v51, %v1180_v8  ;;  %v945_v33 = vmul.f32 %v6086_v7, %v7906_v2  ;;  %v1071_v30 = vmul.f32 %v5902_v43, %v949_v21  ;;  %v4150_v21 = vld [vmem:[%s4701_s18 + $0x260] ss:$16 sps:$4 sm:$0xff]  }
 0x18f   : > { %4248 = vrsqrt.f32 %v881_v19  ;;  %v944_v22 = vmul.f32 %v6086_v7, %v7907_v55  ;;  %2158 = vmatprep.mubr.bf16.mxu0 %v1273_v20  ;;  %2480 = vmatprep.mubr.bf16.mxu1 %v1273_v20  ;;  %v1070_v49 = vmul.f32 %v5928_v59, %v948_v60  ;;  %v1170_v44 = vadd.f32 %v5925_v62, %v1048_v15  ;;  %v7909_v15 = vld [vmem:[#allocation42_spill] sm:$0xff] }
 0x190   : > { %4250 = vrsqrt.f32 %v880_v34  ;;  %v1067_v8 = vmul.f32 %v5902_v43, %v945_v33  ;;  %v1193_v51 = vadd.f32 %v5922_v31, %v1071_v30  ;;  %2272 = vmatpush1.bf16.msra.mxu0 %v4144_v1  ;;  %2594 = vmatpush1.bf16.msra.mxu1 %v4147_v26  ;;  %v935_v2 = vmul.f32 %v6022_v12, %v7909_v15  ;;  %v7910_v30 = vld [vmem:[#allocation52_spill] sm:$0xff] }
 0x191   : > { %v785_v39 = vpop.xlane.xlu0 %784  ;;  %v1066_v46 = vmul.f32 %v5928_v59, %v944_v22  ;;  %v1192_v50 = vadd.f32 %v5937_v32, %v1070_v49  ;;  %2273 = vmatprep.subr.bf16.mxu0 %v4152_v27  ;;  %2595 = vmatprep.subr.bf16.mxu1 %v4155_v23  ;;  %v6107_v20 = vpack.c.bf16 %v1170_v44, %v1166_v45  ;;  %v4158_v23 = vld [vmem:[%s4701_s18 + $0x284] ss:$16 sps:$4 sm:$0xff]   ;;  %v4161_v49 = vld [vmem:[%s4701_s18 + $0x28c] ss:$16 sps:$4 sm:$0xff]   ;;  %v4156_v15 = vld [vmem:[%s4701_s18 + $0x280] ss:$16 sps:$4 sm:$0xff]  }
 0x192   : > { %v780_v19 = vpop.xlane.xlu1 %779  ;;  %v858_v4 = vmul.f32 0.001953125, %v785_v39  ;;  %v6104_v34 = vpop.eup %4244  ;;  %v1189_v1 = vadd.f32 %v5922_v31, %v1067_v8  ;;  %v7911_v39 = vld [vmem:[#allocation51_spill] sm:$0xff]  ;;  %v1053_v45 = vmul.f32 %v5940_v56, %v6049_v3  ;;  %v1057_v44 = vmul.f32 %v5940_v56, %v935_v2 }
 0x193   : > { %v857_v60 = vmul.f32 0.001953125, %v780_v19  ;;  %7908 = vst [vmem:[#allocation32_spill] sm:$0xff] %v6107_v20  ;;  %v1188_v26 = vadd.f32 %v5937_v32, %v1066_v46  ;;  %v957_v55 = vmul.f32 %v6104_v34, %v7910_v30  ;;  %v956_v27 = vmul.f32 %v6104_v34, %v7911_v39  ;;  %v4159_v30 = vld [vmem:[%s4701_s18 + $0x288] ss:$16 sps:$4 sm:$0xff]  }
 0x194   : > { %v883_v33 = vadd.f32 1e-06, %v858_v4  ;;  %v1277_v8 = vpack.c.bf16 %v1193_v51, %v1189_v1  ;;  %2274 = vmatpush1.bf16.msra.mxu0 %v4150_v21  ;;  %2596 = vmatpush1.bf16.msra.mxu1 %v4153_v11  ;;  %v4167_v51 = vld [vmem:[%s4701_s18 + $0x2ac] ss:$16 sps:$4 sm:$0xff]   ;;  %v1175_v11 = vadd.f32 %v5957_v52, %v1053_v45 }
 0x195   : > { %v882_v22 = vadd.f32 1e-06, %v857_v60  ;;  %v6122_v19 = vpop.eup %4246  ;;  %v6124_v46 = vpack.c.bf16 %v1192_v50, %v1188_v26  ;;  %v1079_v60 = vmul.f32 %v5902_v43, %v957_v55  ;;  %2159 = vmatmul.mubr.bf16.gmra.mrb[8].mxu0 %v1272_v6  ;;  %v1078_v21 = vmul.f32 %v5928_v59, %v956_v27  ;;  %2275 = vmatprep.subr.bf16.mxu0 %v4158_v23 }
 0x196   : > { %4252 = vrsqrt.f32 %v883_v33  ;;  %2481 = vmatmul.mubr.bf16.gmra.mrb[8].mxu1 %v1272_v6  ;;  %v953_v3 = vmul.f32 %v6122_v19, %v5403_v25  ;;  %v952_v2 = vmul.f32 %v6122_v19, %v5399_v47  ;;  %v4164_v33 = vld [vmem:[%s4701_s18 + $0x2a4] ss:$16 sps:$4 sm:$0xff]   ;;  %2168 = vmatprep.mubr.bf16.mxu0 %v1277_v8  ;;  %v1179_v55 = vadd.f32 %v5957_v52, %v1057_v44 }
 0x197   : > { %v795_v4 = vpop.xlane.xlu0 %794  ;;  %4254 = vrsqrt.f32 %v882_v22  ;;  %2490 = vmatprep.mubr.bf16.mxu1 %v1277_v8  ;;  %v1201_v50 = vadd.f32 %v5922_v31, %v1079_v60  ;;  %2597 = vmatprep.subr.bf16.mxu1 %v4161_v49  ;;  %v1200_v27 = vadd.f32 %v5937_v32, %v1078_v21  ;;  %v7912_v8 = vld [vmem:[#allocation56_spill] sm:$0xff]  ;;  %v7913_v60 = vld [vmem:[#allocation55_spill] sm:$0xff] }
 0x198   : > { %v860_v39 = vmul.f32 0.001953125, %v795_v4  ;;  %v1075_v25 = vmul.f32 %v5902_v43, %v953_v3  ;;  %v1074_v47 = vmul.f32 %v5928_v59, %v952_v2  ;;  %2276 = vmatpush1.bf16.msra.mxu0 %v4156_v15  ;;  %2598 = vmatpush1.bf16.msra.mxu1 %v4159_v30  ;;  %v4165_v3 = vld [vmem:[%s4701_s18 + $0x2a8] ss:$16 sps:$4 sm:$0xff]  }
 0x199   : > { %v6138_v1 = vpop.eup %4248  ;;  %2277 = vmatprep.subr.bf16.mxu0 %v4164_v33  ;;  %2599 = vmatprep.subr.bf16.mxu1 %v4167_v51  ;;  %v4170_v33 = vld [vmem:[%s4701_s18 + $0x2c4] ss:$16 sps:$4 sm:$0xff]   ;;  %v4173_v51 = vld [vmem:[%s4701_s18 + $0x2cc] ss:$16 sps:$4 sm:$0xff]  }
 0x19a   : > { %v790_v6 = vpop.xlane.xlu1 %789  ;;  %v885_v26 = vadd.f32 1e-06, %v860_v39  ;;  %v965_v45 = vmul.f32 %v6138_v1, %v7912_v8  ;;  %v964_v20 = vmul.f32 %v6138_v1, %v7913_v60  ;;  %v4162_v39 = vld [vmem:[%s4701_s18 + $0x2a0] ss:$16 sps:$4 sm:$0xff]   ;;  %v6150_v14 = vpop.eup %4250  ;;  %v1197_v49 = vadd.f32 %v5922_v31, %v1075_v25  ;;  %v4176_v60 = vld [vmem:[%s4701_s18 + $0x2e4] ss:$16 sps:$4 sm:$0xff]  }
 0x19b   : > { %v859_v22 = vmul.f32 0.001953125, %v790_v6  ;;  %v805_v4 = vpop.xlane.xlu0 %804  ;;  %v1196_v44 = vadd.f32 %v5937_v32, %v1074_v47  ;;  %v961_v21 = vmul.f32 %v6150_v14, %v5440_v38  ;;  %v960_v30 = vmul.f32 %v6150_v14, %v5436_v0  ;;  %v4171_v0 = vld [vmem:[%s4701_s18 + $0x2c8] ss:$16 sps:$4 sm:$0xff]  }
 0x19c   : > { %4256 = vrsqrt.f32 %v885_v26  ;;  %v862_v23 = vmul.f32 0.001953125, %v805_v4  ;;  %v1087_v15 = vmul.f32 %v5902_v43, %v965_v45  ;;  %v1281_v4 = vpack.c.bf16 %v1201_v50, %v1197_v49  ;;  %2278 = vmatpush1.bf16.msra.mxu0 %v4162_v39  ;;  %2600 = vmatpush1.bf16.msra.mxu1 %v4165_v3  ;;  %v4168_v45 = vld [vmem:[%s4701_s18 + $0x2c0] ss:$16 sps:$4 sm:$0xff]  }
 0x19d   : > { %v884_v2 = vadd.f32 1e-06, %v859_v22  ;;  %v6159_v8 = vpack.c.bf16 %v1200_v27, %v1196_v44  ;;  %v1086_v25 = vmul.f32 %v5928_v59, %v964_v20  ;;  %v1083_v38 = vmul.f32 %v5902_v43, %v961_v21  ;;  %2169 = vmatmul.mubr.bf16.gmra.mrb[12].mxu0 %v6124_v46  ;;  %v7914_v21 = vld [vmem:[#allocation39_spill] sm:$0xff]  ;;  %2279 = vmatprep.subr.bf16.mxu0 %v4170_v33 }
 0x19e   : > { %v887_v26 = vadd.f32 1e-06, %v862_v23  ;;  %v1209_v22 = vadd.f32 %v5922_v31, %v1087_v15  ;;  %2491 = vmatmul.mubr.bf16.gmra.mrb[12].mxu1 %v6124_v46  ;;  %v1082_v20 = vmul.f32 %v5928_v59, %v960_v30  ;;  %v6173_v23 = vpack.c.bf16 %v1179_v55, %v1175_v11  ;;  %2178 = vmatprep.mubr.bf16.mxu0 %v1281_v4  ;;  %v7915_v55 = vld [vmem:[#allocation7_spill] sm:$0xff] }
 0x19f   : > { %v800_v6 = vpop.xlane.xlu1 %799  ;;  %4258 = vrsqrt.f32 %v884_v2  ;;  %v1208_v27 = vadd.f32 %v5937_v32, %v1086_v25  ;;  %2500 = vmatprep.mubr.bf16.mxu1 %v1281_v4  ;;  %v1205_v44 = vadd.f32 %v5922_v31, %v1083_v38  ;;  %v4179_v2 = vld [vmem:[%s4701_s18 + $0x2ec] ss:$16 sps:$4 sm:$0xff]   ;;  %v930_v46 = vmul.f32 %v6003_v63, %v7914_v21  ;;  %2601 = vmatprep.subr.bf16.mxu1 %v4173_v51  ;;  %v4174_v4 = vld [vmem:[%s4701_s18 + $0x2e0] ss:$16 sps:$4 sm:$0xff]   ;;  %v4177_v63 = vld [vmem:[%s4701_s18 + $0x2e8] ss:$16 sps:$4 sm:$0xff]  }
 0x1a0   : > { %v861_v47 = vmul.f32 0.001953125, %v800_v6  ;;  %4260 = vrsqrt.f32 %v887_v26  ;;  %v6175_v49 = vpop.eup %4252  ;;  %v1204_v11 = vadd.f32 %v5937_v32, %v1082_v20  ;;  %v7916_v26 = vld [vmem:[#allocation6_spill] sm:$0xff]  ;;  %2280 = vmatpush1.bf16.msra.mxu0 %v4168_v45  ;;  %2602 = vmatpush1.bf16.msra.mxu1 %v4171_v0  ;;  %v7917_v45 = vld [vmem:[#allocation41_spill] sm:$0xff] }
 0x1a1   : > { %v815_v50 = vpop.xlane.xlu0 %814  ;;  %v6181_v15 = vpop.eup %4254  ;;  %v973_v6 = vmul.f32 %v6175_v49, %v7915_v55  ;;  %v972_v25 = vmul.f32 %v6175_v49, %v7916_v26  ;;  %2281 = vmatprep.subr.bf16.mxu0 %v4176_v60  ;;  %2603 = vmatprep.subr.bf16.mxu1 %v4179_v2  ;;  %v934_v0 = vmul.f32 %v6022_v12, %v7917_v45  ;;  %v4182_v60 = vld [vmem:[%s4701_s18 + $0x304] ss:$16 sps:$4 sm:$0xff]   ;;  %v4180_v26 = vld [vmem:[%s4701_s18 + $0x300] ss:$16 sps:$4 sm:$0xff]  }
 0x1a2   : > { %v886_v39 = vadd.f32 1e-06, %v861_v47  ;;  %v864_v3 = vmul.f32 0.001953125, %v815_v50  ;;  %v1285_v50 = vpack.c.bf16 %v1209_v22, %v1205_v44  ;;  %v6190_v21 = vpack.c.bf16 %v1208_v27, %v1204_v11 }
 0x1a3   : > { %v810_v30 = vpop.xlane.xlu1 %809  ;;  %v969_v20 = vmul.f32 %v6181_v15, %v5475_v57  ;;  %v1095_v55 = vmul.f32 %v5902_v43, %v973_v6  ;;  %v968_v33 = vmul.f32 %v6181_v15, %v5471_v58  ;;  %v1094_v22 = vmul.f32 %v5928_v59, %v972_v25  ;;  %v4183_v25 = vld [vmem:[%s4701_s18 + $0x308] ss:$16 sps:$4 sm:$0xff]  }
 0x1a4   : > { %4262 = vrsqrt.f32 %v886_v39  ;;  %v863_v47 = vmul.f32 0.001953125, %v810_v30  ;;  %v889_v38 = vadd.f32 1e-06, %v864_v3  ;;  %v4185_v30 = vld [vmem:[%s4701_s18 + $0x30c] ss:$16 sps:$4 sm:$0xff]   ;;  %2282 = vmatpush1.bf16.msra.mxu0 %v4174_v4  ;;  %2604 = vmatpush1.bf16.msra.mxu1 %v4177_v63 }
 0x1a5   : > { %v1091_v3 = vmul.f32 %v5902_v43, %v969_v20  ;;  %v1217_v44 = vadd.f32 %v5922_v31, %v1095_v55  ;;  %v1090_v58 = vmul.f32 %v5928_v59, %v968_v33  ;;  %v1216_v2 = vadd.f32 %v5937_v32, %v1094_v22  ;;  %2179 = vmatmul.mubr.bf16.gmra.mrb[16].mxu0 %v6159_v8  ;;  %v4188_v33 = vld [vmem:[%s4701_s18 + $0x324] ss:$16 sps:$4 sm:$0xff]   ;;  %v4191_v63 = vld [vmem:[%s4701_s18 + $0x32c] ss:$16 sps:$4 sm:$0xff]  }
 0x1a6   : > { %v888_v51 = vadd.f32 1e-06, %v863_v47  ;;  %4264 = vrsqrt.f32 %v889_v38  ;;  %v825_v39 = vpop.xlane.xlu0 %824  ;;  %v6200_v27 = vpop.eup %4256  ;;  %2501 = vmatmul.mubr.bf16.gmra.mrb[16].mxu1 %v6159_v8  ;;  %2188 = vmatprep.mubr.bf16.mxu0 %v1285_v50 }
 0x1a7   : > { %v866_v57 = vmul.f32 0.001953125, %v825_v39  ;;  %v981_v12 = vmul.f32 %v6200_v27, %v5545_v54  ;;  %v980_v6 = vmul.f32 %v6200_v27, %v5541_v35  ;;  %v1213_v20 = vadd.f32 %v5922_v31, %v1091_v3  ;;  %2510 = vmatprep.mubr.bf16.mxu1 %v1285_v50  ;;  %2283 = vmatprep.subr.bf16.mxu0 %v4182_v60 }
 0x1a8   : > { %4266 = vrsqrt.f32 %v888_v51  ;;  %v820_v11 = vpop.xlane.xlu1 %819  ;;  %v1212_v55 = vadd.f32 %v5937_v32, %v1090_v58  ;;  %v1052_v51 = vmul.f32 %v5905_v10, %v930_v46  ;;  %2605 = vmatprep.subr.bf16.mxu1 %v4185_v30  ;;  %2284 = vmatpush1.bf16.msra.mxu0 %v4180_v26  ;;  %v4186_v46 = vld [vmem:[%s4701_s18 + $0x320] ss:$16 sps:$4 sm:$0xff]  }
 0x1a9   : > { %v865_v47 = vmul.f32 0.001953125, %v820_v11  ;;  %v891_v38 = vadd.f32 1e-06, %v866_v57  ;;  %v6219_v54 = vpop.eup %4258  ;;  %v1103_v35 = vmul.f32 %v5902_v43, %v981_v12  ;;  %v1102_v4 = vmul.f32 %v5928_v59, %v980_v6  ;;  %2606 = vmatpush1.bf16.msra.mxu1 %v4183_v25  ;;  %2285 = vmatprep.subr.bf16.mxu0 %v4188_v33  ;;  %v7918_v12 = vld [vmem:[#allocation50_spill] sm:$0xff]  ;;  %v4189_v25 = vld [vmem:[%s4701_s18 + $0x328] ss:$16 sps:$4 sm:$0xff]  }
 0x1aa   : > { %v6225_v39 = vpop.eup %4260  ;;  %v1289_v22 = vpack.c.bf16 %v1217_v44, %v1213_v20  ;;  %v6227_v45 = vpack.c.bf16 %v1216_v2, %v1212_v55  ;;  %v977_v50 = vmul.f32 %v6219_v54, %v5515_v17  ;;  %v976_v3 = vmul.f32 %v6219_v54, %v5511_v53  ;;  %2607 = vmatprep.subr.bf16.mxu1 %v4191_v63  ;;  %v4194_v55 = vld [vmem:[%s4701_s18 + $0x344] ss:$16 sps:$4 sm:$0xff]   ;;  %v4197_v33 = vld [vmem:[%s4701_s18 + $0x34c] ss:$16 sps:$4 sm:$0xff]  }
 0x1ab   : > { %v890_v8 = vadd.f32 1e-06, %v865_v47  ;;  %4268 = vrsqrt.f32 %v891_v38  ;;  %v1225_v57 = vadd.f32 %v5922_v31, %v1103_v35  ;;  %v1224_v58 = vadd.f32 %v5937_v32, %v1102_v4  ;;  %v7919_v35 = vld [vmem:[#allocation46_spill] sm:$0xff] }
 0x1ac   : > { %v989_v44 = vmul.f32 %v6225_v39, %v5584_v24  ;;  %v988_v60 = vmul.f32 %v6225_v39, %v5580_v40  ;;  %v1056_v17 = vmul.f32 %v5905_v10, %v934_v0  ;;  %v1099_v53 = vmul.f32 %v5902_v43, %v977_v50  ;;  %2286 = vmatpush1.bf16.msra.mxu0 %v4186_v46 }
 0x1ad   : > { %4270 = vrsqrt.f32 %v890_v8  ;;  %v1098_v11 = vmul.f32 %v5928_v59, %v976_v3  ;;  %v1174_v2 = vadd.f32 %v5925_v62, %v1052_v51  ;;  %v939_v24 = vmul.f32 %v6051_v37, %v7918_v12  ;;  %2189 = vmatmul.mubr.bf16.gmra.mrb[20].mxu0 %v6190_v21  ;;  %v4192_v8 = vld [vmem:[%s4701_s18 + $0x340] ss:$16 sps:$4 sm:$0xff]   ;;  %2608 = vmatpush1.bf16.msra.mxu1 %v4189_v25  ;;  %v4195_v12 = vld [vmem:[%s4701_s18 + $0x348] ss:$16 sps:$4 sm:$0xff]  }
 0x1ae   : > { %v6241_v30 = vpop.eup %4262  ;;  %v1111_v6 = vmul.f32 %v5902_v43, %v989_v44  ;;  %v1110_v26 = vmul.f32 %v5928_v59, %v988_v60  ;;  %v1221_v38 = vadd.f32 %v5922_v31, %v1099_v53  ;;  %v943_v4 = vmul.f32 %v6041_v42, %v7919_v35  ;;  %2511 = vmatmul.mubr.bf16.gmra.mrb[20].mxu1 %v6190_v21  ;;  %v4200_v60 = vld [vmem:[%s4701_s18 + $0x364] ss:$16 sps:$4 sm:$0xff]  }
 0x1af   : > { %v985_v40 = vmul.f32 %v6241_v30, %v5593_v61  ;;  %v984_v0 = vmul.f32 %v6241_v30, %v5588_v41  ;;  %v1220_v20 = vadd.f32 %v5937_v32, %v1098_v11  ;;  %v1178_v61 = vadd.f32 %v5925_v62, %v1056_v17  ;;  %2198 = vmatprep.mubr.bf16.mxu0 %v1289_v22 }
 0x1b0   : > { %v6255_v47 = vpop.eup %4264  ;;  %v1233_v63 = vadd.f32 %v5922_v31, %v1111_v6  ;;  %2520 = vmatprep.mubr.bf16.mxu1 %v1289_v22  ;;  %v1293_v3 = vpack.c.bf16 %v1225_v57, %v1221_v38  ;;  %v1232_v44 = vadd.f32 %v5937_v32, %v1110_v26  ;;  %2287 = vmatprep.subr.bf16.mxu0 %v4194_v55 }
 0x1b1   : > { %v1107_v41 = vmul.f32 %v5902_v43, %v985_v40  ;;  %v1106_v51 = vmul.f32 %v5928_v59, %v984_v0  ;;  %v6272_v46 = vpack.c.bf16 %v1224_v58, %v1220_v20  ;;  %v997_v11 = vmul.f32 %v6255_v47, %v5643_v13  ;;  %2609 = vmatprep.subr.bf16.mxu1 %v4197_v33  ;;  %v4203_v58 = vld [vmem:[%s4701_s18 + $0x36c] ss:$16 sps:$4 sm:$0xff]   ;;  %v4198_v33 = vld [vmem:[%s4701_s18 + $0x360] ss:$16 sps:$4 sm:$0xff]  }
 0x1b2   : > { %v6270_v50 = vpop.eup %4266  ;;  %v996_v57 = vmul.f32 %v6255_v47, %v5639_v36  ;;  %v6288_v40 = vpack.c.bf16 %v1178_v61, %v1174_v2  ;;  %2288 = vmatpush1.bf16.msra.mxu0 %v4192_v8  ;;  %2610 = vmatpush1.bf16.msra.mxu1 %v4195_v12  ;;  %v4201_v61 = vld [vmem:[%s4701_s18 + $0x368] ss:$16 sps:$4 sm:$0xff]   ;;  %v1061_v35 = vmul.f32 %v5940_v56, %v939_v24 }
 0x1b3   : > { %v1229_v21 = vadd.f32 %v5922_v31, %v1107_v41  ;;  %v1228_v17 = vadd.f32 %v5937_v32, %v1106_v51  ;;  %v993_v53 = vmul.f32 %v6270_v50, %v5651_v16  ;;  %v992_v22 = vmul.f32 %v6270_v50, %v5647_v18  ;;  %2289 = vmatprep.subr.bf16.mxu0 %v4200_v60  ;;  %v4209_v60 = vld [vmem:[%s4701_s18 + $0x38c] ss:$16 sps:$4 sm:$0xff]  }
 0x1b4   : > { %v1119_v18 = vmul.f32 %v5902_v43, %v997_v11  ;;  %v1118_v26 = vmul.f32 %v5928_v59, %v996_v57  ;;  %v1065_v41 = vmul.f32 %v5940_v56, %v943_v4  ;;  %2611 = vmatprep.subr.bf16.mxu1 %v4203_v58  ;;  %v7921_v4 = vld [vmem:[#allocation24_spill] sm:$0xff]  ;;  %v4207_v58 = vld [vmem:[%s4701_s18 + $0x388] ss:$16 sps:$4 sm:$0xff]  }
 0x1b5   : > { %v6290_v6 = vpop.eup %4268  ;;  %v6292_v16 = vpack.c.bf16 %v1233_v63, %v1229_v21  ;;  %v6294_v13 = vpack.c.bf16 %v1232_v44, %v1228_v17  ;;  %v1115_v0 = vmul.f32 %v5902_v43, %v993_v53  ;;  %v1114_v36 = vmul.f32 %v5928_v59, %v992_v22  ;;  %v4206_v44 = vld [vmem:[%s4701_s18 + $0x384] ss:$16 sps:$4 sm:$0xff]   ;;  %2199 = vmatmul.mubr.bf16.gmra.mrb[24].mxu0 %v6227_v45  ;;  %v4204_v57 = vld [vmem:[%s4701_s18 + $0x380] ss:$16 sps:$4 sm:$0xff]  }
 0x1b6   : > { %v1005_v2 = vmul.f32 %v6290_v6, %v5716_v28  ;;  %v1004_v25 = vmul.f32 %v6290_v6, %v5712_v48  ;;  %v1241_v55 = vadd.f32 %v5922_v31, %v1119_v18  ;;  %v1240_v63 = vadd.f32 %v5937_v32, %v1118_v26  ;;  %v7920_v48 = vld [vmem:[#allocation25_spill] sm:$0xff]  ;;  %2521 = vmatmul.mubr.bf16.gmra.mrb[24].mxu1 %v6227_v45 }
 0x1b7   : > { %v6304_v38 = vpop.eup %4270  ;;  %v1237_v20 = vadd.f32 %v5922_v31, %v1115_v0  ;;  %v1236_v28 = vadd.f32 %v5937_v32, %v1114_v36  ;;  %2208 = vmatprep.mubr.bf16.mxu0 %v1293_v3  ;;  %2530 = vmatprep.mubr.bf16.mxu1 %v1293_v3  ;;  %v1183_v0 = vadd.f32 %v5957_v52, %v1061_v35  ;;  %v4212_v3 = vld [vmem:[%s4701_s18 + $0x3a4] ss:$16 sps:$4 sm:$0xff]   ;;  %v4215_v36 = vld [vmem:[%s4701_s18 + $0x3ac] ss:$16 sps:$4 sm:$0xff]  }
 0x1b8   : > { %v1001_v51 = vmul.f32 %v6304_v38, %v7920_v48  ;;  %v1127_v8 = vmul.f32 %v5902_v43, %v1005_v2  ;;  %v1000_v21 = vmul.f32 %v6304_v38, %v7921_v4  ;;  %v1126_v17 = vmul.f32 %v5928_v59, %v1004_v25  ;;  %2290 = vmatpush1.bf16.msra.mxu0 %v4198_v33  ;;  %v7922_v2 = vld [vmem:[#allocation49_spill] sm:$0xff] }
 0x1b9   : > { %v6321_v24 = vpack.c.bf16 %v1241_v55, %v1237_v20  ;;  %v6326_v53 = vpack.c.bf16 %v1240_v63, %v1236_v28  ;;  %2612 = vmatpush1.bf16.msra.mxu1 %v4201_v61  ;;  %2291 = vmatprep.subr.bf16.mxu0 %v4206_v44  ;;  %v1187_v26 = vadd.f32 %v5957_v52, %v1065_v41  ;;  %v7923_v55 = vld [vmem:[#allocation45_spill] sm:$0xff]  ;;  %v7924_v61 = vld [vmem:[#allocation12_spill] sm:$0xff]  ;;  %v7925_v28 = vld [vmem:[#allocation54_spill] sm:$0xff] }
 0x1ba   : > { %v1123_v11 = vmul.f32 %v5902_v43, %v1001_v51  ;;  %v1249_v12 = vadd.f32 %v5922_v31, %v1127_v8  ;;  %v1122_v22 = vmul.f32 %v5928_v59, %v1000_v21  ;;  %v1248_v45 = vadd.f32 %v5937_v32, %v1126_v17  ;;  %2613 = vmatprep.subr.bf16.mxu1 %v4209_v60  ;;  %v4213_v60 = vld [vmem:[%s4701_s18 + $0x3a8] ss:$16 sps:$4 sm:$0xff]   ;;  %v4218_v17 = vld [vmem:[%s4701_s18 + $0x3c4] ss:$16 sps:$4 sm:$0xff]  }
 0x1bb   : > { %v938_v25 = vmul.f32 %v6051_v37, %v7922_v2  ;;  %v942_v33 = vmul.f32 %v6041_v42, %v7923_v55  ;;  %v947_v35 = vmul.f32 %v6086_v7, %v7924_v61  ;;  %v951_v63 = vmul.f32 %v6071_v5, %v7925_v28  ;;  %v7926_v37 = vld [vmem:[#allocation11_spill] sm:$0xff]  ;;  %v4210_v42 = vld [vmem:[%s4701_s18 + $0x3a0] ss:$16 sps:$4 sm:$0xff]  }
 0x1bc   : > { %v1245_v18 = vadd.f32 %v5922_v31, %v1123_v11  ;;  %v1244_v20 = vadd.f32 %v5937_v32, %v1122_v22  ;;  %v6350_v51 = vpack.c.bf16 %v1187_v26, %v1183_v0  ;;  %v946_v8 = vmul.f32 %v6086_v7, %v7926_v37  ;;  %2292 = vmatpush1.bf16.msra.mxu0 %v4204_v57  ;;  %v4221_v11 = vld [vmem:[%s4701_s18 + $0x3cc] ss:$16 sps:$4 sm:$0xff]   ;;  %v4219_v26 = vld [vmem:[%s4701_s18 + $0x3c8] ss:$16 sps:$4 sm:$0xff]  }
 0x1bd   : > { %v1060_v41 = vmul.f32 %v5905_v10, %v938_v25  ;;  %2614 = vmatpush1.bf16.msra.mxu1 %v4207_v58  ;;  %v1064_v4 = vmul.f32 %v5905_v10, %v942_v33  ;;  %v1069_v21 = vmul.f32 %v5940_v56, %v947_v35  ;;  %2293 = vmatprep.subr.bf16.mxu0 %v4212_v3  ;;  %v7927_v22 = vld [vmem:[#allocation53_spill] sm:$0xff]  ;;  %v7928_v3 = vld [vmem:[#allocation18_spill] sm:$0xff] }
 0x1be   : > { %v6348_v48 = vpack.c.bf16 %v1249_v12, %v1245_v18  ;;  %v6355_v44 = vpack.c.bf16 %v1248_v45, %v1244_v20  ;;  %2615 = vmatprep.subr.bf16.mxu1 %v4215_v36  ;;  %v1073_v7 = vmul.f32 %v5940_v56, %v951_v63  ;;  %v950_v45 = vmul.f32 %v6071_v5, %v7927_v22  ;;  %v7929_v20 = vld [vmem:[#allocation16_spill] sm:$0xff]  ;;  %v4227_v33 = vld [vmem:[%s4701_s18 + $0x3ec] ss:$16 sps:$4 sm:$0xff]  }
 0x1bf   : > { %v1182_v12 = vadd.f32 %v5925_v62, %v1060_v41  ;;  %2209 = vmatmul.mubr.bf16.gmra.mrb[28].mxu0 %v6272_v46  ;;  %2531 = vmatmul.mubr.bf16.gmra.mrb[28].mxu1 %v6272_v46  ;;  %v1186_v57 = vadd.f32 %v5925_v62, %v1064_v4  ;;  %v1191_v58 = vadd.f32 %v5957_v52, %v1069_v21  ;;  %v4216_v46 = vld [vmem:[%s4701_s18 + $0x3c0] ss:$16 sps:$4 sm:$0xff]   ;;  %v7930_v41 = vld [vmem:[#allocation17_spill] sm:$0xff] }
 0x1c0   : > { %v1068_v0 = vmul.f32 %v5905_v10, %v946_v8  ;;  %2218 = vmatprep.mubr.bf16.mxu0 %v6292_v16  ;;  %2540 = vmatprep.mubr.bf16.mxu1 %v6292_v16  ;;  %v1195_v18 = vadd.f32 %v5957_v52, %v1073_v7  ;;  %v1072_v5 = vmul.f32 %v5905_v10, %v950_v45  ;;  %v4224_v16 = vld [vmem:[%s4701_s18 + $0x3e4] ss:$16 sps:$4 sm:$0xff]   ;;  %v7931_v8 = vld [vmem:[#allocation15_spill] sm:$0xff]  ;;  %v4222_v45 = vld [vmem:[%s4701_s18 + $0x3e0] ss:$16 sps:$4 sm:$0xff]  }
 0x1c1   : > { %v955_v36 = vmul.f32 %v6122_v19, %v7928_v3  ;;  %2294 = vmatpush1.bf16.msra.mxu0 %v4210_v42  ;;  %2616 = vmatpush1.bf16.msra.mxu1 %v4213_v60  ;;  %v6380_v2 = vpack.c.bf16 %v1186_v57, %v1182_v12  ;;  %v959_v55 = vmul.f32 %v6104_v34, %v7929_v20  ;;  %v7932_v60 = vld [vmem:[#allocation20_spill] sm:$0xff] }
 0x1c2   : > { %v1190_v25 = vadd.f32 %v5925_v62, %v1068_v0  ;;  %2295 = vmatprep.subr.bf16.mxu0 %v4218_v17  ;;  %2617 = vmatprep.subr.bf16.mxu1 %v4221_v11  ;;  %v6387_v61 = vpack.c.bf16 %v1195_v18, %v1191_v58  ;;  %v1194_v35 = vadd.f32 %v5925_v62, %v1072_v5  ;;  %v7933_v11 = vld [vmem:[#allocation13_spill] sm:$0xff]  ;;  %v7934_v7 = vld [vmem:[#allocation8_spill] sm:$0xff] }
 0x1c3   : > { %v1077_v28 = vmul.f32 %v5940_v56, %v955_v36  ;;  %v1081_v63 = vmul.f32 %v5940_v56, %v959_v55  ;;  %v954_v37 = vmul.f32 %v6122_v19, %v7930_v41  ;;  %v958_v42 = vmul.f32 %v6104_v34, %v7931_v8  ;;  %v4225_v19 = vld [vmem:[%s4701_s18 + $0x3e8] ss:$16 sps:$4 sm:$0xff]   ;;  %s3654_s18 = sshll.u32 %s4621_s22, 2 }
 0x1c4   : > { %v963_v4 = vmul.f32 %v6150_v14, %v7932_v60  ;;  %v6398_v21 = vpack.c.bf16 %v1194_v35, %v1190_v25  ;;  %v967_v12 = vmul.f32 %v6138_v1, %v7933_v11  ;;  %v962_v22 = vmul.f32 %v6150_v14, %v7934_v7  ;;  %v7935_v5 = vld [vmem:[#allocation9_spill] sm:$0xff]  ;;  %v7936_v55 = vld [vmem:[#allocation19_spill] sm:$0xff]  ;;  %p255_p7 = scmp.lt.s32.totalorder %s3654_s18, 15 }
 0x1c5   : > { %v1199_v17 = vadd.f32 %v5957_v52, %v1077_v28  ;;  %2296 = vmatpush1.bf16.msra.mxu0 %v4216_v46  ;;  %2618 = vmatpush1.bf16.msra.mxu1 %v4219_v26  ;;  %v1203_v57 = vadd.f32 %v5957_v52, %v1081_v63  ;;  %v1076_v34 = vmul.f32 %v5905_v10, %v954_v37  ;;  %v7938_v63 = vld [vmem:[#allocation14_spill] sm:$0xff]  ;;  %v7941_v7 = vld [vmem:[#allocation23_spill] sm:$0xff] }
 0x1c6   : > { %v1080_v58 = vmul.f32 %v5905_v10, %v958_v42  ;;  %2297 = vmatprep.subr.bf16.mxu0 %v4224_v16  ;;  %2619 = vmatprep.subr.bf16.mxu1 %v4227_v33  ;;  %v1085_v0 = vmul.f32 %v5940_v56, %v963_v4  ;;  %v1089_v18 = vmul.f32 %v5940_v56, %v967_v12  ;;  %v7939_v42 = vld [vmem:[#allocation21_spill] sm:$0xff]  ;;  %v7940_v4 = vld [vmem:[#allocation58_spill] sm:$0xff]  ;;  %s7978_s18 = smov (!%p255_p7, %s3654_s18), 15 }
 0x1c7   : > { %v966_v3 = vmul.f32 %v6138_v1, %v7935_v5  ;;  %2219 = vmatmul.mubr.bf16.gmra.mrb[32].mxu0 %v6294_v13  ;;  %2541 = vmatmul.mubr.bf16.gmra.mrb[32].mxu1 %v6294_v13  ;;  %v6416_v14 = vpack.c.bf16 %v1203_v57, %v1199_v17  ;;  %v1198_v36 = vadd.f32 %v5925_v62, %v1076_v34  ;;  %v7943_v5 = vld [vmem:[#allocation22_spill] sm:$0xff]  ;;  %s257_s17 = scalar_lea.vmem %s7663_s4, %s7978_s18 }
 0x1c8   : > { %v1202_v46 = vadd.f32 %v5925_v62, %v1080_v58  ;;  %2228 = vmatprep.mubr.bf16.mxu0 %v6321_v24  ;;  %2550 = vmatprep.mubr.bf16.mxu1 %v6321_v24  ;;  %v1207_v26 = vadd.f32 %v5957_v52, %v1085_v0  ;;  %v1211_v25 = vadd.f32 %v5957_v52, %v1089_v18  ;;  %v7937_v24 = vld [vmem:[#allocation10_spill] sm:$0xff] }
 0x1c9   : > { %v1084_v1 = vmul.f32 %v5905_v10, %v962_v22  ;;  %2298 = vmatpush1.bf16.msra.mxu0 %v4222_v45  ;;  %2620 = vmatpush1.bf16.msra.mxu1 %v4225_v19  ;;  %v1088_v13 = vmul.f32 %v5905_v10, %v966_v3  ;;  %v971_v16 = vmul.f32 %v6181_v15, %v7936_v55  ;;  %v7942_v45 = vld [vmem:[#allocation57_spill] sm:$0xff] }
 0x1ca   : > { %v6425_v20 = vpack.c.bf16 %v1202_v46, %v1198_v36  ;;  %v6430_v33 = vpack.c.bf16 %v1211_v25, %v1207_v26  ;;  %v975_v28 = vmul.f32 %v6175_v49, %v7937_v24  ;;  %v970_v41 = vmul.f32 %v6181_v15, %v7938_v63 }
 0x1cb   : > { %v1206_v35 = vadd.f32 %v5925_v62, %v1084_v1  ;;  %v1210_v37 = vadd.f32 %v5925_v62, %v1088_v13  ;;  %v1093_v8 = vmul.f32 %v5940_v56, %v971_v16  ;;  %v974_v60 = vmul.f32 %v6175_v49, %v7939_v42  ;;  %v7944_v13 = vld [vmem:[#allocation62_spill] sm:$0xff]  ;;  %v7945_v16 = vld [vmem:[#allocation60_spill] sm:$0xff] }
 0x1cc   : > { %v979_v17 = vmul.f32 %v6219_v54, %v7940_v4  ;;  %v1097_v11 = vmul.f32 %v5940_v56, %v975_v28  ;;  %v1092_v12 = vmul.f32 %v5905_v10, %v970_v41  ;;  %v983_v22 = vmul.f32 %v6200_v27, %v7941_v7  ;;  %v7946_v28 = vld [vmem:[#allocation61_spill] sm:$0xff]  ;;  %v7947_v41 = vld [vmem:[#allocation59_spill] sm:$0xff] }
 0x1cd   : > { %v978_v15 = vmul.f32 %v6219_v54, %v7942_v45  ;;  %v6449_v19 = vpack.c.bf16 %v1210_v37, %v1206_v35  ;;  %v1215_v57 = vadd.f32 %v5957_v52, %v1093_v8  ;;  %v1096_v34 = vmul.f32 %v5905_v10, %v974_v60  ;;  %v7948_v60 = vld [vmem:[#allocation66_spill] sm:$0xff] }
 0x1ce   : > { %v1101_v49 = vmul.f32 %v5940_v56, %v979_v17  ;;  %v1219_v58 = vadd.f32 %v5957_v52, %v1097_v11  ;;  %v1214_v0 = vadd.f32 %v5925_v62, %v1092_v12  ;;  %v1105_v18 = vmul.f32 %v5940_v56, %v983_v22  ;;  %v7949_v17 = vld [vmem:[#allocation64_spill] sm:$0xff] }
 0x1cf   : > { %v982_v3 = vmul.f32 %v6200_v27, %v7943_v5  ;;  %2229 = vmatmul.mubr.bf16.gmra.mrb[36].mxu0 %v6326_v53  ;;  %2551 = vmatmul.mubr.bf16.gmra.mrb[36].mxu1 %v6326_v53  ;;  %v1218_v54 = vadd.f32 %v5925_v62, %v1096_v34  ;;  %v1100_v46 = vmul.f32 %v5905_v10, %v978_v15 }
 0x1d0   : > { %v1223_v36 = vadd.f32 %v5957_v52, %v1101_v49  ;;  %2238 = vmatprep.mubr.bf16.mxu0 %v6348_v48  ;;  %2560 = vmatprep.mubr.bf16.mxu1 %v6348_v48  ;;  %v6466_v26 = vpack.c.bf16 %v1219_v58, %v1215_v57  ;;  %v1227_v25 = vadd.f32 %v5957_v52, %v1105_v18 }
 0x1d1   : > { %v1104_v27 = vmul.f32 %v5905_v10, %v982_v3  ;;  %v6470_v1 = vpack.c.bf16 %v1218_v54, %v1214_v0  ;;  %v1222_v53 = vadd.f32 %v5925_v62, %v1100_v46  ;;  %v987_v55 = vmul.f32 %v6241_v30, %v7944_v13  ;;  %v7951_v0 = vld [vmem:[#allocation63_spill] sm:$0xff]  ;;  %v7953_v13 = vld [vmem:[#allocation68_spill] sm:$0xff] }
 0x1d2   : > { %v991_v35 = vmul.f32 %v6225_v39, %v7945_v16  ;;  %v6477_v24 = vpack.c.bf16 %v1227_v25, %v1223_v36  ;;  %v986_v63 = vmul.f32 %v6241_v30, %v7946_v28  ;;  %v990_v37 = vmul.f32 %v6225_v39, %v7947_v41  ;;  %v7950_v30 = vld [vmem:[#allocation65_spill] sm:$0xff] }
 0x1d3   : > { %v1226_v48 = vadd.f32 %v5925_v62, %v1104_v27  ;;  %v1109_v8 = vmul.f32 %v5940_v56, %v987_v55  ;;  %v995_v4 = vmul.f32 %v6270_v50, %v7948_v60  ;;  %v999_v11 = vmul.f32 %v6255_v47, %v7949_v17  ;;  %v7952_v27 = vld [vmem:[#allocation70_spill] sm:$0xff]  ;;  %v7954_v55 = vld [vmem:[#allocation69_spill] sm:$0xff] }
 0x1d4   : > { %v1113_v42 = vmul.f32 %v5940_v56, %v991_v35  ;;  %v1108_v7 = vmul.f32 %v5905_v10, %v986_v63  ;;  %v1112_v22 = vmul.f32 %v5905_v10, %v990_v37  ;;  %v994_v45 = vmul.f32 %v6270_v50, %v7950_v30  ;;  %v7955_v35 = vld [vmem:[#allocation67_spill] sm:$0xff] }
 0x1d5   : > { %v6490_v12 = vpack.c.bf16 %v1226_v48, %v1222_v53  ;;  %v1231_v39 = vadd.f32 %v5957_v52, %v1109_v8  ;;  %v1117_v57 = vmul.f32 %v5940_v56, %v995_v4  ;;  %v1121_v34 = vmul.f32 %v5940_v56, %v999_v11 }
 0x1d6   : > { %v1235_v15 = vadd.f32 %v5957_v52, %v1113_v42  ;;  %v1230_v49 = vadd.f32 %v5925_v62, %v1108_v7  ;;  %v1234_v58 = vadd.f32 %v5925_v62, %v1112_v22  ;;  %v998_v18 = vmul.f32 %v6255_v47, %v7951_v0  ;;  %v7956_v0 = vld [vmem:[#allocation76_spill] sm:$0xff] }
 0x1d7   : > { %v1116_v5 = vmul.f32 %v5905_v10, %v994_v45  ;;  %2239 = vmatmul.mubr.bf16.gmra.mrb[40].mxu0 %v6355_v44  ;;  %2561 = vmatmul.mubr.bf16.gmra.mrb[40].mxu1 %v6355_v44  ;;  %v1239_v3 = vadd.f32 %v5957_v52, %v1117_v57  ;;  %v1243_v54 = vadd.f32 %v5957_v52, %v1121_v34 }
 0x1d8   : > { %v6507_v50 = vpack.c.bf16 %v1235_v15, %v1231_v39  ;;  %v6511_v36 = vpack.c.bf16 %v1234_v58, %v1230_v49  ;;  %v1120_v46 = vmul.f32 %v5905_v10, %v998_v18  ;;  %v1003_v47 = vmul.f32 %v6304_v38, %v7952_v27 }
 0x1d9   : > { %v1238_v25 = vadd.f32 %v5925_v62, %v1116_v5  ;;  %v6517_v53 = vpack.c.bf16 %v1243_v54, %v1239_v3  ;;  %v1007_v44 = vmul.f32 %v6290_v6, %v7953_v13  ;;  %v1002_v16 = vmul.f32 %v6304_v38, %v7954_v55  ;;  %v7957_v5 = vld [vmem:[#allocation75_spill] sm:$0xff]  ;;  %v7958_v54 = vld [vmem:[#allocation78_spill] sm:$0xff]  ;;  %v7960_v55 = vld [vmem:[#allocation29_spill] sm:$0xff] }
 0x1da   : > { %v1006_v48 = vmul.f32 %v6290_v6, %v7955_v35  ;;  %v1242_v28 = vadd.f32 %v5925_v62, %v1120_v46  ;;  %v1125_v63 = vmul.f32 %v5940_v56, %v1003_v47  ;;  %v7961_v35 = vld [vmem:[#allocation28_spill] sm:$0xff] }
 0x1db   : > { %v1129_v41 = vmul.f32 %v5940_v56, %v1007_v44  ;;  %v1124_v37 = vmul.f32 %v5905_v10, %v1002_v16 }
 0x1dc   : > { %v1128_v8 = vmul.f32 %v5905_v10, %v1006_v48  ;;  %v6530_v42 = vpack.c.bf16 %v1242_v28, %v1238_v25  ;;  %v1247_v60 = vadd.f32 %v5957_v52, %v1125_v63  ;;  %v7959_v25 = vld [vmem:[#allocation77_spill] sm:$0xff] }
 0x1dd   : > { %v1251_v4 = vadd.f32 %v5957_v52, %v1129_v41  ;;  %v1246_v38 = vadd.f32 %v5925_v62, %v1124_v37  ;;  %v7962_v28 = vld [vmem:[#allocation33_spill] sm:$0xff]  ;;  %v7963_v37 = vld [vmem:[#allocation31_spill] sm:$0xff] }
 0x1de   : > { %v1250_v6 = vadd.f32 %v5925_v62, %v1128_v8 }
 0x1df   : > { %v6536_v17 = vpack.c.bf16 %v1251_v4, %v1247_v60 }
 0x1e0   : > { %v6538_v11 = vpack.c.bf16 %v1250_v6, %v1246_v38 }
 0x203   : > { %v830_v7 = vpop.xlane.xlu1 %829 }
 0x204   : > { %v867_v22 = vmul.f32 0.001953125, %v830_v7 }
 0x206   : > { %v892_v30 = vadd.f32 1e-06, %v867_v22 }
 0x208   : > { %4272 = vrsqrt.f32 %v892_v30 }
 0x209   : > { %v835_v45 = vpop.xlane.xlu0 %834 }
 0x20a   : > { %v868_v39 = vmul.f32 0.001953125, %v835_v45 }
 0x20c   : > { %v893_v15 = vadd.f32 1e-06, %v868_v39 }
 0x20d   : > { %v844_v57 = vpop.xlane.xlu1 %843 }
 0x20e   : > { %4274 = vrsqrt.f32 %v893_v15  ;;  %v869_v34 = vmul.f32 0.001953125, %v844_v57 }
 0x210   : > { %v894_v49 = vadd.f32 1e-06, %v869_v34 }
 0x212   : > { %4276 = vrsqrt.f32 %v894_v49  ;;  %v4273_v58 = vpop.eup %4272 }
 0x213   : > { %v1009_v18 = vmul.f32 %v4273_v58, %v7956_v0  ;;  %v1008_v3 = vmul.f32 %v4273_v58, %v7957_v5  ;;  %v1011_v46 = vmul.f32 %v4273_v58, %v7958_v54  ;;  %v1010_v27 = vmul.f32 %v4273_v58, %v7959_v25 }
 0x215   : > { %v1131_v13 = vmul.f32 %v5902_v43, %v1009_v18  ;;  %v1130_v44 = vmul.f32 %v5928_v59, %v1008_v3  ;;  %v1133_v41 = vmul.f32 %v5940_v56, %v1011_v46  ;;  %v1132_v60 = vmul.f32 %v5905_v10, %v1010_v27 }
 0x217   : > { %v1253_v7 = vadd.f32 %v5922_v31, %v1131_v13  ;;  %v1252_v22 = vadd.f32 %v5937_v32, %v1130_v44  ;;  %v1255_v49 = vadd.f32 %v5957_v52, %v1133_v41  ;;  %v1254_v0 = vadd.f32 %v5925_v62, %v1132_v60 }
 0x218   : > { %v4275_v47 = vpop.eup %4274 }
 0x219   : > { %v1013_v16 = vmul.f32 %v4275_v47, %v7960_v55  ;;  %v1012_v48 = vmul.f32 %v4275_v47, %v7961_v35  ;;  %v1015_v63 = vmul.f32 %v4275_v47, %v7962_v28  ;;  %v1014_v8 = vmul.f32 %v4275_v47, %v7963_v37 }
 0x21b   : > { %v1135_v4 = vmul.f32 %v5902_v43, %v1013_v16  ;;  %v1134_v38 = vmul.f32 %v5928_v59, %v1012_v48  ;;  %v1137_v30 = vmul.f32 %v5940_v56, %v1015_v63  ;;  %v1136_v45 = vmul.f32 %v5905_v10, %v1014_v8 }
 0x21c   : > { %v6554_v6 = vpop.eup %4276 }
 0x21d   : > { %v1257_v39 = vadd.f32 %v5922_v31, %v1135_v4  ;;  %v1256_v15 = vadd.f32 %v5937_v32, %v1134_v38  ;;  %v1017_v57 = vmul.f32 %v6554_v6, %v5973_v9  ;;  %v1016_v34 = vmul.f32 %v6554_v6, %v5970_v29 }
 0x21e   : > { %v1259_v58 = vadd.f32 %v5957_v52, %v1137_v30  ;;  %v1258_v18 = vadd.f32 %v5925_v62, %v1136_v45 }
 0x21f   : > { %v1309_v5 = vpack.c.bf16 %v1257_v39, %v1253_v7  ;;  %v1308_v3 = vpack.c.bf16 %v1256_v15, %v1252_v22  ;;  %v1139_v54 = vmul.f32 %v5902_v43, %v1017_v57  ;;  %v1138_v46 = vmul.f32 %v5928_v59, %v1016_v34  ;;  %v7964_v43 = vld [vmem:[#allocation30_spill] sm:$0xff]  ;;  %v7965_v59 = vld [vmem:[#allocation32_spill] sm:$0xff] }
 0x220   : > { %v1311_v25 = vpack.c.bf16 %v1259_v58, %v1255_v49  ;;  %v6572_v27 = vpack.c.bf16 %v1258_v18, %v1254_v0 }
 0x221   : > { %2248 = vmatprep.mubr.bf16.mxu0 %v1309_v5  ;;  %2570 = vmatprep.mubr.bf16.mxu1 %v1309_v5  ;;  %v1261_v29 = vadd.f32 %v5922_v31, %v1139_v54  ;;  %v1260_v47 = vadd.f32 %v5937_v32, %v1138_v46  ;;  %v7966_v31 = vld [vmem:[#allocation27_spill] sm:$0xff] }
 0x222   : > { %2249 = vmatmul.mubr.bf16.gmra.mrb[44].mxu0 %v1308_v3  ;;  %2571 = vmatmul.mubr.bf16.gmra.mrb[44].mxu1 %v1308_v3  ;;  %v1019_v32 = vmul.f32 %v6554_v6, %v7966_v31 }
 0x223   : > { %v1313_v9 = vpack.c.bf16 %v1261_v29, %v1261_v29  ;;  %v1312_v13 = vpack.c.bf16 %v1260_v47, %v1260_v47 }
 0x225   : > { %2258 = vmatprep.mubr.bf16.mxu0 %v1313_v9  ;;  %2580 = vmatprep.mubr.bf16.mxu1 %v1313_v9 }
 0x22a   : > { %2259 = vmatmul.mubr.bf16.gmra.mrb[48].mxu0 %v1312_v13  ;;  %2581 = vmatmul.mubr.bf16.gmra.mrb[48].mxu1 %v1312_v13 }
 0x22b   : > { %2299 = vmatprep.mubr.bf16.mxu0 %v7964_v43  ;;  %2621 = vmatprep.mubr.bf16.mxu1 %v7964_v43 }
 0x232   : > { %2300 = vmatmul.mubr.bf16.vlgmr.msra.gmra.mrb[0].mxu0 %v7965_v59  ;;  %2622 = vmatmul.mubr.bf16.vlgmr.msra.gmra.mrb[0].mxu1 %v7965_v59 }
 0x233   : > { %2309 = vmatprep.mubr.bf16.mxu0 %v6173_v23  ;;  %2631 = vmatprep.mubr.bf16.mxu1 %v6173_v23  ;;  %v1141_v23 = vmul.f32 %v5940_v56, %v1019_v32 }
 0x23a   : > { %2310 = vmatmul.mubr.bf16.gmra.mrb[4].mxu0 %v6288_v40  ;;  %2632 = vmatmul.mubr.bf16.gmra.mrb[4].mxu1 %v6288_v40  ;;  %v7967_v40 = vld [vmem:[#allocation26_spill] sm:$0xff] }
 0x23b   : > { %2319 = vmatprep.mubr.bf16.mxu0 %v6350_v51  ;;  %2641 = vmatprep.mubr.bf16.mxu1 %v6350_v51  ;;  %v1018_v51 = vmul.f32 %v6554_v6, %v7967_v40 }
 0x242   : > { %2320 = vmatmul.mubr.bf16.gmra.mrb[8].mxu0 %v6380_v2  ;;  %2642 = vmatmul.mubr.bf16.gmra.mrb[8].mxu1 %v6380_v2  ;;  %v1263_v2 = vadd.f32 %v5957_v52, %v1141_v23  ;;  %v7968_v52 = vld [vmem:[#allocation73_spill] sm:$0xff] }
 0x243   : > { %2329 = vmatprep.mubr.bf16.mxu0 %v6387_v61  ;;  %2651 = vmatprep.mubr.bf16.mxu1 %v6387_v61  ;;  %v1140_v61 = vmul.f32 %v5905_v10, %v1018_v51  ;;  %v1444_v10 = vld [vmem:[%s257_s17] sm:$0xf] }
 0x245   : > { %v1262_v56 = vadd.f32 %v5925_v62, %v1140_v61  ;;  %v7971_v62 = vld [vmem:[#allocation74_spill] sm:$0xff] }
 0x24a   : > { %2330 = vmatmul.mubr.bf16.gmra.mrb[12].mxu0 %v6398_v21  ;;  %2652 = vmatmul.mubr.bf16.gmra.mrb[12].mxu1 %v6398_v21  ;;  %v1315_v21 = vpack.c.bf16 %v1263_v2, %v1263_v2 }
 0x24b   : > { %2339 = vmatprep.mubr.bf16.mxu0 %v6416_v14  ;;  %2661 = vmatprep.mubr.bf16.mxu1 %v6416_v14  ;;  %v1314_v14 = vpack.c.bf16 %v1262_v56, %v1262_v56 }
 0x252   : > { %2340 = vmatmul.mubr.bf16.gmra.mrb[16].mxu0 %v6425_v20  ;;  %2662 = vmatmul.mubr.bf16.gmra.mrb[16].mxu1 %v6425_v20  ;;  %v6635_v20 = vrot.slane %v1444_v10, %v7968_v52 }
 0x253   : > { %2349 = vmatprep.mubr.bf16.mxu0 %v6430_v33  ;;  %2671 = vmatprep.mubr.bf16.mxu1 %v6430_v33  ;;  %v7969_v33 = vld [vmem:[#allocation72_spill] sm:$0xff] }
 0x25a   : > { %2350 = vmatmul.mubr.bf16.gmra.mrb[20].mxu0 %v6449_v19  ;;  %2672 = vmatmul.mubr.bf16.gmra.mrb[20].mxu1 %v6449_v19  ;;  %v6638_v19 = vrot.slane %v1444_v10, %v7969_v33 }
 0x25b   : > { %2359 = vmatprep.mubr.bf16.mxu0 %v6466_v26  ;;  %2681 = vmatprep.mubr.bf16.mxu1 %v6466_v26  ;;  %v7970_v26 = vld [vmem:[#allocation71_spill] sm:$0xff] }
 0x262   : > { %2360 = vmatmul.mubr.bf16.gmra.mrb[24].mxu0 %v6470_v1  ;;  %2682 = vmatmul.mubr.bf16.gmra.mrb[24].mxu1 %v6470_v1  ;;  %v6641_v1 = vrot.slane %v1444_v10, %v7970_v26 }
 0x263   : > { %2369 = vmatprep.mubr.bf16.mxu0 %v6477_v24  ;;  %2691 = vmatprep.mubr.bf16.mxu1 %v6477_v24  ;;  %v6644_v24 = vrot.slane %v1444_v10, %v7971_v62 }
 0x26a   : > { %2370 = vmatmul.mubr.bf16.gmra.mrb[28].mxu0 %v6490_v12  ;;  %2692 = vmatmul.mubr.bf16.gmra.mrb[28].mxu1 %v6490_v12 }
 0x26b   : > { %2379 = vmatprep.mubr.bf16.mxu0 %v6507_v50  ;;  %2701 = vmatprep.mubr.bf16.mxu1 %v6507_v50 }
 0x272   : > { %2380 = vmatmul.mubr.bf16.gmra.mrb[32].mxu0 %v6511_v36  ;;  %2702 = vmatmul.mubr.bf16.gmra.mrb[32].mxu1 %v6511_v36 }
 0x273   : > { %2389 = vmatprep.mubr.bf16.mxu0 %v6517_v53  ;;  %2711 = vmatprep.mubr.bf16.mxu1 %v6517_v53 }
 0x27a   : > { %2390 = vmatmul.mubr.bf16.gmra.mrb[36].mxu0 %v6530_v42  ;;  %2712 = vmatmul.mubr.bf16.gmra.mrb[36].mxu1 %v6530_v42 }
 0x27b   : > { %2399 = vmatprep.mubr.bf16.mxu0 %v6536_v17  ;;  %2721 = vmatprep.mubr.bf16.mxu1 %v6536_v17 }
 0x282   : > { %2400 = vmatmul.mubr.bf16.gmra.mrb[40].mxu0 %v6538_v11  ;;  %2722 = vmatmul.mubr.bf16.gmra.mrb[40].mxu1 %v6538_v11 }
 0x283   : > { %2409 = vmatprep.mubr.bf16.mxu0 %v1311_v25  ;;  %2731 = vmatprep.mubr.bf16.mxu1 %v1311_v25 }
 0x28a   : > { %2410 = vmatmul.mubr.bf16.gmra.mrb[44].mxu0 %v6572_v27  ;;  %2732 = vmatmul.mubr.bf16.gmra.mrb[44].mxu1 %v6572_v27 }
 0x28b   : > { %2419 = vmatprep.mubr.bf16.mxu0 %v1315_v21  ;;  %2741 = vmatprep.mubr.bf16.mxu1 %v1315_v21 }
 0x292   : > { %2420 = vmatmul.mubr.bf16.gmra.mrb[48].mxu0 %v1314_v14  ;;  %2742 = vmatmul.mubr.bf16.gmra.mrb[48].mxu1 %v1314_v14 }
 0x305   : > { %v2301_v12 = vpop.f32.mrb[0].mxu0  ;;  %v2623_v50 = vpop.f32.mrb[0].mxu1 }
 0x306   : > { %v3789_v36 = vadd.f32 %v2301_v12, %v6635_v20  ;;  %v3839_v53 = vadd.f32 %v2623_v50, %v6638_v19  ;;  %v2303_v42 = vpop.f32.mrb[1].mxu0  ;;  %v2625_v17 = vpop.f32.mrb[1].mxu1 }
 0x307   : > { %v3790_v11 = vadd.f32 %v2303_v42, %v6641_v1  ;;  %v3840_v44 = vadd.f32 %v2625_v17, %v6644_v24  ;;  %v2305_v55 = vpop.f32.mrb[2].mxu0  ;;  %v2627_v16 = vpop.f32.mrb[2].mxu1 }
 0x308   : > { %v2850_v35 = vmul.f32 0.70710677, %v3789_v36  ;;  %v2852_v48 = vmul.f32 0.70710677, %v3839_v53  ;;  %v3791_v41 = vadd.f32 %v2305_v55, %v6635_v20  ;;  %v3841_v37 = vadd.f32 %v2627_v16, %v6638_v19  ;;  %v2307_v8 = vpop.f32.mrb[3].mxu0  ;;  %v2629_v60 = vpop.f32.mrb[3].mxu1 }
 0x309   : > { %v2851_v28 = vmul.f32 0.70710677, %v3790_v11  ;;  %v2853_v63 = vmul.f32 0.70710677, %v3840_v44  ;;  %v3792_v4 = vadd.f32 %v2307_v8, %v6641_v1  ;;  %v3842_v38 = vadd.f32 %v2629_v60, %v6644_v24 }
 0x30a   : > { %4278 = verf.f32 %v2850_v35  ;;  %v2854_v6 = vmul.f32 0.70710677, %v3791_v41  ;;  %v2856_v7 = vmul.f32 0.70710677, %v3841_v37  ;;  %v2750_v46 = vmul.f32 0.5, %v3789_v36 }
 0x30b   : > { %4280 = verf.f32 %v2852_v48  ;;  %v2855_v22 = vmul.f32 0.70710677, %v3792_v4  ;;  %v2857_v45 = vmul.f32 0.70710677, %v3842_v38  ;;  %v2752_v25 = vmul.f32 0.5, %v3839_v53 }
 0x30c   : > { %4282 = verf.f32 %v2851_v28  ;;  %v2751_v9 = vmul.f32 0.5, %v3790_v11  ;;  %v2753_v23 = vmul.f32 0.5, %v3840_v44  ;;  %v2754_v40 = vmul.f32 0.5, %v3791_v41 }
 0x30d   : > { %4284 = verf.f32 %v2853_v63  ;;  %v2311_v30 = vpop.f32.mrb[4].mxu0  ;;  %v2633_v15 = vpop.f32.mrb[4].mxu1  ;;  %v2756_v51 = vmul.f32 0.5, %v3841_v37  ;;  %v2755_v26 = vmul.f32 0.5, %v3792_v4  ;;  %v2757_v62 = vmul.f32 0.5, %v3842_v38 }
 0x30e   : > { %4286 = verf.f32 %v2854_v6  ;;  %v3793_v39 = vadd.f32 %v2311_v30, %v6635_v20  ;;  %v2313_v57 = vpop.f32.mrb[5].mxu0  ;;  %v6656_v34 = vadd.f32 %v2633_v15, %v6638_v19  ;;  %v2635_v58 = vpop.f32.mrb[5].mxu1 }
 0x30f   : > { %4288 = verf.f32 %v2856_v7  ;;  %v6659_v49 = vadd.f32 %v2313_v57, %v6641_v1  ;;  %v2315_v0 = vpop.f32.mrb[6].mxu0  ;;  %v6662_v5 = vadd.f32 %v2635_v58, %v6644_v24  ;;  %v2637_v3 = vpop.f32.mrb[6].mxu1 }
 0x310   : > { %4290 = verf.f32 %v2855_v22  ;;  %v2858_v18 = vmul.f32 0.70710677, %v3793_v39  ;;  %v2317_v54 = vpop.f32.mrb[7].mxu0  ;;  %v2860_v27 = vmul.f32 0.70710677, %v6656_v34  ;;  %v2639_v29 = vpop.f32.mrb[7].mxu1  ;;  %v6669_v43 = vadd.f32 %v2315_v0, %v6635_v20 }
 0x311   : > { %4292 = verf.f32 %v2857_v45  ;;  %v2859_v47 = vmul.f32 0.70710677, %v6659_v49  ;;  %v2861_v13 = vmul.f32 0.70710677, %v6662_v5  ;;  %v6672_v59 = vadd.f32 %v2637_v3, %v6638_v19 }
 0x312   : > { %4294 = verf.f32 %v2858_v18  ;;  %v6675_v31 = vadd.f32 %v2317_v54, %v6641_v1  ;;  %v2862_v21 = vmul.f32 0.70710677, %v6669_v43  ;;  %v6679_v56 = vadd.f32 %v2639_v29, %v6644_v24 }
 0x313   : > { %4296 = verf.f32 %v2860_v27  ;;  %v2864_v12 = vmul.f32 0.70710677, %v6672_v59  ;;  %v2758_v48 = vmul.f32 0.5, %v3793_v39  ;;  %v2760_v3 = vmul.f32 0.5, %v6656_v34 }
 0x314   : > { %v4279_v32 = vpop.eup %4278  ;;  %4298 = verf.f32 %v2859_v47  ;;  %v2863_v17 = vmul.f32 0.70710677, %v6675_v31  ;;  %v2865_v60 = vmul.f32 0.70710677, %v6679_v56  ;;  %v2759_v29 = vmul.f32 0.5, %v6659_v49 }
 0x315   : > { %v4281_v2 = vpop.eup %4280  ;;  %v3050_v61 = vadd.f32 1.0, %v4279_v32  ;;  %4300 = verf.f32 %v2861_v13  ;;  %v2321_v14 = vpop.f32.mrb[8].mxu0 }
 0x316   : > { %v2643_v10 = vpop.f32.mrb[8].mxu1  ;;  %v4283_v52 = vpop.eup %4282  ;;  %v3052_v33 = vadd.f32 1.0, %v4281_v2  ;;  %4302 = verf.f32 %v2862_v21  ;;  %v6697_v22 = vadd.f32 %v2321_v14, %v6635_v20 }
 0x317   : > { %v2323_v50 = vpop.f32.mrb[9].mxu0  ;;  %v4285_v36 = vpop.eup %4284  ;;  %v3150_v53 = vmul.f32 %v3050_v61, %v2750_v46  ;;  %v3051_v42 = vadd.f32 1.0, %v4283_v52  ;;  %4304 = verf.f32 %v2864_v12  ;;  %v6700_v30 = vadd.f32 %v2643_v10, %v6638_v19 }
 0x318   : > { %v2645_v11 = vpop.f32.mrb[9].mxu1  ;;  %v2325_v44 = vpop.f32.mrb[10].mxu0  ;;  %v3152_v16 = vmul.f32 %v3052_v33, %v2752_v25  ;;  %v3053_v35 = vadd.f32 1.0, %v4285_v36  ;;  %4306 = verf.f32 %v2863_v17  ;;  %v6704_v57 = vadd.f32 %v2323_v50, %v6641_v1 }
 0x319   : > { %v4287_v55 = vpop.eup %4286  ;;  %v6683_v28 = vpop.f32.mrb[10].mxu1  ;;  %3250 = vst [vmem:[%s6689_s12] sm:$0xff] %v3150_v53  ;;  %v3151_v37 = vmul.f32 %v3051_v42, %v2751_v9  ;;  %4308 = verf.f32 %v2865_v60  ;;  %v2866_v54 = vmul.f32 0.70710677, %v6697_v22  ;;  %v2868_v9 = vmul.f32 0.70710677, %v6700_v30 }
 0x31a   : > { %v6685_v63 = vpop.f32.mrb[11].mxu0  ;;  %v4289_v41 = vpop.eup %4288  ;;  %v3054_v8 = vadd.f32 1.0, %v4287_v55  ;;  %3252 = vst [vmem:[%s6689_s12 + $0x10] sm:$0xff] %v3152_v16  ;;  %v3153_v6 = vmul.f32 %v3053_v35, %v2753_v23  ;;  %v2867_v14 = vmul.f32 0.70710677, %v6704_v57  ;;  %v6740_v42 = vadd.f32 %v6683_v28, %v6638_v19 }
 0x31b   : > { %v6693_v4 = vpop.f32.mrb[11].mxu1  ;;  %v4291_v38 = vpop.eup %4290  ;;  %v3056_v7 = vadd.f32 1.0, %v4289_v41  ;;  %3251 = vst [vmem:[%s6689_s12 + $0x8] sm:$0xff] %v3151_v37  ;;  %4310 = verf.f32 %v2866_v54  ;;  %v6744_v17 = vadd.f32 %v6685_v63, %v6641_v1  ;;  %v2762_v55 = vmul.f32 0.5, %v6669_v43 }
 0x31c   : > { %v4293_v45 = vpop.eup %4292  ;;  %v3154_v39 = vmul.f32 %v3054_v8, %v2754_v40  ;;  %v3055_v15 = vadd.f32 1.0, %v4291_v38  ;;  %3253 = vst [vmem:[%s6689_s12 + $0x18] sm:$0xff] %v3153_v6  ;;  %v2761_v40 = vmul.f32 0.5, %v6662_v5  ;;  %4312 = verf.f32 %v2868_v9 }
 0x31d   : > { %v4295_v58 = vpop.eup %4294  ;;  %v3156_v0 = vmul.f32 %v3056_v7, %v2756_v51  ;;  %v3057_v18 = vadd.f32 1.0, %v4293_v45  ;;  %v6712_v47 = vpop.f32.mrb[12].mxu0  ;;  %4314 = verf.f32 %v2867_v14  ;;  %v2764_v41 = vmul.f32 0.5, %v6672_v59 }
 0x31e   : > { %v4297_v46 = vpop.eup %4296  ;;  %3254 = vst [vmem:[%s6689_s12 + $0x20] sm:$0xff] %v3154_v39  ;;  %v3155_v25 = vmul.f32 %v3055_v15, %v2755_v26  ;;  %v3058_v27 = vadd.f32 1.0, %v4295_v58  ;;  %v6714_v13 = vpop.f32.mrb[12].mxu1  ;;  %v6728_v26 = vadd.f32 %v2645_v11, %v6644_v24  ;;  %v2763_v28 = vmul.f32 0.5, %v6675_v31 }
 0x31f   : > { %v4299_v32 = vpop.eup %4298  ;;  %3256 = vst [vmem:[%s6689_s12 + $0x30] sm:$0xff] %v3156_v0  ;;  %v3157_v23 = vmul.f32 %v3057_v18, %v2757_v62  ;;  %v3060_v34 = vadd.f32 1.0, %v4297_v46  ;;  %v2333_v51 = vpop.f32.mrb[13].mxu0  ;;  %v6731_v62 = vadd.f32 %v2325_v44, %v6635_v20  ;;  %v2872_v43 = vmul.f32 0.70710677, %v6740_v42 }
 0x320   : > { %v6718_v2 = vpop.f32.mrb[13].mxu1  ;;  %v4301_v61 = vpop.eup %4300  ;;  %3255 = vst [vmem:[%s6689_s12 + $0x28] sm:$0xff] %v3155_v25  ;;  %v3158_v49 = vmul.f32 %v3058_v27, %v2758_v48  ;;  %v3059_v21 = vadd.f32 1.0, %v4299_v32  ;;  %v2869_v35 = vmul.f32 0.70710677, %v6728_v26  ;;  %v2765_v7 = vmul.f32 0.5, %v6679_v56 }
 0x321   : > { %v6722_v10 = vpop.f32.mrb[14].mxu0  ;;  %v6724_v52 = vpop.f32.mrb[14].mxu1  ;;  %3257 = vst [vmem:[%s6689_s12 + $0x38] sm:$0xff] %v3157_v23  ;;  %v3160_v33 = vmul.f32 %v3060_v34, %v2760_v3  ;;  %v3061_v5 = vadd.f32 1.0, %v4301_v61  ;;  %v2870_v8 = vmul.f32 0.70710677, %v6731_v62  ;;  %v6762_v58 = vadd.f32 %v6693_v4, %v6644_v24 }
 0x322   : > { %v6733_v12 = vpop.f32.mrb[15].mxu0  ;;  %v6735_v50 = vpop.f32.mrb[15].mxu1  ;;  %3258 = vst [vmem:[%s6689_s12 + $0x40] sm:$0xff] %v3158_v49  ;;  %v3159_v53 = vmul.f32 %v3059_v21, %v2759_v29  ;;  %4316 = verf.f32 %v2869_v35  ;;  %v2871_v59 = vmul.f32 0.70710677, %v6744_v17  ;;  %v6771_v56 = vadd.f32 %v6712_v47, %v6635_v20 }
 0x323   : > { %v4303_v36 = vpop.eup %4302  ;;  %3260 = vst [vmem:[%s6689_s12 + $0x50] sm:$0xff] %v3160_v33  ;;  %v3161_v44 = vmul.f32 %v3061_v5, %v2761_v40  ;;  %4318 = verf.f32 %v2870_v8  ;;  %v6775_v3 = vadd.f32 %v6714_v13, %v6638_v19  ;;  %v6778_v54 = vadd.f32 %v2333_v51, %v6641_v1 }
 0x324   : > { %v4305_v11 = vpop.eup %4304  ;;  %v3062_v16 = vadd.f32 1.0, %v4303_v36  ;;  %3259 = vst [vmem:[%s6689_s12 + $0x48] sm:$0xff] %v3159_v53  ;;  %4320 = verf.f32 %v2872_v43  ;;  %v2873_v29 = vmul.f32 0.70710677, %v6762_v58  ;;  %v6788_v9 = vadd.f32 %v6718_v2, %v6644_v24 }
 0x325   : > { %v4307_v48 = vpop.eup %4306  ;;  %v3064_v37 = vadd.f32 1.0, %v4305_v11  ;;  %3261 = vst [vmem:[%s6689_s12 + $0x58] sm:$0xff] %v3161_v44  ;;  %v2341_v45 = vpop.f32.mrb[16].mxu0  ;;  %4322 = verf.f32 %v2871_v59  ;;  %v2766_v23 = vmul.f32 0.5, %v6697_v22  ;;  %v2768_v40 = vmul.f32 0.5, %v6700_v30 }
 0x326   : > { %v3162_v63 = vmul.f32 %v3062_v16, %v2762_v55  ;;  %v3063_v60 = vadd.f32 1.0, %v4307_v48  ;;  %v4309_v38 = vpop.eup %4308  ;;  %v6757_v39 = vpop.f32.mrb[16].mxu1  ;;  %v2874_v51 = vmul.f32 0.70710677, %v6771_v56  ;;  %v2767_v49 = vmul.f32 0.5, %v6704_v57 }
 0x327   : > { %v3164_v6 = vmul.f32 %v3064_v37, %v2764_v41  ;;  %v3065_v15 = vadd.f32 1.0, %v4309_v38  ;;  %v6764_v0 = vpop.f32.mrb[17].mxu0  ;;  %v6766_v18 = vpop.f32.mrb[17].mxu1  ;;  %4324 = verf.f32 %v2873_v29  ;;  %v2876_v2 = vmul.f32 0.70710677, %v6775_v3 }
 0x328   : > { %3262 = vst [vmem:[%s6689_s12 + $0x60] sm:$0xff] %v3162_v63  ;;  %v3163_v31 = vmul.f32 %v3063_v60, %v2763_v28  ;;  %v6780_v4 = vpop.f32.mrb[18].mxu0  ;;  %v6782_v46 = vpop.f32.mrb[18].mxu1  ;;  %v2769_v33 = vmul.f32 0.5, %v6728_v26  ;;  %4326 = verf.f32 %v2874_v51  ;;  %v2875_v22 = vmul.f32 0.70710677, %v6778_v54 }
 0x329   : > { %3264 = vst [vmem:[%s6689_s12 + $0x70] sm:$0xff] %v3164_v6  ;;  %v4311_v25 = vpop.eup %4310  ;;  %v3165_v27 = vmul.f32 %v3065_v15, %v2765_v7  ;;  %v6790_v47 = vpop.f32.mrb[19].mxu0  ;;  %4328 = verf.f32 %v2876_v2  ;;  %v2877_v36 = vmul.f32 0.70710677, %v6788_v9  ;;  %v6806_v57 = vadd.f32 %v6722_v10, %v6635_v20 }
 0x32a   : > { %3263 = vst [vmem:[%s6689_s12 + $0x68] sm:$0xff] %v3163_v31  ;;  %v6792_v13 = vpop.f32.mrb[19].mxu1  ;;  %v4313_v32 = vpop.eup %4312  ;;  %v3066_v34 = vadd.f32 1.0, %v4311_v25  ;;  %4330 = verf.f32 %v2875_v22  ;;  %v6810_v53 = vadd.f32 %v6724_v52, %v6638_v19  ;;  %v6814_v26 = vadd.f32 %v6733_v12, %v6641_v1 }
 0x32b   : > { %3265 = vst [vmem:[%s6689_s12 + $0x78] sm:$0xff] %v3165_v27  ;;  %v3068_v61 = vadd.f32 1.0, %v4313_v32  ;;  %v4315_v21 = vpop.eup %4314  ;;  %v2770_v35 = vmul.f32 0.5, %v6731_v62  ;;  %4332 = verf.f32 %v2877_v36  ;;  %v6824_v10 = vadd.f32 %v6735_v50, %v6644_v24 }
 0x32c   : > { %v3166_v14 = vmul.f32 %v3066_v34, %v2766_v23  ;;  %v3067_v30 = vadd.f32 1.0, %v4315_v21  ;;  %v4317_v55 = vpop.eup %4316  ;;  %v2772_v37 = vmul.f32 0.5, %v6740_v42  ;;  %v2878_v28 = vmul.f32 0.70710677, %v6806_v57 }
 0x32d   : > { %v3168_v5 = vmul.f32 %v3068_v61, %v2768_v40  ;;  %v6816_v11 = vpop.f32.mrb[20].mxu0  ;;  %v6818_v44 = vpop.f32.mrb[20].mxu1  ;;  %v3069_v41 = vadd.f32 1.0, %v4317_v55  ;;  %v6833_v8 = vadd.f32 %v2341_v45, %v6635_v20  ;;  %v2771_v50 = vmul.f32 0.5, %v6744_v17 }
 0x32e   : > { %3266 = vst [vmem:[%s6689_s12 + $0x80] sm:$0xff] %v3166_v14  ;;  %v3167_v16 = vmul.f32 %v3067_v30, %v2767_v49  ;;  %v6826_v52 = vpop.f32.mrb[21].mxu0  ;;  %v6828_v48 = vpop.f32.mrb[21].mxu1  ;;  %v2880_v43 = vmul.f32 0.70710677, %v6810_v53  ;;  %v2773_v59 = vmul.f32 0.5, %v6762_v58  ;;  %4334 = verf.f32 %v2878_v28 }
 0x32f   : > { %3268 = vst [vmem:[%s6689_s12 + $0x90] sm:$0xff] %v3168_v5  ;;  %v4319_v12 = vpop.eup %4318  ;;  %v6835_v63 = vpop.f32.mrb[22].mxu0  ;;  %v2879_v38 = vmul.f32 0.70710677, %v6814_v26  ;;  %v3169_v7 = vmul.f32 %v3069_v41, %v2769_v33  ;;  %v2881_v17 = vmul.f32 0.70710677, %v6824_v10  ;;  %v6855_v40 = vadd.f32 %v6757_v39, %v6638_v19 }
 0x330   : > { %v4321_v62 = vpop.eup %4320  ;;  %3267 = vst [vmem:[%s6689_s12 + $0x88] sm:$0xff] %v3167_v16  ;;  %v3070_v60 = vadd.f32 1.0, %v4319_v12  ;;  %v6842_v45 = vpop.f32.mrb[22].mxu1  ;;  %4336 = verf.f32 %v2880_v43  ;;  %v2774_v32 = vmul.f32 0.5, %v6771_v56  ;;  %v2882_v58 = vmul.f32 0.70710677, %v6833_v8 }
 0x331   : > { %v4323_v6 = vpop.eup %4322  ;;  %v3072_v42 = vadd.f32 1.0, %v4321_v62  ;;  %v6844_v31 = vpop.f32.mrb[23].mxu0  ;;  %3269 = vst [vmem:[%s6689_s12 + $0x98] sm:$0xff] %v3169_v7  ;;  %4338 = verf.f32 %v2879_v38  ;;  %v6859_v51 = vadd.f32 %v6764_v0, %v6641_v1  ;;  %v2776_v56 = vmul.f32 0.5, %v6775_v3 }
 0x332   : > { %v3170_v15 = vmul.f32 %v3070_v60, %v2770_v35  ;;  %v3071_v25 = vadd.f32 1.0, %v4323_v6  ;;  %v6847_v27 = vpop.f32.mrb[23].mxu1  ;;  %v4325_v23 = vpop.eup %4324  ;;  %4340 = verf.f32 %v2881_v17  ;;  %v6865_v2 = vadd.f32 %v6766_v18, %v6644_v24 }
 0x333   : > { %v3172_v29 = vmul.f32 %v3072_v42, %v2772_v37  ;;  %v4327_v61 = vpop.eup %4326  ;;  %v3073_v49 = vadd.f32 1.0, %v4325_v23  ;;  %4342 = verf.f32 %v2882_v58  ;;  %v2775_v0 = vmul.f32 0.5, %v6778_v54 }
 0x334   : > { %3270 = vst [vmem:[%s6689_s12 + $0xa0] sm:$0xff] %v3170_v15  ;;  %v3171_v34 = vmul.f32 %v3071_v25, %v2771_v50  ;;  %v4329_v39 = vpop.eup %4328  ;;  %v3074_v33 = vadd.f32 1.0, %v4327_v61  ;;  %v2884_v22 = vmul.f32 0.70710677, %v6855_v40  ;;  %v6876_v5 = vadd.f32 %v6780_v4, %v6635_v20 }
 0x335   : > { %3272 = vst [vmem:[%s6689_s12 + $0xb0] sm:$0xff] %v3172_v29  ;;  %v6867_v21 = vpop.f32.mrb[24].mxu0  ;;  %v6869_v14 = vpop.f32.mrb[24].mxu1  ;;  %v3173_v30 = vmul.f32 %v3073_v49, %v2773_v59  ;;  %v3076_v36 = vadd.f32 1.0, %v4329_v39  ;;  %v2777_v55 = vmul.f32 0.5, %v6788_v9  ;;  %v2778_v50 = vmul.f32 0.5, %v6806_v57 }
 0x336   : > { %3271 = vst [vmem:[%s6689_s12 + $0xa8] sm:$0xff] %v3171_v34  ;;  %v6878_v3 = vpop.f32.mrb[25].mxu0  ;;  %v4331_v18 = vpop.eup %4330  ;;  %v2883_v16 = vmul.f32 0.70710677, %v6859_v51  ;;  %v3174_v41 = vmul.f32 %v3074_v33, %v2774_v32  ;;  %4344 = verf.f32 %v2884_v22  ;;  %v2885_v4 = vmul.f32 0.70710677, %v6865_v2 }
 0x337   : > { %v6882_v35 = vpop.f32.mrb[25].mxu1  ;;  %v6884_v54 = vpop.f32.mrb[26].mxu0  ;;  %v3075_v37 = vadd.f32 1.0, %v4331_v18  ;;  %3273 = vst [vmem:[%s6689_s12 + $0xb8] sm:$0xff] %v3173_v30  ;;  %v3176_v9 = vmul.f32 %v3076_v36, %v2776_v56  ;;  %v2886_v6 = vmul.f32 0.70710677, %v6876_v5  ;;  %v6899_v7 = vadd.f32 %v6782_v46, %v6638_v19 }
 0x338   : > { %v4333_v12 = vpop.eup %4332  ;;  %v6887_v28 = vpop.f32.mrb[26].mxu1  ;;  %4346 = verf.f32 %v2883_v16  ;;  %3274 = vst [vmem:[%s6689_s12 + $0xc0] sm:$0xff] %v3174_v41  ;;  %v2780_v15 = vmul.f32 0.5, %v6810_v53  ;;  %v6905_v57 = vadd.f32 %v6790_v47, %v6641_v1  ;;  %v6909_v25 = vadd.f32 %v6792_v13, %v6644_v24 }
 0x339   : > { %v6889_v62 = vpop.f32.mrb[27].mxu0  ;;  %v3077_v60 = vadd.f32 1.0, %v4333_v12  ;;  %v6893_v43 = vpop.f32.mrb[27].mxu1  ;;  %v3175_v38 = vmul.f32 %v3075_v37, %v2775_v0  ;;  %4348 = verf.f32 %v2885_v4  ;;  %3276 = vst [vmem:[%s6689_s12 + $0xd0] sm:$0xff] %v3176_v9  ;;  %v2888_v46 = vmul.f32 0.70710677, %v6899_v7 }
 0x33a   : > { %v4335_v42 = vpop.eup %4334  ;;  %4350 = verf.f32 %v2886_v6  ;;  %v6915_v32 = vadd.f32 %v6816_v11, %v6635_v20  ;;  %v2779_v47 = vmul.f32 0.5, %v6814_v26  ;;  %v2781_v23 = vmul.f32 0.5, %v6824_v10 }
 0x33b   : > { %v3177_v59 = vmul.f32 %v3077_v60, %v2777_v55  ;;  %v4337_v17 = vpop.eup %4336  ;;  %3275 = vst [vmem:[%s6689_s12 + $0xc8] sm:$0xff] %v3175_v38  ;;  %v3078_v29 = vadd.f32 1.0, %v4335_v42  ;;  %v2887_v13 = vmul.f32 0.70710677, %v6905_v57  ;;  %4352 = verf.f32 %v2888_v46 }
 0x33c   : > { %v4339_v58 = vpop.eup %4338  ;;  %v3080_v53 = vadd.f32 1.0, %v4337_v17  ;;  %v2889_v39 = vmul.f32 0.70710677, %v6909_v25  ;;  %v2782_v10 = vmul.f32 0.5, %v6833_v8  ;;  %v2890_v16 = vmul.f32 0.70710677, %v6915_v32 }
 0x33d   : > { %3277 = vst [vmem:[%s6689_s12 + $0xd8] sm:$0xff] %v3177_v59  ;;  %v6921_v34 = vpop.f32.mrb[28].mxu0  ;;  %v4341_v61 = vpop.eup %4340  ;;  %v3178_v49 = vmul.f32 %v3078_v29, %v2778_v50  ;;  %v3079_v56 = vadd.f32 1.0, %v4339_v58  ;;  %4354 = verf.f32 %v2887_v13  ;;  %v6942_v8 = vadd.f32 %v6818_v44, %v6638_v19 }
 0x33e   : > { %v6924_v11 = vpop.f32.mrb[28].mxu1  ;;  %v6926_v33 = vpop.f32.mrb[29].mxu0  ;;  %v3180_v26 = vmul.f32 %v3080_v53, %v2780_v15  ;;  %v3081_v22 = vadd.f32 1.0, %v4341_v61  ;;  %4356 = verf.f32 %v2889_v39  ;;  %v6946_v4 = vadd.f32 %v6826_v52, %v6641_v1 }
 0x33f   : > { %v4343_v0 = vpop.eup %4342  ;;  %v6929_v18 = vpop.f32.mrb[29].mxu1  ;;  %3278 = vst [vmem:[%s6689_s12 + $0xe0] sm:$0xff] %v3178_v49  ;;  %v3179_v36 = vmul.f32 %v3079_v56, %v2779_v47  ;;  %v6950_v9 = vadd.f32 %v6828_v48, %v6644_v24  ;;  %v2784_v6 = vmul.f32 0.5, %v6855_v40  ;;  %4358 = verf.f32 %v2890_v16 }
 0x340   : > { %v6931_v30 = vpop.f32.mrb[30].mxu0  ;;  %v3082_v55 = vadd.f32 1.0, %v4343_v0  ;;  %v6935_v12 = vpop.f32.mrb[30].mxu1  ;;  %3280 = vst [vmem:[%s6689_s12 + $0xf0] sm:$0xff] %v3180_v26  ;;  %v3181_v37 = vmul.f32 %v3081_v22, %v2781_v23  ;;  %v6958_v44 = vadd.f32 %v6835_v63, %v6635_v20  ;;  %v2783_v59 = vmul.f32 0.5, %v6859_v51 }
 0x341   : > { %v6937_v41 = vpop.f32.mrb[31].mxu0  ;;  %v6952_v60 = vpop.f32.mrb[31].mxu1  ;;  %3279 = vst [vmem:[%s6689_s12 + $0xe8] sm:$0xff] %v3179_v36  ;;  %v2892_v48 = vmul.f32 0.70710677, %v6942_v8  ;;  %v6965_v15 = vadd.f32 %v6842_v45, %v6638_v19  ;;  %v2785_v40 = vmul.f32 0.5, %v6865_v2  ;;  %v6995_v36 = vadd.f32 %v6847_v27, %v6644_v24 }
 0x342   : > { %v4345_v50 = vpop.eup %4344  ;;  %v3182_v38 = vmul.f32 %v3082_v55, %v2782_v10  ;;  %3281 = vst [vmem:[%s6689_s12 + $0xf8] sm:$0xff] %v3181_v37  ;;  %v2891_v63 = vmul.f32 0.70710677, %v6946_v4  ;;  %v2893_v46 = vmul.f32 0.70710677, %v6950_v9  ;;  %v2786_v51 = vmul.f32 0.5, %v6876_v5 }
 0x343   : > { %v4347_v42 = vpop.eup %4346  ;;  %v3084_v52 = vadd.f32 1.0, %v4345_v50  ;;  %4360 = verf.f32 %v2892_v48  ;;  %v2788_v61 = vmul.f32 0.5, %v6899_v7  ;;  %v2894_v2 = vmul.f32 0.70710677, %v6958_v44 }
 0x344   : > { %v4349_v17 = vpop.eup %4348  ;;  %3282 = vst [vmem:[%s6689_s12 + $0x100] sm:$0xff] %v3182_v38  ;;  %v3083_v29 = vadd.f32 1.0, %v4347_v42  ;;  %4362 = verf.f32 %v2891_v63  ;;  %v2896_v0 = vmul.f32 0.70710677, %v6965_v15  ;;  %v6991_v7 = vadd.f32 %v6844_v31, %v6641_v1 }
 0x345   : > { %v3184_v58 = vmul.f32 %v3084_v52, %v2784_v6  ;;  %v3085_v53 = vadd.f32 1.0, %v4349_v17  ;;  %v6972_v47 = vpop.f32.mrb[32].mxu0  ;;  %v6974_v23 = vpop.f32.mrb[32].mxu1  ;;  %4364 = verf.f32 %v2893_v46  ;;  %v6999_v55 = vadd.f32 %v6867_v21, %v6635_v20 }
 0x346   : > { %v4351_v45 = vpop.eup %4350  ;;  %v3183_v13 = vmul.f32 %v3083_v29, %v2783_v59  ;;  %v6978_v49 = vpop.f32.mrb[33].mxu0  ;;  %4366 = verf.f32 %v2894_v2  ;;  %v7008_v31 = vadd.f32 %v6869_v14, %v6638_v19  ;;  %v2787_v42 = vmul.f32 0.5, %v6905_v57 }
 0x347   : > { %v6980_v56 = vpop.f32.mrb[33].mxu1  ;;  %3284 = vst [vmem:[%s6689_s12 + $0x110] sm:$0xff] %v3184_v58  ;;  %v3185_v5 = vmul.f32 %v3085_v53, %v2785_v40  ;;  %v3086_v39 = vadd.f32 1.0, %v4351_v45  ;;  %v6984_v26 = vpop.f32.mrb[34].mxu0  ;;  %4368 = verf.f32 %v2896_v0  ;;  %v2789_v21 = vmul.f32 0.5, %v6909_v25 }
 0x348   : > { %v6986_v22 = vpop.f32.mrb[34].mxu1  ;;  %v4353_v10 = vpop.eup %4352  ;;  %3283 = vst [vmem:[%s6689_s12 + $0x108] sm:$0xff] %v3183_v13  ;;  %v2895_v59 = vmul.f32 0.70710677, %v6991_v7  ;;  %v2790_v29 = vmul.f32 0.5, %v6915_v32  ;;  %v2792_v46 = vmul.f32 0.5, %v6942_v8  ;;  %v7027_v32 = vadd.f32 %v6878_v3, %v6641_v1 }
 0x349   : > { %v7001_v16 = vpop.f32.mrb[35].mxu0  ;;  %v7003_v37 = vpop.f32.mrb[35].mxu1  ;;  %3285 = vst [vmem:[%s6689_s12 + $0x118] sm:$0xff] %v3185_v5  ;;  %v3186_v38 = vmul.f32 %v3086_v39, %v2786_v51  ;;  %v3088_v6 = vadd.f32 1.0, %v4353_v10  ;;  %v2897_v40 = vmul.f32 0.70710677, %v6995_v36  ;;  %v7031_v8 = vadd.f32 %v6882_v35, %v6644_v24 }
 0x34a   : > { %v4355_v50 = vpop.eup %4354  ;;  %4370 = verf.f32 %v2895_v59  ;;  %v2898_v57 = vmul.f32 0.70710677, %v6999_v55  ;;  %v2900_v53 = vmul.f32 0.70710677, %v7008_v31  ;;  %v7035_v13 = vadd.f32 %v6884_v54, %v6635_v20 }
 0x34b   : > { %v4357_v27 = vpop.eup %4356  ;;  %v3087_v52 = vadd.f32 1.0, %v4355_v50  ;;  %3286 = vst [vmem:[%s6689_s12 + $0x120] sm:$0xff] %v3186_v38  ;;  %v3188_v48 = vmul.f32 %v3088_v6, %v2788_v61  ;;  %4372 = verf.f32 %v2897_v40  ;;  %v2791_v0 = vmul.f32 0.5, %v6946_v4 }
 0x34c   : > { %v3089_v17 = vadd.f32 1.0, %v4357_v27  ;;  %v4359_v63 = vpop.eup %4358  ;;  %4374 = verf.f32 %v2898_v57  ;;  %v7045_v3 = vadd.f32 %v6887_v28, %v6638_v19  ;;  %v2793_v38 = vmul.f32 0.5, %v6950_v9 }
 0x34d   : > { %v3187_v14 = vmul.f32 %v3087_v52, %v2787_v42  ;;  %3288 = vst [vmem:[%s6689_s12 + $0x130] sm:$0xff] %v3188_v48  ;;  %v3090_v58 = vadd.f32 1.0, %v4359_v63  ;;  %v7020_v51 = vpop.f32.mrb[36].mxu0  ;;  %v7022_v45 = vpop.f32.mrb[36].mxu1  ;;  %4376 = verf.f32 %v2900_v53  ;;  %v2794_v6 = vmul.f32 0.5, %v6958_v44 }
 0x34e   : > { %v3189_v25 = vmul.f32 %v3089_v17, %v2789_v21  ;;  %v7037_v61 = vpop.f32.mrb[37].mxu0  ;;  %v7039_v2 = vpop.f32.mrb[37].mxu1  ;;  %v2899_v27 = vmul.f32 0.70710677, %v7027_v32  ;;  %v2901_v28 = vmul.f32 0.70710677, %v7031_v8  ;;  %v7061_v59 = vadd.f32 %v6889_v62, %v6641_v1 }
 0x34f   : > { %3287 = vst [vmem:[%s6689_s12 + $0x128] sm:$0xff] %v3187_v14  ;;  %v4361_v5 = vpop.eup %4360  ;;  %v3190_v39 = vmul.f32 %v3090_v58, %v2790_v29  ;;  %v7047_v35 = vpop.f32.mrb[38].mxu0  ;;  %v2902_v21 = vmul.f32 0.70710677, %v7035_v13  ;;  %v2796_v17 = vmul.f32 0.5, %v6965_v15  ;;  %v2795_v58 = vmul.f32 0.5, %v6991_v7 }
 0x350   : > { %3289 = vst [vmem:[%s6689_s12 + $0x138] sm:$0xff] %v3189_v25  ;;  %v7049_v10 = vpop.f32.mrb[38].mxu1  ;;  %v4363_v54 = vpop.eup %4362  ;;  %v3092_v50 = vadd.f32 1.0, %v4361_v5  ;;  %4378 = verf.f32 %v2899_v27  ;;  %v2904_v57 = vmul.f32 0.70710677, %v7045_v3  ;;  %v7073_v53 = vadd.f32 %v6893_v43, %v6644_v24 }
 0x351   : > { %v7054_v42 = vpop.f32.mrb[39].mxu0  ;;  %v4365_v4 = vpop.eup %4364  ;;  %3290 = vst [vmem:[%s6689_s12 + $0x140] sm:$0xff] %v3190_v39  ;;  %v3091_v52 = vadd.f32 1.0, %v4363_v54  ;;  %4380 = verf.f32 %v2901_v28  ;;  %v2903_v15 = vmul.f32 0.70710677, %v7061_v59  ;;  %v2797_v7 = vmul.f32 0.5, %v6995_v36 }
 0x352   : > { %v4367_v48 = vpop.eup %4366  ;;  %v3192_v9 = vmul.f32 %v3092_v50, %v2792_v46  ;;  %v3093_v44 = vadd.f32 1.0, %v4365_v4  ;;  %v7064_v29 = vpop.f32.mrb[39].mxu1  ;;  %4382 = verf.f32 %v2902_v21  ;;  %v7083_v50 = vadd.f32 %v6921_v34, %v6635_v20 }
 0x353   : > { %v4369_v40 = vpop.eup %4368  ;;  %v3191_v63 = vmul.f32 %v3091_v52, %v2791_v0  ;;  %v3094_v14 = vadd.f32 1.0, %v4367_v48  ;;  %4384 = verf.f32 %v2904_v57  ;;  %v2905_v52 = vmul.f32 0.70710677, %v7073_v53 }
 0x354   : > { %3292 = vst [vmem:[%s6689_s12 + $0x150] sm:$0xff] %v3192_v9  ;;  %v3193_v25 = vmul.f32 %v3093_v44, %v2793_v38  ;;  %v3096_v62 = vadd.f32 1.0, %v4369_v40  ;;  %v4371_v0 = vpop.eup %4370  ;;  %v7087_v38 = vadd.f32 %v6924_v11, %v6638_v19  ;;  %4386 = verf.f32 %v2903_v15 }
 0x355   : > { %3291 = vst [vmem:[%s6689_s12 + $0x148] sm:$0xff] %v3191_v63  ;;  %v3194_v46 = vmul.f32 %v3094_v14, %v2794_v6  ;;  %v7075_v5 = vpop.f32.mrb[40].mxu0  ;;  %v7077_v39 = vpop.f32.mrb[40].mxu1  ;;  %v3095_v4 = vadd.f32 1.0, %v4371_v0  ;;  %v7097_v36 = vadd.f32 %v6926_v33, %v6641_v1  ;;  %v2798_v48 = vmul.f32 0.5, %v6999_v55 }
 0x356   : > { %3293 = vst [vmem:[%s6689_s12 + $0x158] sm:$0xff] %v3193_v25  ;;  %v3196_v54 = vmul.f32 %v3096_v62, %v2796_v17  ;;  %v7089_v43 = vpop.f32.mrb[41].mxu0  ;;  %v7091_v6 = vpop.f32.mrb[41].mxu1  ;;  %v2800_v9 = vmul.f32 0.5, %v7008_v31  ;;  %v2906_v44 = vmul.f32 0.70710677, %v7083_v50  ;;  %4388 = verf.f32 %v2905_v52 }
 0x357   : > { %v4373_v27 = vpop.eup %4372  ;;  %3294 = vst [vmem:[%s6689_s12 + $0x160] sm:$0xff] %v3194_v46  ;;  %v7099_v34 = vpop.f32.mrb[42].mxu0  ;;  %v3195_v33 = vmul.f32 %v3095_v4, %v2795_v58  ;;  %v2908_v14 = vmul.f32 0.70710677, %v7087_v38  ;;  %v2799_v55 = vmul.f32 0.5, %v7027_v32  ;;  %v7117_v58 = vadd.f32 %v6929_v18, %v6644_v24 }
 0x358   : > { %v7101_v28 = vpop.f32.mrb[42].mxu1  ;;  %v4375_v11 = vpop.eup %4374  ;;  %3296 = vst [vmem:[%s6689_s12 + $0x170] sm:$0xff] %v3196_v54  ;;  %v3097_v21 = vadd.f32 1.0, %v4373_v27  ;;  %4390 = verf.f32 %v2906_v44  ;;  %v2907_v46 = vmul.f32 0.70710677, %v7097_v36  ;;  %v2801_v54 = vmul.f32 0.5, %v7031_v8 }
 0x359   : > { %v7107_v17 = vpop.f32.mrb[43].mxu0  ;;  %v4377_v40 = vpop.eup %4376  ;;  %v3098_v63 = vadd.f32 1.0, %v4375_v11  ;;  %3295 = vst [vmem:[%s6689_s12 + $0x168] sm:$0xff] %v3195_v33  ;;  %4392 = verf.f32 %v2908_v14  ;;  %v7127_v32 = vadd.f32 %v6935_v12, %v6638_v19  ;;  %v2909_v18 = vmul.f32 0.70710677, %v7117_v58 }
 0x35a   : > { %v7110_v57 = vpop.f32.mrb[43].mxu1  ;;  %v3197_v25 = vmul.f32 %v3097_v21, %v2797_v7  ;;  %v3100_v62 = vadd.f32 1.0, %v4377_v40  ;;  %v4379_v15 = vpop.eup %4378  ;;  %v7123_v7 = vadd.f32 %v6931_v30, %v6635_v20  ;;  %4394 = verf.f32 %v2907_v46 }
 0x35b   : > { %v3198_v31 = vmul.f32 %v3098_v63, %v2798_v48  ;;  %v4381_v27 = vpop.eup %4380  ;;  %v3099_v4 = vadd.f32 1.0, %v4379_v15  ;;  %v7133_v52 = vadd.f32 %v6937_v41, %v6641_v1  ;;  %v2802_v12 = vmul.f32 0.5, %v7035_v13 }
 0x35c   : > { %3297 = vst [vmem:[%s6689_s12 + $0x178] sm:$0xff] %v3197_v25  ;;  %v3200_v0 = vmul.f32 %v3100_v62, %v2800_v9  ;;  %v4383_v30 = vpop.eup %4382  ;;  %v3101_v21 = vadd.f32 1.0, %v4381_v27  ;;  %v2804_v48 = vmul.f32 0.5, %v7045_v3  ;;  %v2910_v9 = vmul.f32 0.70710677, %v7123_v7 }
 0x35d   : > { %3298 = vst [vmem:[%s6689_s12 + $0x180] sm:$0xff] %v3198_v31  ;;  %v7135_v11 = vpop.f32.mrb[44].mxu0  ;;  %v7137_v8 = vpop.f32.mrb[44].mxu1  ;;  %v3199_v33 = vmul.f32 %v3099_v4, %v2799_v55  ;;  %v3102_v41 = vadd.f32 1.0, %v4383_v30  ;;  %4396 = verf.f32 %v2909_v18  ;;  %v2912_v63 = vmul.f32 0.70710677, %v7127_v32 }
 0x35e   : > { %3300 = vst [vmem:[%s6689_s12 + $0x190] sm:$0xff] %v3200_v0  ;;  %v7143_v44 = vpop.f32.mrb[45].mxu0  ;;  %v4385_v40 = vpop.eup %4384  ;;  %v3201_v62 = vmul.f32 %v3101_v21, %v2801_v54  ;;  %v2803_v3 = vmul.f32 0.5, %v7061_v59  ;;  %4398 = verf.f32 %v2910_v9  ;;  %v2911_v0 = vmul.f32 0.70710677, %v7133_v52 }
 0x35f   : > { %v7146_v14 = vpop.f32.mrb[45].mxu1  ;;  %v7148_v25 = vpop.f32.mrb[46].mxu0  ;;  %v3104_v13 = vadd.f32 1.0, %v4385_v40  ;;  %3299 = vst [vmem:[%s6689_s12 + $0x188] sm:$0xff] %v3199_v33  ;;  %v3202_v15 = vmul.f32 %v3102_v41, %v2802_v12  ;;  %4400 = verf.f32 %v2912_v63  ;;  %v7159_v27 = vadd.f32 %v6952_v60, %v6644_v24 }
 0x360   : > { %v7151_v31 = vpop.f32.mrb[46].mxu1  ;;  %v7153_v46 = vpop.f32.mrb[47].mxu0  ;;  %3301 = vst [vmem:[%s6689_s12 + $0x198] sm:$0xff] %v3201_v62  ;;  %v7166_v18 = vadd.f32 %v6972_v47, %v6635_v20  ;;  %v7170_v30 = vadd.f32 %v6974_v23, %v6638_v19  ;;  %v2805_v12 = vmul.f32 0.5, %v7073_v53  ;;  %4402 = verf.f32 %v2911_v0 }
 0x361   : > { %v4387_v55 = vpop.eup %4386  ;;  %v7161_v54 = vpop.f32.mrb[47].mxu1  ;;  %v3204_v59 = vmul.f32 %v3104_v13, %v2804_v48  ;;  %3302 = vst [vmem:[%s6689_s12 + $0x1a0] sm:$0xff] %v3202_v15  ;;  %v2913_v60 = vmul.f32 0.70710677, %v7159_v27  ;;  %v7177_v48 = vadd.f32 %v6978_v49, %v6641_v1  ;;  %v2806_v33 = vmul.f32 0.5, %v7083_v50 }
 0x362   : > { %v3103_v4 = vadd.f32 1.0, %v4387_v55  ;;  %v4389_v21 = vpop.eup %4388  ;;  %v2914_v23 = vmul.f32 0.70710677, %v7166_v18  ;;  %v2808_v53 = vmul.f32 0.5, %v7087_v38  ;;  %v2916_v62 = vmul.f32 0.70710677, %v7170_v30 }
 0x363   : > { %v4391_v9 = vpop.eup %4390  ;;  %3304 = vst [vmem:[%s6689_s12 + $0x1b0] sm:$0xff] %v3204_v59  ;;  %v3105_v40 = vadd.f32 1.0, %v4389_v21  ;;  %4404 = verf.f32 %v2913_v60  ;;  %v2807_v15 = vmul.f32 0.5, %v7097_v36  ;;  %v7197_v21 = vadd.f32 %v6980_v56, %v6644_v24 }
 0x364   : > { %v3203_v47 = vmul.f32 %v3103_v4, %v2803_v3  ;;  %v4393_v41 = vpop.eup %4392  ;;  %v3106_v63 = vadd.f32 1.0, %v4391_v9  ;;  %4406 = verf.f32 %v2914_v23  ;;  %v2915_v4 = vmul.f32 0.70710677, %v7177_v48 }
 0x365   : > { %v7184_v13 = vpop.f32.mrb[48].mxu0  ;;  %v7186_v49 = vpop.f32.mrb[48].mxu1  ;;  %v3205_v55 = vmul.f32 %v3105_v40, %v2805_v12  ;;  %v3108_v3 = vadd.f32 1.0, %v4393_v41  ;;  %4408 = verf.f32 %v2916_v62  ;;  %v7206_v40 = vadd.f32 %v6986_v22, %v6638_v19 }
 0x366   : > { %3303 = vst [vmem:[%s6689_s12 + $0x1a8] sm:$0xff] %v3203_v47  ;;  %v7190_v50 = vpop.f32.mrb[49].mxu0  ;;  %v7192_v0 = vpop.f32.mrb[49].mxu1  ;;  %v3206_v59 = vmul.f32 %v3106_v63, %v2806_v33  ;;  %v7202_v47 = vadd.f32 %v6984_v26, %v6635_v20  ;;  %v2809_v56 = vmul.f32 0.5, %v7117_v58  ;;  %4410 = verf.f32 %v2915_v4 }
 0x367   : > { %v4395_v38 = vpop.eup %4394  ;;  %v2425_v60 = vpop.f32.mrb[50].mxu0  ;;  %3305 = vst [vmem:[%s6689_s12 + $0x1b8] sm:$0xff] %v3205_v55  ;;  %v3208_v36 = vmul.f32 %v3108_v3, %v2808_v53  ;;  %v2917_v63 = vmul.f32 0.70710677, %v7197_v21  ;;  %v7213_v53 = vadd.f32 %v7001_v16, %v6641_v1  ;;  %v2810_v22 = vmul.f32 0.5, %v7123_v7 }
 0x368   : > { %v2747_v12 = vpop.f32.mrb[50].mxu1  ;;  %v3107_v9 = vadd.f32 1.0, %v4395_v38  ;;  %v2426_v33 = vpop.f32.mrb[51].mxu0  ;;  %3306 = vst [vmem:[%s6689_s12 + $0x1c0] sm:$0xff] %v3206_v59  ;;  %v2918_v3 = vmul.f32 0.70710677, %v7202_v47 }
 0x369   : > { %v2748_v23 = vpop.f32.mrb[51].mxu1  ;;  %v4397_v41 = vpop.eup %4396  ;;  %3308 = vst [vmem:[%s6689_s12 + $0x1d0] sm:$0xff] %v3208_v36  ;;  %v2812_v58 = vmul.f32 0.5, %v7127_v32  ;;  %4412 = verf.f32 %v2917_v63  ;;  %v2920_v4 = vmul.f32 0.70710677, %v7206_v40  ;;  %v2811_v12 = vmul.f32 0.5, %v7133_v52 }
 0x36a   : > { %v4399_v26 = vpop.eup %4398  ;;  %v3207_v62 = vmul.f32 %v3107_v9, %v2807_v15  ;;  %v3109_v55 = vadd.f32 1.0, %v4397_v41  ;;  %4414 = verf.f32 %v2918_v3  ;;  %v2919_v7 = vmul.f32 0.70710677, %v7213_v53 }
 0x36b   : > { %v4401_v38 = vpop.eup %4400  ;;  %v3110_v59 = vadd.f32 1.0, %v4399_v26  ;;  %4416 = verf.f32 %v2920_v4  ;;  %v7225_v9 = vadd.f32 %v7003_v37, %v6644_v24  ;;  %v7230_v23 = vadd.f32 %v7020_v51, %v6635_v20 }
 0x36c   : > { %3307 = vst [vmem:[%s6689_s12 + $0x1c8] sm:$0xff] %v3207_v62  ;;  %v3209_v16 = vmul.f32 %v3109_v55, %v2809_v56  ;;  %v3112_v60 = vadd.f32 1.0, %v4401_v38  ;;  %v4403_v15 = vpop.eup %4402  ;;  %v7234_v52 = vadd.f32 %v7022_v45, %v6638_v19  ;;  %v2813_v56 = vmul.f32 0.5, %v7159_v27 }
 0x36d   : > { %v3210_v36 = vmul.f32 %v3110_v59, %v2810_v22  ;;  %v3111_v33 = vadd.f32 1.0, %v4403_v15  ;;  %v4405_v41 = vpop.eup %4404  ;;  %4418 = verf.f32 %v2919_v7  ;;  %v2921_v37 = vmul.f32 0.70710677, %v7225_v9 }
 0x36e   : > { %3309 = vst [vmem:[%s6689_s12 + $0x1d8] sm:$0xff] %v3209_v16  ;;  %v3212_v32 = vmul.f32 %v3112_v60, %v2812_v58  ;;  %v7241_v63 = vadd.f32 %v7037_v61, %v6641_v1  ;;  %v4407_v26 = vpop.eup %4406  ;;  %v3113_v62 = vadd.f32 1.0, %v4405_v41  ;;  %v2814_v55 = vmul.f32 0.5, %v7166_v18 }
 0x36f   : > { %3310 = vst [vmem:[%s6689_s12 + $0x1e0] sm:$0xff] %v3210_v36  ;;  %v3211_v51 = vmul.f32 %v3111_v33, %v2811_v12  ;;  %v2922_v45 = vmul.f32 0.70710677, %v7230_v23  ;;  %v4409_v22 = vpop.eup %4408  ;;  %v3114_v3 = vadd.f32 1.0, %v4407_v26  ;;  %v2816_v27 = vmul.f32 0.5, %v7170_v30 }
 0x370   : > { %3312 = vst [vmem:[%s6689_s12 + $0x1f0] sm:$0xff] %v3212_v32  ;;  %4420 = verf.f32 %v2921_v37  ;;  %v2924_v38 = vmul.f32 0.70710677, %v7234_v52  ;;  %v3213_v61 = vmul.f32 %v3113_v62, %v2813_v56  ;;  %v3116_v59 = vadd.f32 1.0, %v4409_v22  ;;  %v4411_v4 = vpop.eup %4410 }
 0x371   : > { %3311 = vst [vmem:[%s6689_s12 + $0x1e8] sm:$0xff] %v3211_v51  ;;  %v2815_v58 = vmul.f32 0.5, %v7177_v48  ;;  %4422 = verf.f32 %v2922_v45  ;;  %v3214_v16 = vmul.f32 %v3114_v3, %v2814_v55  ;;  %v2923_v18 = vmul.f32 0.70710677, %v7241_v63 }
 0x372   : > { %4424 = verf.f32 %v2924_v38  ;;  %v7253_v60 = vadd.f32 %v7039_v2, %v6644_v24  ;;  %3313 = vst [vmem:[%s6689_s12 + $0x1f8] sm:$0xff] %v3213_v61  ;;  %v3216_v30 = vmul.f32 %v3116_v59, %v2816_v27  ;;  %v3115_v12 = vadd.f32 1.0, %v4411_v4 }
 0x373   : > { %v7258_v15 = vadd.f32 %v7047_v35, %v6635_v20  ;;  %v7262_v48 = vadd.f32 %v7049_v10, %v6638_v19  ;;  %v4413_v36 = vpop.eup %4412  ;;  %3314 = vst [vmem:[%s6689_s12 + $0x200] sm:$0xff] %v3214_v16  ;;  %v2817_v7 = vmul.f32 0.5, %v7197_v21  ;;  %4426 = verf.f32 %v2923_v18 }
 0x374   : > { %v2925_v2 = vmul.f32 0.70710677, %v7253_v60  ;;  %v7269_v32 = vadd.f32 %v7054_v42, %v6641_v1  ;;  %v4415_v33 = vpop.eup %4414  ;;  %3316 = vst [vmem:[%s6689_s12 + $0x210] sm:$0xff] %v3216_v30  ;;  %v3215_v35 = vmul.f32 %v3115_v12, %v2815_v58  ;;  %v3117_v41 = vadd.f32 1.0, %v4413_v36 }
 0x375   : > { %v2818_v56 = vmul.f32 0.5, %v7202_v47  ;;  %v2926_v10 = vmul.f32 0.70710677, %v7258_v15  ;;  %v4417_v37 = vpop.eup %4416  ;;  %v3118_v26 = vadd.f32 1.0, %v4415_v33  ;;  %v2820_v21 = vmul.f32 0.5, %v7206_v40 }
 0x376   : > { %4428 = verf.f32 %v2925_v2  ;;  %v2928_v51 = vmul.f32 0.70710677, %v7262_v48  ;;  %3315 = vst [vmem:[%s6689_s12 + $0x208] sm:$0xff] %v3215_v35  ;;  %v3217_v42 = vmul.f32 %v3117_v41, %v2817_v7  ;;  %v3120_v62 = vadd.f32 1.0, %v4417_v37 }
 0x377   : > { %v2819_v55 = vmul.f32 0.5, %v7213_v53  ;;  %4430 = verf.f32 %v2926_v10  ;;  %v4419_v45 = vpop.eup %4418  ;;  %v3218_v22 = vmul.f32 %v3118_v26, %v2818_v56  ;;  %v2927_v47 = vmul.f32 0.70710677, %v7269_v32 }
 0x378   : > { %4432 = verf.f32 %v2928_v51  ;;  %v7281_v3 = vadd.f32 %v7064_v29, %v6644_v24  ;;  %3317 = vst [vmem:[%s6689_s12 + $0x218] sm:$0xff] %v3217_v42  ;;  %v3220_v40 = vmul.f32 %v3120_v62, %v2820_v21  ;;  %v3119_v27 = vadd.f32 1.0, %v4419_v45 }
 0x379   : > { %v7286_v38 = vadd.f32 %v7075_v5, %v6635_v20  ;;  %v7290_v53 = vadd.f32 %v7077_v39, %v6638_v19  ;;  %3318 = vst [vmem:[%s6689_s12 + $0x220] sm:$0xff] %v3218_v22  ;;  %v2821_v59 = vmul.f32 0.5, %v7225_v9  ;;  %4434 = verf.f32 %v2927_v47 }
 0x37a   : > { %v4421_v61 = vpop.eup %4420  ;;  %v2929_v29 = vmul.f32 0.70710677, %v7281_v3  ;;  %v7297_v58 = vadd.f32 %v7089_v43, %v6641_v1  ;;  %3320 = vst [vmem:[%s6689_s12 + $0x230] sm:$0xff] %v3220_v40  ;;  %v3219_v5 = vmul.f32 %v3119_v27, %v2819_v55  ;;  %v2822_v18 = vmul.f32 0.5, %v7230_v23 }
 0x37b   : > { %v4423_v4 = vpop.eup %4422  ;;  %v3121_v16 = vadd.f32 1.0, %v4421_v61  ;;  %v2930_v39 = vmul.f32 0.70710677, %v7286_v38  ;;  %v2824_v9 = vmul.f32 0.5, %v7234_v52  ;;  %v2932_v36 = vmul.f32 0.70710677, %v7290_v53 }
 0x37c   : > { %v4425_v30 = vpop.eup %4424  ;;  %v3122_v12 = vadd.f32 1.0, %v4423_v4  ;;  %4436 = verf.f32 %v2929_v29  ;;  %3319 = vst [vmem:[%s6689_s12 + $0x228] sm:$0xff] %v3219_v5  ;;  %v2823_v2 = vmul.f32 0.5, %v7241_v63  ;;  %v2931_v23 = vmul.f32 0.70710677, %v7297_v58 }
 0x37d   : > { %v3221_v43 = vmul.f32 %v3121_v16, %v2821_v59  ;;  %v3124_v7 = vadd.f32 1.0, %v4425_v30  ;;  %4438 = verf.f32 %v2930_v39  ;;  %v4427_v33 = vpop.eup %4426  ;;  %v7309_v41 = vadd.f32 %v7091_v6, %v6644_v24 }
 0x37e   : > { %v3222_v35 = vmul.f32 %v3122_v12, %v2822_v18  ;;  %4440 = verf.f32 %v2932_v36  ;;  %v3123_v56 = vadd.f32 1.0, %v4427_v33  ;;  %v7314_v10 = vadd.f32 %v7099_v34, %v6635_v20 }
 0x37f   : > { %3321 = vst [vmem:[%s6689_s12 + $0x238] sm:$0xff] %v3221_v43  ;;  %v3224_v52 = vmul.f32 %v3124_v7, %v2824_v9  ;;  %v7318_v63 = vadd.f32 %v7101_v28, %v6638_v19  ;;  %v2825_v26 = vmul.f32 0.5, %v7253_v60  ;;  %4442 = verf.f32 %v2931_v23 }
 0x380   : > { %v4429_v37 = vpop.eup %4428  ;;  %3322 = vst [vmem:[%s6689_s12 + $0x240] sm:$0xff] %v3222_v35  ;;  %v2933_v6 = vmul.f32 0.70710677, %v7309_v41  ;;  %v7325_v21 = vadd.f32 %v7107_v17, %v6641_v1  ;;  %v3223_v34 = vmul.f32 %v3123_v56, %v2823_v2  ;;  %v2826_v62 = vmul.f32 0.5, %v7258_v15 }
 0x381   : > { %v4431_v51 = vpop.eup %4430  ;;  %3324 = vst [vmem:[%s6689_s12 + $0x250] sm:$0xff] %v3224_v52  ;;  %v3125_v42 = vadd.f32 1.0, %v4429_v37  ;;  %v2934_v28 = vmul.f32 0.70710677, %v7314_v10  ;;  %v2828_v60 = vmul.f32 0.5, %v7262_v48  ;;  %v2827_v40 = vmul.f32 0.5, %v7269_v32 }
 0x382   : > { %v4433_v55 = vpop.eup %4432  ;;  %v3126_v45 = vadd.f32 1.0, %v4431_v51  ;;  %4444 = verf.f32 %v2933_v6  ;;  %v2936_v22 = vmul.f32 0.70710677, %v7318_v63  ;;  %3323 = vst [vmem:[%s6689_s12 + $0x248] sm:$0xff] %v3223_v34  ;;  %v2935_v15 = vmul.f32 0.70710677, %v7325_v21 }
 0x383   : > { %v3225_v17 = vmul.f32 %v3125_v42, %v2825_v26  ;;  %v3128_v47 = vadd.f32 1.0, %v4433_v55  ;;  %4446 = verf.f32 %v2934_v28  ;;  %v4435_v27 = vpop.eup %4434  ;;  %v7337_v59 = vadd.f32 %v7110_v57, %v6644_v24 }
 0x384   : > { %v3226_v61 = vmul.f32 %v3126_v45, %v2826_v62  ;;  %4448 = verf.f32 %v2936_v22  ;;  %v3127_v29 = vadd.f32 1.0, %v4435_v27  ;;  %v7342_v4 = vadd.f32 %v7135_v11, %v6635_v20 }
 0x385   : > { %3325 = vst [vmem:[%s6689_s12 + $0x258] sm:$0xff] %v3225_v17  ;;  %v3228_v48 = vmul.f32 %v3128_v47, %v2828_v60  ;;  %v7346_v32 = vadd.f32 %v7137_v8, %v6638_v19  ;;  %v2829_v16 = vmul.f32 0.5, %v7281_v3  ;;  %4450 = verf.f32 %v2935_v15 }
 0x386   : > { %v4437_v5 = vpop.eup %4436  ;;  %3326 = vst [vmem:[%s6689_s12 + $0x260] sm:$0xff] %v3226_v61  ;;  %v2937_v57 = vmul.f32 0.70710677, %v7337_v59  ;;  %v7353_v18 = vadd.f32 %v7143_v44, %v6641_v1  ;;  %v3227_v11 = vmul.f32 %v3127_v29, %v2827_v40  ;;  %v2830_v12 = vmul.f32 0.5, %v7286_v38 }
 0x387   : > { %v4439_v39 = vpop.eup %4438  ;;  %3328 = vst [vmem:[%s6689_s12 + $0x270] sm:$0xff] %v3228_v48  ;;  %v3129_v30 = vadd.f32 1.0, %v4437_v5  ;;  %v2938_v8 = vmul.f32 0.70710677, %v7342_v4  ;;  %v2832_v3 = vmul.f32 0.5, %v7290_v53  ;;  %v2831_v2 = vmul.f32 0.5, %v7297_v58 }
 0x388   : > { %v4441_v9 = vpop.eup %4440  ;;  %v3130_v36 = vadd.f32 1.0, %v4439_v39  ;;  %4452 = verf.f32 %v2937_v57  ;;  %v2940_v43 = vmul.f32 0.70710677, %v7346_v32  ;;  %3327 = vst [vmem:[%s6689_s12 + $0x268] sm:$0xff] %v3227_v11  ;;  %v2939_v38 = vmul.f32 0.70710677, %v7353_v18 }
 0x389   : > { %v3229_v44 = vmul.f32 %v3129_v30, %v2829_v16  ;;  %v3132_v7 = vadd.f32 1.0, %v4441_v9  ;;  %4454 = verf.f32 %v2938_v8  ;;  %v4443_v33 = vpop.eup %4442  ;;  %v7365_v23 = vadd.f32 %v7146_v14, %v6644_v24 }
 0x38a   : > { %v3230_v35 = vmul.f32 %v3130_v36, %v2830_v12  ;;  %4456 = verf.f32 %v2940_v43  ;;  %v3131_v52 = vadd.f32 1.0, %v4443_v33  ;;  %v7370_v56 = vadd.f32 %v7148_v25, %v6635_v20 }
 0x38b   : > { %3329 = vst [vmem:[%s6689_s12 + $0x278] sm:$0xff] %v3229_v44  ;;  %v3232_v53 = vmul.f32 %v3132_v7, %v2832_v3  ;;  %v7374_v58 = vadd.f32 %v7151_v31, %v6638_v19  ;;  %v2833_v26 = vmul.f32 0.5, %v7309_v41  ;;  %4458 = verf.f32 %v2939_v38 }
 0x38c   : > { %v4445_v37 = vpop.eup %4444  ;;  %3330 = vst [vmem:[%s6689_s12 + $0x280] sm:$0xff] %v3230_v35  ;;  %v2941_v14 = vmul.f32 0.70710677, %v7365_v23  ;;  %v7381_v6 = vadd.f32 %v7153_v46, %v6641_v1  ;;  %v3231_v25 = vmul.f32 %v3131_v52, %v2831_v2  ;;  %v2834_v42 = vmul.f32 0.5, %v7314_v10 }
 0x38d   : > { %v4447_v51 = vpop.eup %4446  ;;  %3332 = vst [vmem:[%s6689_s12 + $0x290] sm:$0xff] %v3232_v53  ;;  %v3133_v34 = vadd.f32 1.0, %v4445_v37  ;;  %v2942_v31 = vmul.f32 0.70710677, %v7370_v56  ;;  %v2836_v41 = vmul.f32 0.5, %v7318_v63  ;;  %v2835_v60 = vmul.f32 0.5, %v7325_v21 }
 0x38e   : > { %v4449_v62 = vpop.eup %4448  ;;  %v3134_v28 = vadd.f32 1.0, %v4447_v51  ;;  %4460 = verf.f32 %v2941_v14  ;;  %v2944_v55 = vmul.f32 0.70710677, %v7374_v58  ;;  %3331 = vst [vmem:[%s6689_s12 + $0x288] sm:$0xff] %v3231_v25  ;;  %v2943_v17 = vmul.f32 0.70710677, %v7381_v6 }
 0x38f   : > { %v3233_v46 = vmul.f32 %v3133_v34, %v2833_v26  ;;  %v3136_v45 = vadd.f32 1.0, %v4449_v62  ;;  %4462 = verf.f32 %v2942_v31  ;;  %v4451_v22 = vpop.eup %4450  ;;  %v7393_v47 = vadd.f32 %v7161_v54, %v6644_v24 }
 0x390   : > { %v3234_v10 = vmul.f32 %v3134_v28, %v2834_v42  ;;  %4464 = verf.f32 %v2944_v55  ;;  %v3135_v40 = vadd.f32 1.0, %v4451_v22  ;;  %v3837_v27 = vadd.f32 %v7184_v13, %v6635_v20 }
 0x391   : > { %3333 = vst [vmem:[%s6689_s12 + $0x298] sm:$0xff] %v3233_v46  ;;  %v3236_v63 = vmul.f32 %v3136_v45, %v2836_v41  ;;  %v7400_v21 = vadd.f32 %v7186_v49, %v6638_v19  ;;  %4466 = verf.f32 %v2943_v17  ;;  %v2945_v15 = vmul.f32 0.70710677, %v7393_v47 }
 0x392   : > { %v4453_v61 = vpop.eup %4452  ;;  %3334 = vst [vmem:[%s6689_s12 + $0x2a0] sm:$0xff] %v3234_v10  ;;  %v7406_v54 = vadd.f32 %v7190_v50, %v6641_v1  ;;  %v3235_v29 = vmul.f32 %v3135_v40, %v2835_v60  ;;  %v2837_v5 = vmul.f32 0.5, %v7337_v59  ;;  %v2946_v13 = vmul.f32 0.70710677, %v3837_v27  ;;  %v3374_v40 = vld [vmem:[%s6689_s12 + $0x8] sm:$0xff] (%p7972_p9) }
 0x393   : > { %v4455_v48 = vpop.eup %4454  ;;  %3336 = vst [vmem:[%s6689_s12 + $0x2b0] sm:$0xff] %v3236_v63  ;;  %v3137_v20 = vadd.f32 1.0, %v4453_v61  ;;  %v2838_v49 = vmul.f32 0.5, %v7342_v4  ;;  %4468 = verf.f32 %v2945_v15  ;;  %v2948_v57 = vmul.f32 0.70710677, %v7400_v21  ;;  %v3372_v63 = vld [vmem:[%s6689_s12] sm:$0xff] (%p7972_p9) }
 0x394   : > { %v4457_v19 = vpop.eup %4456  ;;  %v3138_v16 = vadd.f32 1.0, %v4455_v48  ;;  %3335 = vst [vmem:[%s6689_s12 + $0x2a8] sm:$0xff] %v3235_v29  ;;  %v2840_v1 = vmul.f32 0.5, %v7346_v32  ;;  %4470 = verf.f32 %v2946_v13  ;;  %v2947_v30 = vmul.f32 0.70710677, %v7406_v54  ;;  %v3380_v61 = vld [vmem:[%s6689_s12 + $0x20] sm:$0xff] (%p7972_p9)  ;;  %3373 = vst [vmem:[%s7447_s14] sm:$0xff] (%p7972_p9), %v3372_v63 }
 0x395   : > { %v3237_v39 = vmul.f32 %v3137_v20, %v2837_v5  ;;  %v3140_v50 = vadd.f32 1.0, %v4457_v19  ;;  %v4459_v11 = vpop.eup %4458  ;;  %4472 = verf.f32 %v2948_v57  ;;  %v3888_v4 = vadd.f32 %v7192_v0, %v6644_v24  ;;  %v3382_v15 = vld [vmem:[%s6689_s12 + $0x28] sm:$0xff] (%p7972_p9)  ;;  %3375 = vst [vmem:[%s7447_s14 + $0x8] sm:$0xff] (%p7972_p9), %v3374_v40  ;;  %3381 = vst [vmem:[%s7447_s14 + $0x80] sm:$0xff] (%p7972_p9), %v3380_v61  ;;  %v3386_v48 = vld [vmem:[%s6689_s12 + $0x38] sm:$0xff] (%p7972_p9) }
 0x396   : > { %v3238_v59 = vmul.f32 %v3138_v16, %v2838_v49  ;;  %v2839_v8 = vmul.f32 0.5, %v7353_v18  ;;  %v3139_v9 = vadd.f32 1.0, %v4459_v11  ;;  %4474 = verf.f32 %v2947_v30  ;;  %3383 = vst [vmem:[%s7447_s14 + $0x88] sm:$0xff] (%p7972_p9), %v3382_v15  ;;  %v3388_v29 = vld [vmem:[%s6689_s12 + $0x40] sm:$0xff] (%p7972_p9)  ;;  %3387 = vst [vmem:[%s7447_s14 + $0x98] sm:$0xff] (%p7972_p9), %v3386_v48  ;;  %v3390_v5 = vld [vmem:[%s6689_s12 + $0x48] sm:$0xff] (%p7972_p9) }
 0x397   : > { %3337 = vst [vmem:[%s6689_s12 + $0x2b8] sm:$0xff] %v3237_v39  ;;  %v3240_v12 = vmul.f32 %v3140_v50, %v2840_v1  ;;  %v2949_v32 = vmul.f32 0.70710677, %v3888_v4  ;;  %v2841_v44 = vmul.f32 0.5, %v7365_v23  ;;  %v2842_v24 = vmul.f32 0.5, %v7370_v56  ;;  %3389 = vst [vmem:[%s7447_s14 + $0x100] sm:$0xff] (%p7972_p9), %v3388_v29 }
 0x398   : > { %v4461_v36 = vpop.eup %4460  ;;  %3338 = vst [vmem:[%s6689_s12 + $0x2c0] sm:$0xff] %v3238_v59  ;;  %v3239_v43 = vmul.f32 %v3139_v9, %v2839_v8  ;;  %v2844_v33 = vmul.f32 0.5, %v7374_v58  ;;  %v2843_v23 = vmul.f32 0.5, %v7381_v6  ;;  %v2845_v51 = vmul.f32 0.5, %v7393_v47  ;;  %v3392_v20 = vld [vmem:[%s6689_s12 + $0x50] sm:$0xff] (%p7972_p9)  ;;  %v3394_v13 = vld [vmem:[%s6689_s12 + $0x58] sm:$0xff] (%p7972_p9) }
 0x399   : > { %v4463_v3 = vpop.eup %4462  ;;  %3340 = vst [vmem:[%s6689_s12 + $0x2d0] sm:$0xff] %v3240_v12  ;;  %v3141_v7 = vadd.f32 1.0, %v4461_v36  ;;  %4476 = verf.f32 %v2949_v32  ;;  %v2846_v34 = vmul.f32 0.5, %v3837_v27  ;;  %v2848_v6 = vmul.f32 0.5, %v7400_v21  ;;  %v3376_v27 = vld [vmem:[%s6689_s12 + $0x10] sm:$0xff] (%p7972_p9)  ;;  %v3378_v21 = vld [vmem:[%s6689_s12 + $0x18] sm:$0xff] (%p7972_p9) }
 0x39a   : > { %v4465_v2 = vpop.eup %4464  ;;  %v3142_v0 = vadd.f32 1.0, %v4463_v3  ;;  %3339 = vst [vmem:[%s6689_s12 + $0x2c8] sm:$0xff] %v3239_v43  ;;  %v2847_v46 = vmul.f32 0.5, %v7406_v54  ;;  %v2849_v10 = vmul.f32 0.5, %v3888_v4  ;;  %3377 = vst [vmem:[%s7447_s14 + $0x10] sm:$0xff] (%p7972_p9), %v3376_v27  ;;  %v3384_v54 = vld [vmem:[%s6689_s12 + $0x30] sm:$0xff] (%p7972_p9) }
 0x39b   : > { %v3241_v18 = vmul.f32 %v3141_v7, %v2841_v44  ;;  %v3144_v35 = vadd.f32 1.0, %v4465_v2  ;;  %v4467_v38 = vpop.eup %4466  ;;  %3379 = vst [vmem:[%s7447_s14 + $0x18] sm:$0xff] (%p7972_p9), %v3378_v21  ;;  %3385 = vst [vmem:[%s7447_s14 + $0x90] sm:$0xff] (%p7972_p9), %v3384_v54  ;;  %v3396_v19 = vld [vmem:[%s6689_s12 + $0x60] sm:$0xff] (%p7972_p9)  ;;  %v3398_v49 = vld [vmem:[%s6689_s12 + $0x68] sm:$0xff] (%p7972_p9) }
 0x39c   : > { %v3242_v53 = vmul.f32 %v3142_v0, %v2842_v24  ;;  %v3143_v37 = vadd.f32 1.0, %v4467_v38  ;;  %3391 = vst [vmem:[%s7447_s14 + $0x108] sm:$0xff] (%p7972_p9), %v3390_v5  ;;  %3393 = vst [vmem:[%s7447_s14 + $0x110] sm:$0xff] (%p7972_p9), %v3392_v20  ;;  %v3400_v16 = vld [vmem:[%s6689_s12 + $0x70] sm:$0xff] (%p7972_p9)  ;;  %v3402_v57 = vld [vmem:[%s6689_s12 + $0x78] sm:$0xff] (%p7972_p9) }
 0x39d   : > { %3341 = vst [vmem:[%s6689_s12 + $0x2d8] sm:$0xff] %v3241_v18  ;;  %v3244_v52 = vmul.f32 %v3144_v35, %v2844_v33  ;;  %v4469_v26 = vpop.eup %4468  ;;  %3395 = vst [vmem:[%s7447_s14 + $0x118] sm:$0xff] (%p7972_p9), %v3394_v13  ;;  %v3404_v39 = vld [vmem:[%s6689_s12 + $0x80] sm:$0xff] (%p7972_p9)  ;;  %v3406_v1 = vld [vmem:[%s6689_s12 + $0x88] sm:$0xff] (%p7972_p9) }
 0x39e   : > { %3342 = vst [vmem:[%s6689_s12 + $0x2e0] sm:$0xff] %v3242_v53  ;;  %v4471_v56 = vpop.eup %4470  ;;  %v3243_v14 = vmul.f32 %v3143_v37, %v2843_v23  ;;  %v3145_v25 = vadd.f32 1.0, %v4469_v26  ;;  %3397 = vst [vmem:[%s7447_s14 + $0x180] sm:$0xff] (%p7972_p9), %v3396_v19  ;;  %v3408_v50 = vld [vmem:[%s6689_s12 + $0x90] sm:$0xff] (%p7972_p9)  ;;  %v3410_v11 = vld [vmem:[%s6689_s12 + $0x98] sm:$0xff] (%p7972_p9) }
 0x39f   : > { %3344 = vst [vmem:[%s6689_s12 + $0x2f0] sm:$0xff] %v3244_v52  ;;  %v4473_v58 = vpop.eup %4472  ;;  %v3146_v42 = vadd.f32 1.0, %v4471_v56  ;;  %3399 = vst [vmem:[%s7447_s14 + $0x188] sm:$0xff] (%p7972_p9), %v3398_v49  ;;  %v3412_v59 = vld [vmem:[%s6689_s12 + $0xa0] sm:$0xff] (%p7972_p9)  ;;  %v3414_v30 = vld [vmem:[%s6689_s12 + $0xa8] sm:$0xff] (%p7972_p9) }
 0x3a0   : > { %3343 = vst [vmem:[%s6689_s12 + $0x2e8] sm:$0xff] %v3243_v14  ;;  %v3245_v31 = vmul.f32 %v3145_v25, %v2845_v51  ;;  %v3148_v62 = vadd.f32 1.0, %v4473_v58  ;;  %v4475_v28 = vpop.eup %4474  ;;  %3401 = vst [vmem:[%s7447_s14 + $0x190] sm:$0xff] (%p7972_p9), %v3400_v16  ;;  %v3416_v4 = vld [vmem:[%s6689_s12 + $0xb0] sm:$0xff] (%p7972_p9)  ;;  %v3418_v12 = vld [vmem:[%s6689_s12 + $0xb8] sm:$0xff] (%p7972_p9) }
 0x3a1   : > { %v3246_v41 = vmul.f32 %v3146_v42, %v2846_v34  ;;  %v3147_v45 = vadd.f32 1.0, %v4475_v28  ;;  %3403 = vst [vmem:[%s7447_s14 + $0x198] sm:$0xff] (%p7972_p9), %v3402_v57  ;;  %3405 = vst [vmem:[%s7447_s14 + $0x200] sm:$0xff] (%p7972_p9), %v3404_v39  ;;  %v3420_v8 = vld [vmem:[%s6689_s12 + $0xc0] sm:$0xff] (%p7972_p9)  ;;  %v3422_v9 = vld [vmem:[%s6689_s12 + $0xc8] sm:$0xff] (%p7972_p9) }
 0x3a2   : > { %3345 = vst [vmem:[%s6689_s12 + $0x2f8] sm:$0xff] %v3245_v31  ;;  %v3248_v55 = vmul.f32 %v3148_v62, %v2848_v6  ;;  %3356 = sbr.rel (!%p7972_p9) target bundleno = 974 (0x3ce), region = 48  ;;  %3407 = vst [vmem:[%s7447_s14 + $0x208] sm:$0xff] (%p7972_p9), %v3406_v1  ;;  %v3424_v36 = vld [vmem:[%s6689_s12 + $0xd0] sm:$0xff] (%p7972_p9)  ;;  %v3426_v32 = vld [vmem:[%s6689_s12 + $0xd8] sm:$0xff] (%p7972_p9) }
 0x3a3   : > { %v4477_v60 = vpop.eup %4476  ;;  %3346 = vst [vmem:[%s6689_s12 + $0x300] sm:$0xf] %v3246_v41  ;;  %v3247_v22 = vmul.f32 %v3147_v45, %v2847_v46  ;;  %3409 = vst [vmem:[%s7447_s14 + $0x210] sm:$0xff] (%p7972_p9), %v3408_v50  ;;  %v3428_v3 = vld [vmem:[%s6689_s12 + $0xe0] sm:$0xff] (%p7972_p9)  ;;  %v3430_v43 = vld [vmem:[%s6689_s12 + $0xe8] sm:$0xff] (%p7972_p9) }
 0x3a4   : > { %3348 = vst [vmem:[%s6689_s12 + $0x310] sm:$0xf] %v3248_v55  ;;  %v3149_v17 = vadd.f32 1.0, %v4477_v60  ;;  %3411 = vst [vmem:[%s7447_s14 + $0x218] sm:$0xff] (%p7972_p9), %v3410_v11  ;;  %v3432_v44 = vld [vmem:[%s6689_s12 + $0xf0] sm:$0xff] (%p7972_p9)  ;;  %v3434_v7 = vld [vmem:[%s6689_s12 + $0xf8] sm:$0xff] (%p7972_p9) }
 0x3a5   : > { %3347 = vst [vmem:[%s6689_s12 + $0x308] sm:$0xf] %v3247_v22  ;;  %3413 = vst [vmem:[%s7447_s14 + $0x280] sm:$0xff] (%p7972_p9), %v3412_v59  ;;  %v3436_v2 = vld [vmem:[%s6689_s12 + $0x100] sm:$0xff] (%p7972_p9)  ;;  %v3438_v24 = vld [vmem:[%s6689_s12 + $0x108] sm:$0xff] (%p7972_p9) }
 0x3a6   : > { %v3249_v47 = vmul.f32 %v3149_v17, %v2849_v10  ;;  %3415 = vst [vmem:[%s7447_s14 + $0x288] sm:$0xff] (%p7972_p9), %v3414_v30  ;;  %3417 = vst [vmem:[%s7447_s14 + $0x290] sm:$0xff] (%p7972_p9), %v3416_v4  ;;  %v3440_v0 = vld [vmem:[%s6689_s12 + $0x110] sm:$0xff] (%p7972_p9)  ;;  %v3442_v18 = vld [vmem:[%s6689_s12 + $0x118] sm:$0xff] (%p7972_p9) }
 0x3a7   : > { %3419 = vst [vmem:[%s7447_s14 + $0x298] sm:$0xff] (%p7972_p9), %v3418_v12  ;;  %3421 = vst [vmem:[%s7447_s14 + $0x300] sm:$0xff] (%p7972_p9), %v3420_v8  ;;  %v3444_v33 = vld [vmem:[%s6689_s12 + $0x120] sm:$0xff] (%p7972_p9)  ;;  %v3446_v35 = vld [vmem:[%s6689_s12 + $0x128] sm:$0xff] (%p7972_p9) }
 0x3a8   : > { %3349 = vst [vmem:[%s6689_s12 + $0x318] sm:$0xf] %v3249_v47  ;;  %3423 = vst [vmem:[%s7447_s14 + $0x308] sm:$0xff] (%p7972_p9), %v3422_v9  ;;  %v3448_v38 = vld [vmem:[%s6689_s12 + $0x130] sm:$0xff] (%p7972_p9)  ;;  %v3450_v53 = vld [vmem:[%s6689_s12 + $0x138] sm:$0xff] (%p7972_p9) }
 0x3a9   : > { %3425 = vst [vmem:[%s7447_s14 + $0x310] sm:$0xff] %v3424_v36  ;;  %3427 = vst [vmem:[%s7447_s14 + $0x318] sm:$0xff] %v3426_v32  ;;  %v3452_v52 = vld [vmem:[%s6689_s12 + $0x140] sm:$0xff]  ;;  %v3454_v23 = vld [vmem:[%s6689_s12 + $0x148] sm:$0xff] }
 0x3aa   : > { %3429 = vst [vmem:[%s7447_s14 + $0x380] sm:$0xff] %v3428_v3  ;;  %3431 = vst [vmem:[%s7447_s14 + $0x388] sm:$0xff] %v3430_v43  ;;  %v3456_v37 = vld [vmem:[%s6689_s12 + $0x150] sm:$0xff]  ;;  %v3458_v26 = vld [vmem:[%s6689_s12 + $0x158] sm:$0xff] }
 0x3ab   : > { %3433 = vst [vmem:[%s7447_s14 + $0x390] sm:$0xff] %v3432_v44  ;;  %3435 = vst [vmem:[%s7447_s14 + $0x398] sm:$0xff] %v3434_v7  ;;  %v3460_v56 = vld [vmem:[%s6689_s12 + $0x160] sm:$0xff]  ;;  %v3462_v14 = vld [vmem:[%s6689_s12 + $0x168] sm:$0xff] }
 0x3ac   : > { %3437 = vst [vmem:[%s7447_s14 + $0x400] sm:$0xff] %v3436_v2  ;;  %3439 = vst [vmem:[%s7447_s14 + $0x408] sm:$0xff] %v3438_v24  ;;  %v3464_v51 = vld [vmem:[%s6689_s12 + $0x170] sm:$0xff]  ;;  %v3466_v25 = vld [vmem:[%s6689_s12 + $0x178] sm:$0xff] }
 0x3ad   : > { %3441 = vst [vmem:[%s7447_s14 + $0x410] sm:$0xff] %v3440_v0  ;;  %3443 = vst [vmem:[%s7447_s14 + $0x418] sm:$0xff] %v3442_v18  ;;  %v3468_v58 = vld [vmem:[%s6689_s12 + $0x180] sm:$0xff]  ;;  %v3470_v34 = vld [vmem:[%s6689_s12 + $0x188] sm:$0xff] }
 0x3ae   : > { %3445 = vst [vmem:[%s7447_s14 + $0x480] sm:$0xff] %v3444_v33  ;;  %3447 = vst [vmem:[%s7447_s14 + $0x488] sm:$0xff] %v3446_v35  ;;  %v3472_v42 = vld [vmem:[%s6689_s12 + $0x190] sm:$0xff]  ;;  %v3474_v31 = vld [vmem:[%s6689_s12 + $0x198] sm:$0xff] }
 0x3af   : > { %3449 = vst [vmem:[%s7447_s14 + $0x490] sm:$0xff] %v3448_v38  ;;  %3451 = vst [vmem:[%s7447_s14 + $0x498] sm:$0xff] %v3450_v53  ;;  %v3476_v6 = vld [vmem:[%s6689_s12 + $0x1a0] sm:$0xff]  ;;  %v3478_v62 = vld [vmem:[%s6689_s12 + $0x1a8] sm:$0xff] }
 0x3b0   : > { %3453 = vst [vmem:[%s7447_s14 + $0x500] sm:$0xff] %v3452_v52  ;;  %3455 = vst [vmem:[%s7447_s14 + $0x508] sm:$0xff] %v3454_v23  ;;  %v3480_v28 = vld [vmem:[%s6689_s12 + $0x1b0] sm:$0xff]  ;;  %v3482_v41 = vld [vmem:[%s6689_s12 + $0x1b8] sm:$0xff] }
 0x3b1   : > { %3457 = vst [vmem:[%s7447_s14 + $0x510] sm:$0xff] %v3456_v37  ;;  %3459 = vst [vmem:[%s7447_s14 + $0x518] sm:$0xff] %v3458_v26  ;;  %v3484_v55 = vld [vmem:[%s6689_s12 + $0x1c0] sm:$0xff]  ;;  %v3486_v46 = vld [vmem:[%s6689_s12 + $0x1c8] sm:$0xff] }
 0x3b2   : > { %3461 = vst [vmem:[%s7447_s14 + $0x580] sm:$0xff] %v3460_v56  ;;  %3463 = vst [vmem:[%s7447_s14 + $0x588] sm:$0xff] %v3462_v14  ;;  %v3488_v45 = vld [vmem:[%s6689_s12 + $0x1d0] sm:$0xff]  ;;  %v3490_v60 = vld [vmem:[%s6689_s12 + $0x1d8] sm:$0xff] }
 0x3b3   : > { %3465 = vst [vmem:[%s7447_s14 + $0x590] sm:$0xff] %v3464_v51  ;;  %3467 = vst [vmem:[%s7447_s14 + $0x598] sm:$0xff] %v3466_v25  ;;  %v3492_v22 = vld [vmem:[%s6689_s12 + $0x1e0] sm:$0xff]  ;;  %v3494_v10 = vld [vmem:[%s6689_s12 + $0x1e8] sm:$0xff] }
 0x3b4   : > { %3469 = vst [vmem:[%s7447_s14 + $0x600] sm:$0xff] %v3468_v58  ;;  %3471 = vst [vmem:[%s7447_s14 + $0x608] sm:$0xff] %v3470_v34  ;;  %v3496_v17 = vld [vmem:[%s6689_s12 + $0x1f0] sm:$0xff]  ;;  %v3498_v47 = vld [vmem:[%s6689_s12 + $0x1f8] sm:$0xff] }
 0x3b5   : > { %3473 = vst [vmem:[%s7447_s14 + $0x610] sm:$0xff] %v3472_v42  ;;  %3475 = vst [vmem:[%s7447_s14 + $0x618] sm:$0xff] %v3474_v31  ;;  %v3500_v63 = vld [vmem:[%s6689_s12 + $0x200] sm:$0xff]  ;;  %v3502_v40 = vld [vmem:[%s6689_s12 + $0x208] sm:$0xff] }
 0x3b6   : > { %3477 = vst [vmem:[%s7447_s14 + $0x680] sm:$0xff] %v3476_v6  ;;  %3479 = vst [vmem:[%s7447_s14 + $0x688] sm:$0xff] %v3478_v62  ;;  %v3504_v27 = vld [vmem:[%s6689_s12 + $0x210] sm:$0xff]  ;;  %v3506_v21 = vld [vmem:[%s6689_s12 + $0x218] sm:$0xff] }
 0x3b7   : > { %3481 = vst [vmem:[%s7447_s14 + $0x690] sm:$0xff] %v3480_v28  ;;  %3483 = vst [vmem:[%s7447_s14 + $0x698] sm:$0xff] %v3482_v41  ;;  %v3508_v61 = vld [vmem:[%s6689_s12 + $0x220] sm:$0xff]  ;;  %v3510_v15 = vld [vmem:[%s6689_s12 + $0x228] sm:$0xff] }
 0x3b8   : > { %3485 = vst [vmem:[%s7447_s14 + $0x700] sm:$0xff] %v3484_v55  ;;  %3487 = vst [vmem:[%s7447_s14 + $0x708] sm:$0xff] %v3486_v46  ;;  %v3512_v54 = vld [vmem:[%s6689_s12 + $0x230] sm:$0xff]  ;;  %v3514_v48 = vld [vmem:[%s6689_s12 + $0x238] sm:$0xff] }
 0x3b9   : > { %3489 = vst [vmem:[%s7447_s14 + $0x710] sm:$0xff] %v3488_v45  ;;  %3491 = vst [vmem:[%s7447_s14 + $0x718] sm:$0xff] %v3490_v60  ;;  %v3516_v29 = vld [vmem:[%s6689_s12 + $0x240] sm:$0xff]  ;;  %v3518_v5 = vld [vmem:[%s6689_s12 + $0x248] sm:$0xff] }
 0x3ba   : > { %3493 = vst [vmem:[%s7447_s14 + $0x780] sm:$0xff] %v3492_v22  ;;  %3495 = vst [vmem:[%s7447_s14 + $0x788] sm:$0xff] %v3494_v10  ;;  %v3520_v20 = vld [vmem:[%s6689_s12 + $0x250] sm:$0xff]  ;;  %v3522_v13 = vld [vmem:[%s6689_s12 + $0x258] sm:$0xff] }
 0x3bb   : > { %3497 = vst [vmem:[%s7447_s14 + $0x790] sm:$0xff] %v3496_v17  ;;  %3499 = vst [vmem:[%s7447_s14 + $0x798] sm:$0xff] %v3498_v47  ;;  %v3524_v19 = vld [vmem:[%s6689_s12 + $0x260] sm:$0xff]  ;;  %v3526_v49 = vld [vmem:[%s6689_s12 + $0x268] sm:$0xff] }
 0x3bc   : > { %3501 = vst [vmem:[%s7447_s14 + $0x800] sm:$0xff] %v3500_v63  ;;  %3503 = vst [vmem:[%s7447_s14 + $0x808] sm:$0xff] %v3502_v40  ;;  %v3528_v16 = vld [vmem:[%s6689_s12 + $0x270] sm:$0xff]  ;;  %v3530_v57 = vld [vmem:[%s6689_s12 + $0x278] sm:$0xff] }
 0x3bd   : > { %3505 = vst [vmem:[%s7447_s14 + $0x810] sm:$0xff] %v3504_v27  ;;  %3507 = vst [vmem:[%s7447_s14 + $0x818] sm:$0xff] %v3506_v21  ;;  %v3532_v39 = vld [vmem:[%s6689_s12 + $0x280] sm:$0xff]  ;;  %v3534_v1 = vld [vmem:[%s6689_s12 + $0x288] sm:$0xff] }
 0x3be   : > { %3509 = vst [vmem:[%s7447_s14 + $0x880] sm:$0xff] %v3508_v61  ;;  %3511 = vst [vmem:[%s7447_s14 + $0x888] sm:$0xff] %v3510_v15  ;;  %v3536_v50 = vld [vmem:[%s6689_s12 + $0x290] sm:$0xff]  ;;  %v3538_v11 = vld [vmem:[%s6689_s12 + $0x298] sm:$0xff] }
 0x3bf   : > { %3513 = vst [vmem:[%s7447_s14 + $0x890] sm:$0xff] %v3512_v54  ;;  %3515 = vst [vmem:[%s7447_s14 + $0x898] sm:$0xff] %v3514_v48  ;;  %v3540_v59 = vld [vmem:[%s6689_s12 + $0x2a0] sm:$0xff]  ;;  %v3542_v30 = vld [vmem:[%s6689_s12 + $0x2a8] sm:$0xff] }
 0x3c0   : > { %3517 = vst [vmem:[%s7447_s14 + $0x900] sm:$0xff] %v3516_v29  ;;  %3519 = vst [vmem:[%s7447_s14 + $0x908] sm:$0xff] %v3518_v5  ;;  %v3544_v4 = vld [vmem:[%s6689_s12 + $0x2b0] sm:$0xff]  ;;  %v3546_v12 = vld [vmem:[%s6689_s12 + $0x2b8] sm:$0xff] }
 0x3c1   : > { %3521 = vst [vmem:[%s7447_s14 + $0x910] sm:$0xff] %v3520_v20  ;;  %3523 = vst [vmem:[%s7447_s14 + $0x918] sm:$0xff] %v3522_v13  ;;  %v3548_v8 = vld [vmem:[%s6689_s12 + $0x2c0] sm:$0xff]  ;;  %v3550_v9 = vld [vmem:[%s6689_s12 + $0x2c8] sm:$0xff] }
 0x3c2   : > { %3525 = vst [vmem:[%s7447_s14 + $0x980] sm:$0xff] %v3524_v19  ;;  %3527 = vst [vmem:[%s7447_s14 + $0x988] sm:$0xff] %v3526_v49  ;;  %v3552_v36 = vld [vmem:[%s6689_s12 + $0x2d0] sm:$0xff]  ;;  %v3554_v32 = vld [vmem:[%s6689_s12 + $0x2d8] sm:$0xff] }
 0x3c3   : > { %3529 = vst [vmem:[%s7447_s14 + $0x990] sm:$0xff] %v3528_v16  ;;  %3531 = vst [vmem:[%s7447_s14 + $0x998] sm:$0xff] %v3530_v57  ;;  %v3556_v3 = vld [vmem:[%s6689_s12 + $0x2e0] sm:$0xff]  ;;  %v3558_v43 = vld [vmem:[%s6689_s12 + $0x2e8] sm:$0xff] }
 0x3c4   : > { %3533 = vst [vmem:[%s7447_s14 + $0xa00] sm:$0xff] %v3532_v39  ;;  %3535 = vst [vmem:[%s7447_s14 + $0xa08] sm:$0xff] %v3534_v1  ;;  %v3560_v44 = vld [vmem:[%s6689_s12 + $0x2f0] sm:$0xff]  ;;  %v3562_v7 = vld [vmem:[%s6689_s12 + $0x2f8] sm:$0xff] }
 0x3c5   : > { %3537 = vst [vmem:[%s7447_s14 + $0xa10] sm:$0xff] %v3536_v50  ;;  %3539 = vst [vmem:[%s7447_s14 + $0xa18] sm:$0xff] %v3538_v11  ;;  %v3564_v2 = vld [vmem:[%s6689_s12 + $0x300] sm:$0xff]  ;;  %v3566_v24 = vld [vmem:[%s6689_s12 + $0x308] sm:$0xff] }
 0x3c6   : > { %3541 = vst [vmem:[%s7447_s14 + $0xa80] sm:$0xff] %v3540_v59  ;;  %3543 = vst [vmem:[%s7447_s14 + $0xa88] sm:$0xff] %v3542_v30  ;;  %v3568_v0 = vld [vmem:[%s6689_s12 + $0x310] sm:$0xff]  ;;  %v3570_v18 = vld [vmem:[%s6689_s12 + $0x318] sm:$0xff] }
 0x3c7   : > { %3545 = vst [vmem:[%s7447_s14 + $0xa90] sm:$0xff] %v3544_v4  ;;  %3547 = vst [vmem:[%s7447_s14 + $0xa98] sm:$0xff] %v3546_v12 }
 0x3c8   : > { %3549 = vst [vmem:[%s7447_s14 + $0xb00] sm:$0xff] %v3548_v8  ;;  %3551 = vst [vmem:[%s7447_s14 + $0xb08] sm:$0xff] %v3550_v9 }
 0x3c9   : > { %3553 = vst [vmem:[%s7447_s14 + $0xb10] sm:$0xff] %v3552_v36  ;;  %3555 = vst [vmem:[%s7447_s14 + $0xb18] sm:$0xff] %v3554_v32 }
 0x3ca   : > { %3557 = vst [vmem:[%s7447_s14 + $0xb80] sm:$0xff] %v3556_v3  ;;  %3559 = vst [vmem:[%s7447_s14 + $0xb88] sm:$0xff] %v3558_v43 }
 0x3cb   : > { %3561 = vst [vmem:[%s7447_s14 + $0xb90] sm:$0xff] %v3560_v44  ;;  %3563 = vst [vmem:[%s7447_s14 + $0xb98] sm:$0xff] %v3562_v7 }
 0x3cc   : > { %3565 = vst [vmem:[%s7447_s14 + $0xc00] sm:$0xff] %v3564_v2  ;;  %3567 = vst [vmem:[%s7447_s14 + $0xc08] sm:$0xff] %v3566_v24 }
 0x3cd   : > { %3569 = vst [vmem:[%s7447_s14 + $0xc10] sm:$0xff] %v3568_v0  ;;  %3571 = vst [vmem:[%s7447_s14 + $0xc18] sm:$0xff] %v3570_v18 }
 0x3ce PF: > { %p15_p10 = scmp.ge.s32.totalorder %s4624_s23, 6   ;;  %s7973_s18 = smov %s4558_s19 }
 0x3cf   : > { %s7974_s19 = smov %s4562_s20  ;;  %s7975_s20 = smov %s4634_s26 }
 0x3d0   : > { %s7976_s21 = smov %s4624_s23  ;;  %17 = sbr.rel (!%p15_p10) target bundleno = 3 (0x3), region = 106 }
 0x3d7   :  { %3587 = vsyncpa [#allocation3], 1 }
 0x3d8   :  { %3589 = vsyncpa [#allocation3 + $0x1], 1 }

</bundles_post_ra>
